<compile_context>
chip_gen: v7x
topology: tpu7x:2x2x1
jax: 0.10.0
libtpu: 0.0.40
codegen_flags: <defaults>
</compile_context>

<pallas_src>
import math

import jax
import jax.numpy as jnp
from jax.experimental import pallas as pl
from jax.experimental.pallas import tpu as pltpu

_INV_SQRT2 = 1.0 / math.sqrt(2.0)


def _round_up(x, m):
    return ((x + m - 1) // m) * m


def _gelu_exact_f32(h):
    # torch.nn.GELU() default = exact erf-based GELU, computed in f32.
    return 0.5 * h * (1.0 + jax.lax.erf(h * _INV_SQRT2))


def _bspec(block_shape, index_map, *, single_buffer=False):
    """BlockSpec helper: request single buffering for constant-index blocks.

    Falls back to a plain (double-buffered) BlockSpec if this JAX version does
    not expose pipeline_mode / pl.Buffered.
    """
    if single_buffer:
        try:
            return pl.BlockSpec(block_shape, index_map,
                                pipeline_mode=pl.Buffered(1))
        except (TypeError, AttributeError):
            pass
    return pl.BlockSpec(block_shape, index_map)


# ----------------------------------------------------------------------------
# Kernels
# ----------------------------------------------------------------------------
def mlp_resident_kernel(x_ref, w1_ref, b1_ref, w2_ref, b2_ref, o_ref):
    """Row-tile MLP with both weight matrices fully resident in VMEM.

    Grid is (row tiles,). Weight/bias index_maps are constant, so Pallas keeps
    them in VMEM for the whole kernel (one HBM read total).
    """
    h = jnp.dot(x_ref[...], w1_ref[...], preferred_element_type=jnp.float32)
    h = _gelu_exact_f32(h + b1_ref[...].astype(jnp.float32))
    out = jnp.dot(h.astype(w2_ref.dtype), w2_ref[...],
                  preferred_element_type=jnp.float32)
    o_ref[...] = (out + b2_ref[...].astype(jnp.float32)).astype(o_ref.dtype)


def mlp_tiled_kernel(x_ref, w1_ref, b1_ref, w2_ref, b2_ref, o_ref, acc_ref):
    """Hidden-tiled fallback for weights that do not fit the VMEM budget.

    Grid is (row tiles, hidden tiles); the hidden axis is the reduction axis of
    the second matmul and is accumulated in an f32 VMEM scratch.
    """
    j = pl.program_id(1)

    @pl.when(j == 0)
    def _():
        acc_ref[...] = jnp.zeros_like(acc_ref)

    h = jnp.dot(x_ref[...], w1_ref[...], preferred_element_type=jnp.float32)
    h = _gelu_exact_f32(h + b1_ref[...].astype(jnp.float32))
    acc_ref[...] += jnp.dot(h.astype(w2_ref.dtype), w2_ref[...],
                            preferred_element_type=jnp.float32)

    @pl.when(j == pl.num_programs(1) - 1)
    def _():
        o_ref[...] = (acc_ref[...]
                      + b2_ref[...].astype(jnp.float32)).astype(o_ref.dtype)


# ----------------------------------------------------------------------------
# Sizing helpers
# ----------------------------------------------------------------------------
def _vmem_capacity_bytes():
    try:
        cap = int(pltpu.get_tpu_info().vmem_capacity_bytes)
        if cap > 0:
            return cap
    except Exception:
        pass
    return 64 * 1024 * 1024  # conservative default = v7x per-TensorCore VMEM


def _pick_tm(M, requested):
    """Row tile: multiple of 256 when possible, >=2 tiles for v7x megacore."""
    if M <= 128:
        return max(8, _round_up(M, 8))
    if M <= 256:
        return 128           # two 128-row tiles -> both v7x TensorCores get work
    if M <= 512:
        return 256
    tm = max(256, (min(int(requested), 1024) // 256) * 256)
    tm = min(tm, _round_up(M, 256))
    while tm > 256 and pl.cdiv(M, tm) < 2:
        tm -= 256
    return tm


def _resident_fits(dim, hidden, tm, itemsize, budget):
    weights = 2 * (2 * dim * hidden * itemsize)   # W1+W2 (conservative: 2 buffers)
    tiles = 2 * (2 * tm * dim * itemsize)         # x + out row tiles, double-buffered
    act = tm * hidden * 4                         # f32 hidden activation
    bias = 4 * (hidden + dim)
    return weights + tiles + act + bias <= budget


def _pick_th(dim, hidden, tm, itemsize, budget):
    """Largest lane-aligned divisor of hidden whose working set fits the budget."""
    cands = [c for c in (2048, 1024, 512, 256, 128)
             if c <= hidden and hidden % c == 0]
    if not cands:
        return hidden
    fixed = 2 * (2 * tm * dim * itemsize) + tm * dim * 4 + 4 * dim
    for c in cands:
        need = fixed + 2 * (2 * dim * c * itemsize) + 4 * c + tm * c * 4
        if need <= budget:
            return c
    return cands[-1]


# ----------------------------------------------------------------------------
# Wrapper
# ----------------------------------------------------------------------------
def mlp_forward(x, w1, b1, w2, b2, *, tm=512, th=None,
                compute_dtype=jnp.bfloat16, force_tiled=False,
                vmem_limit_bytes=None):
    """x: (B, N, dim). Weights stored as (in_features, out_features). Returns (B, N, dim)."""
    B, N, dim = x.shape
    hidden = w1.shape[1]
    M = B * N
    out_dtype = x.dtype

    cdt = jnp.dtype(compute_dtype) if compute_dtype is not None else jnp.dtype(x.dtype)
    itemsize = cdt.itemsize
    out_itemsize = jnp.dtype(out_dtype).itemsize

    cap = _vmem_capacity_bytes()
    budget = int(0.8 * cap) if vmem_limit_bytes is None else int(vmem_limit_bytes)

    tm = _pick_tm(M, tm)
    Mp = _round_up(M, tm)

    x2d = x.reshape(M, dim).astype(cdt)
    if Mp != M:
        x2d = jnp.pad(x2d, ((0, Mp - M), (0, 0)))
    w1c = w1.astype(cdt)
    w2c = w2.astype(cdt)
    b1_2d = b1.reshape(1, hidden).astype(jnp.float32)
    b2_2d = b2.reshape(1, dim).astype(jnp.float32)

    resident = (not force_tiled) and _resident_fits(dim, hidden, tm, itemsize, budget)

    if resident:
        grid = (Mp // tm,)
        cost = pl.CostEstimate(
            flops=4 * Mp * dim * hidden,
            transcendentals=Mp * hidden,
            bytes_accessed=(Mp * dim * (itemsize + out_itemsize)   # x in, out
                            + 2 * dim * hidden * itemsize          # W1 + W2 once
                            + 4 * (hidden + dim)),                 # biases
        )
        out2d = pl.pallas_call(
            mlp_resident_kernel,
            out_shape=jax.ShapeDtypeStruct((Mp, dim), out_dtype),
            grid_spec=pltpu.PrefetchScalarGridSpec(
                num_scalar_prefetch=0,
                grid=grid,
                in_specs=[
                    pl.BlockSpec((tm, dim), lambda i: (i, 0)),                      # x row tile
                    _bspec((dim, hidden), lambda i: (0, 0), single_buffer=True),    # W1 resident
                    _bspec((1, hidden), lambda i: (0, 0), single_buffer=True),      # b1
                    _bspec((hidden, dim), lambda i: (0, 0), single_buffer=True),    # W2 resident
                    _bspec((1, dim), lambda i: (0, 0), single_buffer=True),         # b2
                ],
                out_specs=pl.BlockSpec((tm, dim), lambda i: (i, 0)),
            ),
            compiler_params=pltpu.CompilerParams(
                dimension_semantics=("parallel",),
                vmem_limit_bytes=budget,
            ),
            cost_estimate=cost,
        )(x2d, w1c, b1_2d, w2c, b2_2d)
    else:
        if th is None:
            th = _pick_th(dim, hidden, tm, itemsize, budget)
        th = min(th, hidden)
        if hidden % th != 0 or th % 128 != 0:
            th = hidden
        grid = (Mp // tm, hidden // th)
        cost = pl.CostEstimate(
            flops=4 * Mp * dim * hidden,
            transcendentals=Mp * hidden,
            bytes_accessed=(Mp * dim * (itemsize + out_itemsize)
                            + grid[0] * 2 * dim * hidden * itemsize  # weights refetched per row tile
                            + 4 * (hidden + dim)),
        )
        out2d = pl.pallas_call(
            mlp_tiled_kernel,
            out_shape=jax.ShapeDtypeStruct((Mp, dim), out_dtype),
            grid_spec=pltpu.PrefetchScalarGridSpec(
                num_scalar_prefetch=0,
                grid=grid,
                in_specs=[
                    pl.BlockSpec((tm, dim), lambda i, j: (i, 0)),   # x row tile
                    pl.BlockSpec((dim, th), lambda i, j: (0, j)),   # W1 hidden tile
                    pl.BlockSpec((1, th), lambda i, j: (0, j)),     # b1 hidden tile
                    pl.BlockSpec((th, dim), lambda i, j: (j, 0)),   # W2 hidden tile
                    _bspec((1, dim), lambda i, j: (0, 0), single_buffer=True),  # b2 (constant)
                ],
                out_specs=pl.BlockSpec((tm, dim), lambda i, j: (i, 0)),
                scratch_shapes=[pltpu.VMEM((tm, dim), jnp.float32)],  # f32 accumulator
            ),
            compiler_params=pltpu.CompilerParams(
                dimension_semantics=("parallel", "arbitrary"),
                vmem_limit_bytes=budget,
            ),
            cost_estimate=cost,
        )(x2d, w1c, b1_2d, w2c, b2_2d)

    if Mp != M:
        out2d = out2d[:M]
    return out2d.reshape(B, N, dim)


def init_params(key, dim, hidden_dim, dtype=jnp.float32):
    """nn.Linear-style init (uniform +/- 1/sqrt(fan_in)); weights stored transposed."""
    k1, k2, k3, k4 = jax.random.split(key, 4)
    bound1 = 1.0 / math.sqrt(dim)
    bound2 = 1.0 / math.sqrt(hidden_dim)
    w1 = jax.random.uniform(k1, (dim, hidden_dim), dtype, -bound1, bound1)
    b1 = jax.random.uniform(k2, (hidden_dim,), dtype, -bound1, bound1)
    w2 = jax.random.uniform(k3, (hidden_dim, dim), dtype, -bound2, bound2)
    b2 = jax.random.uniform(k4, (dim,), dtype, -bound2, bound2)
    return w1, b1, w2, b2


def _reference(x, w1, b1, w2, b2, compute_dtype):
    """Pure-JAX reference matching the kernel's numerics (bf16 operands, f32 acc)."""
    dim = x.shape[-1]
    cdt = jnp.dtype(compute_dtype)
    x2 = x.reshape(-1, dim).astype(cdt)
    h = jnp.dot(x2, w1.astype(cdt), preferred_element_type=jnp.float32)
    h = _gelu_exact_f32(h + b1.astype(jnp.float32))
    out = jnp.dot(h.astype(cdt), w2.astype(cdt), preferred_element_type=jnp.float32)
    out = out + b2.astype(jnp.float32)
    return out.astype(x.dtype).reshape(x.shape)


if __name__ == "__main__":
    # Small, lane-dense shapes consistent with a ViT MLP block:
    # batch=2, seq=200, dim=256, hidden=1024. Exercises row padding (400 -> 512)
    # and two row tiles; the tiled fallback is also exercised explicitly below.
    B, N, dim, hidden_dim = 2, 200, 256, 1024

    key = jax.random.PRNGKey(0)
    kx, kp = jax.random.split(key)
    x = jax.random.normal(kx, (B, N, dim), dtype=jnp.float32)
    w1, b1, w2, b2 = init_params(kp, dim, hidden_dim)

    ref = _reference(x, w1, b1, w2, b2, jnp.bfloat16)

    # Resident-weight fast path (weights fit VMEM, weight DMA happens once).
    out_resident = mlp_forward(x, w1, b1, w2, b2)
    out_resident = jax.block_until_ready(out_resident)
    assert jnp.allclose(out_resident, ref, atol=2e-2, rtol=2e-2), \
        "resident-path mismatch vs reference"

    # Hidden-tiled fallback path (used when weights exceed the chip's VMEM budget).
    out_tiled = mlp_forward(x, w1, b1, w2, b2, th=512, force_tiled=True)
    out_tiled = jax.block_until_ready(out_tiled)
    assert jnp.allclose(out_tiled, ref, atol=2e-2, rtol=2e-2), \
        "tiled-path mismatch vs reference"

    print("KERNEL_OK")
</pallas_src>

<mosaic_0001>
module attributes {stable_mosaic.version = 11 : i64} {
  func.func @mlp_resident_kernel(%arg0: i32, %arg1: memref<256x256xbf16, #tpu.memory_space<vmem>>, %arg2: memref<256x1024xbf16, #tpu.memory_space<vmem>>, %arg3: memref<1x1024xf32, #tpu.memory_space<vmem>>, %arg4: memref<1024x256xbf16, #tpu.memory_space<vmem>>, %arg5: memref<1x256xf32, #tpu.memory_space<vmem>>, %arg6: memref<256x256xf32, #tpu.memory_space<vmem>>) attributes {dimension_semantics = [#tpu.dimension_semantics<parallel>], iteration_bounds = array<i64: 2>, scalar_prefetch = 0 : i64, scratch_operands = 0 : i64, tpu.core_type = #tpu.core_type<tc>, window_params = [{transform_indices = @transform_0, window_bounds = array<i64: 256, 256>}, {pipeline_mode = #tpu.pipeline_mode<synchronous>, transform_indices = @transform_1, window_bounds = array<i64: 256, 1024>}, {pipeline_mode = #tpu.pipeline_mode<synchronous>, transform_indices = @transform_2, window_bounds = array<i64: 1, 1024>}, {pipeline_mode = #tpu.pipeline_mode<synchronous>, transform_indices = @transform_3, window_bounds = array<i64: 1024, 256>}, {pipeline_mode = #tpu.pipeline_mode<synchronous>, transform_indices = @transform_4, window_bounds = array<i64: 1, 256>}, {transform_indices = @transform_5, window_bounds = array<i64: 256, 256>}]} {
    %c0 = arith.constant 0 : index
    %c0_0 = arith.constant 0 : index
    %0 = vector.load %arg1[%c0, %c0_0] : memref<256x256xbf16, #tpu.memory_space<vmem>>, vector<256x256xbf16>
    %c0_1 = arith.constant 0 : index
    %c0_2 = arith.constant 0 : index
    %1 = vector.load %arg2[%c0_1, %c0_2] : memref<256x1024xbf16, #tpu.memory_space<vmem>>, vector<256x1024xbf16>
    %cst = arith.constant dense<0.000000e+00> : vector<256x1024xf32>
    %2 = tpu.matmul %0, %1, %cst {dimension_numbers = #tpu.dot_dimension_numbers<[1], [0], [0], [1], [0, 0, 1, 1], [], []>} : vector<256x256xbf16>, vector<256x1024xbf16>, vector<256x1024xf32> -> vector<256x1024xf32>
    %c0_3 = arith.constant 0 : index
    %c0_4 = arith.constant 0 : index
    %3 = vector.load %arg3[%c0_3, %c0_4] : memref<1x1024xf32, #tpu.memory_space<vmem>>, vector<1x1024xf32>
    %4 = vector.broadcast %3 : vector<1x1024xf32> to vector<256x1024xf32>
    %5 = arith.addf %2, %4 : vector<256x1024xf32>
    %cst_5 = arith.constant 5.000000e-01 : f32
    %6 = vector.broadcast %cst_5 : f32 to vector<256x1024xf32>
    %7 = arith.mulf %6, %5 : vector<256x1024xf32>
    %cst_6 = arith.constant 0.707106769 : f32
    %8 = vector.broadcast %cst_6 : f32 to vector<256x1024xf32>
    %9 = arith.mulf %5, %8 : vector<256x1024xf32>
    %10 = math.erf %9 : vector<256x1024xf32>
    %cst_7 = arith.constant 1.000000e+00 : f32
    %11 = vector.broadcast %cst_7 : f32 to vector<256x1024xf32>
    %12 = arith.addf %11, %10 : vector<256x1024xf32>
    %13 = arith.mulf %7, %12 : vector<256x1024xf32>
    %14 = arith.truncf %13 : vector<256x1024xf32> to vector<256x1024xbf16>
    %c0_8 = arith.constant 0 : index
    %c0_9 = arith.constant 0 : index
    %15 = vector.load %arg4[%c0_8, %c0_9] : memref<1024x256xbf16, #tpu.memory_space<vmem>>, vector<1024x256xbf16>
    %cst_10 = arith.constant dense<0.000000e+00> : vector<256x256xf32>
    %16 = tpu.matmul %14, %15, %cst_10 {dimension_numbers = #tpu.dot_dimension_numbers<[1], [0], [0], [1], [0, 0, 1, 1], [], []>} : vector<256x1024xbf16>, vector<1024x256xbf16>, vector<256x256xf32> -> vector<256x256xf32>
    %c0_11 = arith.constant 0 : index
    %c0_12 = arith.constant 0 : index
    %17 = vector.load %arg5[%c0_11, %c0_12] : memref<1x256xf32, #tpu.memory_space<vmem>>, vector<1x256xf32>
    %18 = vector.broadcast %17 : vector<1x256xf32> to vector<256x256xf32>
    %19 = arith.addf %16, %18 : vector<256x256xf32>
    %c0_13 = arith.constant 0 : index
    %c0_14 = arith.constant 0 : index
    %20 = vector.load %arg6[%c0_13, %c0_14] : memref<256x256xf32, #tpu.memory_space<vmem>>, vector<256x256xf32>
    tpu.vector_store %arg6[%c0_13, %c0_14], %19 {strides = array<i32>} : memref<256x256xf32, #tpu.memory_space<vmem>>, vector<256x256xf32>,
    return
  }
  func.func @transform_0(%arg0: i32) -> (i32, i32) {
    %c0_i32 = arith.constant 0 : i32
    %c0_i32_0 = arith.constant 0 : i32
    return %arg0, %c0_i32 : i32, i32
  }
  func.func @transform_1(%arg0: i32) -> (i32, i32) {
    %c0_i32 = arith.constant 0 : i32
    %c0_i32_0 = arith.constant 0 : i32
    %c0_i32_1 = arith.constant 0 : i32
    return %c0_i32, %c0_i32_0 : i32, i32
  }
  func.func @transform_2(%arg0: i32) -> (i32, i32) {
    %c0_i32 = arith.constant 0 : i32
    %c0_i32_0 = arith.constant 0 : i32
    %c0_i32_1 = arith.constant 0 : i32
    return %c0_i32, %c0_i32_0 : i32, i32
  }
  func.func @transform_3(%arg0: i32) -> (i32, i32) {
    %c0_i32 = arith.constant 0 : i32
    %c0_i32_0 = arith.constant 0 : i32
    %c0_i32_1 = arith.constant 0 : i32
    return %c0_i32, %c0_i32_0 : i32, i32
  }
  func.func @transform_4(%arg0: i32) -> (i32, i32) {
    %c0_i32 = arith.constant 0 : i32
    %c0_i32_0 = arith.constant 0 : i32
    %c0_i32_1 = arith.constant 0 : i32
    return %c0_i32, %c0_i32_0 : i32, i32
  }
  func.func @transform_5(%arg0: i32) -> (i32, i32) {
    %c0_i32 = arith.constant 0 : i32
    %c0_i32_0 = arith.constant 0 : i32
    return %arg0, %c0_i32 : i32, i32
  }
}

</mosaic_0001>

<bundles_post_ra>
// kernel: tpu_custom_call.1
= control target key start
LH: loop header
LB: loop body
LE: loop exit
PB: predicated region body
PF: predicated region fallthrough
CT: control target
= control target key end

     0   :  { %10 = vsyncpa [#allocation3], 0  ;;  %s8962_s0 = inlined_call_operand.hbm [shape: bf16[512,256], index: 0, kind: input, shape index: {}]   ;;  %s8963_s1 = inlined_call_operand.hbm [shape: bf16[256,1024], index: 1, kind: input, shape index: {}]   ;;  %s8964_s2 = inlined_call_operand.hbm [shape: f32[1,1024], index: 2, kind: input, shape index: {}]   ;;  %s8965_s3 = inlined_call_operand.hbm [shape: bf16[1024,256], index: 3, kind: input, shape index: {}]   ;;  %s8966_s4 = inlined_call_operand.vmem [shape: f32[1,256], index: 4, kind: input, shape index: {}]   ;;  %s8967_s5 = inlined_call_operand.hbm [shape: f32[512,256], index: 5, kind: output, shape index: {}]  }
   0x1   :  { %12 = vsyncpa [#allocation3 + $0x1], 0 }
   0x2   :  { %13 = vsyncpa [#allocation6], 0 }
   0x3   :  { %14 = vsyncpa [#allocation9], 0 }
   0x4   :  { %15 = vsyncpa [#allocation4], 0 }
   0x5   :  { %17 = vsyncpa [#allocation4 + $0x1], 0  ;;  %s6906_s18 = smov 0   ;;  %s6908_s19 = smov 0  }
   0x6   :  { %s6910_s20 = smov 0   ;;  %s6912_s21 = smov 0  }
   0x7 LB: > { %s6927_s22 = sadd.s32 4294967295, %s6863_s21   ;;  %s5203_s23 = sadd.s32 4294967294, %s6863_s21   ;;  %s6863_s21 = sphi %s6912_s21, %s8990_s21   ;;  %s6859_s20 = sphi %s6910_s20, %s8989_s20   ;;  %s6855_s19 = sphi %s6908_s19, %s8988_s19   ;;  %s6851_s18 = sphi %s6906_s18, %s8987_s18  }
   0x8   : > { %p43_p0 = scmp.ne.s32.totalorder %s6855_s19, %s6851_s18  ;;  %p8968_p1 = scmp.eq.s32.totalorder %s6927_s22, 0 }
   0x9   : > { %p157_p3 = scmp.eq.s32.totalorder %s5203_s23, 1  ;;  %p5204_p5 = scmp.ge.s32.totalorder %s6863_s21, 1 }
   0xa   : > { %p6936_p4 = por %p8968_p1, %p43_p0  ;;  %p164_p7 = scmp.lt.s32.totalorder %s6863_s21, 3 }
   0xb   : > { %p6941_p6 = por %p157_p3, %p43_p0  ;;  %s6865_s27 = smov [#allocation5]  }
   0xc   : > { %s8971_s24 = scalar_select %p6936_p4, 1, 0 }
   0xd   : > { %s8972_s25 = scalar_select %p6941_p6, 1, 0 }
   0xe   : > { %p6946_p8 = pnand %p5204_p5, %p164_p7  ;;  %s176_s28 = sshll.u32 %s6865_s27, 4  ;;  %s6950_s28 = int_to_ptr.vmem [resolvable:$true] %s176_s28 }
   0xf   : > { %s6866_s30 = smov [#allocation7]   ;;  %s6867_s7 = smov [#allocation8]  }
  0x10   : > { %s8973_s26 = scalar_select %p6946_p8, 1, 0 }
  0x11   : > { %p5789_p9 = pneg %p6946_p8  ;;  %s190_s6 = sshll.u32 %s6866_s30, 4  ;;  %s6961_s6 = int_to_ptr.vmem [resolvable:$true] %s190_s6 }
  0x12   : > { %s6963_s8 = sshll.u32 %s6867_s7, 4  ;;  %s6675_s11 = scalar_lea.hbm %s8963_s1, 16384  ;;  %s201_s8 = int_to_ptr.vmem [resolvable:$true] %s6963_s8 }
  0x13   : > { %p6957_p11 = pnand %p5789_p9, %p8968_p1  ;;  %p6676_p12 = scmp.ne.s32.totalorder %s8963_s1, %s6675_s11 }
  0x14   : > { %p6682_p5 = scmp.lt.u32.totalorder %s6675_s11, %s8963_s1 }
  0x15   : > { %p6973_p13 = pneg %p6957_p11 }
  0x17   : > { %p6678_p0 = pnand %p6973_p13, %p6676_p12 }
  0x19   : > { %p6679_p3 = pneg %p6678_p0 }
  0x1b   : > { %p6684_p7 = pnand %p6682_p5, %p6679_p3 }
  0x1d   : > { %6687 = shalt.err (!%p6684_p7)
}
  0x1e   : > { %s6688_s17 = scalar_lea.vmem %s6950_s28, 16384  ;;  %p6696_p2 = scmp.lt.s32.totalorder %s6950_s28, %s6950_s28 }
  0x1f   : > { %p6689_p9 = scmp.ne.s32.totalorder %s6950_s28, %s6688_s17  ;;  %p6697_p6 = scmp.lt.s32.totalorder %s6688_s17, %s6688_s17 }
  0x21   : > { %p6691_p10 = pnand %p6689_p9, %p6973_p13  ;;  %p6698_p12 = por %p6697_p6, %p6696_p2 }
  0x23   : > { %p6692_p1 = pneg %p6691_p10 }
  0x25   : > { %p6699_p0 = pnand %p6698_p12, %p6692_p1 }
  0x27   : > { %6702 = shalt.err (!%p6699_p0)
}
  0x28   : > { %s6868_s23 = smov 512   ;;  %s6869_s27 = smov 32  }
  0x29   : > { %5792 = dma.hbm_to_vmem [thread:$0]  (!%p6957_p11), %s8963_s1, 16384, %s6950_s28, [#allocation6], %s6868_s23, %s6868_s23, %s6869_s27  }
  0x2a   : > { %s6703_s11 = scalar_lea.hbm %s8964_s2, 128 }
  0x2b   : > { %p6704_p2 = scmp.ne.s32.totalorder %s8964_s2, %s6703_s11  ;;  %p6710_p10 = scmp.lt.u32.totalorder %s6703_s11, %s8964_s2 }
  0x2d   : > { %p6706_p1 = pnand %p6704_p2, %p6973_p13 }
  0x2f   : > { %p6707_p6 = pneg %p6706_p1 }
  0x31   : > { %p6712_p3 = pnand %p6710_p10, %p6707_p6 }
  0x33   : > { %6715 = shalt.err (!%p6712_p3)
}
  0x34   : > { %s6716_s28 = scalar_lea.vmem %s6961_s6, 128  ;;  %p6724_p12 = scmp.lt.s32.totalorder %s6961_s6, %s6961_s6 }
  0x35   : > { %p6717_p5 = scmp.ne.s32.totalorder %s6961_s6, %s6716_s28  ;;  %p6725_p0 = scmp.lt.s32.totalorder %s6716_s28, %s6716_s28 }
  0x37   : > { %p6719_p7 = pnand %p6717_p5, %p6973_p13  ;;  %p6726_p2 = por %p6725_p0, %p6724_p12 }
  0x39   : > { %p6720_p9 = pneg %p6719_p7 }
  0x3b   : > { %p6727_p1 = pnand %p6726_p2, %p6720_p9 }
  0x3d   : > { %6730 = shalt.err (!%p6727_p1)
}
  0x3e   : > { %5795 = dma.hbm_to_vmem [thread:$0]  (!%p6957_p11), %s8964_s2, 128, %s6961_s6, [#allocation6]  }
  0x3f   : > { %s6731_s7 = scalar_lea.hbm %s8965_s3, 16384 }
  0x40   : > { %p6732_p6 = scmp.ne.s32.totalorder %s8965_s3, %s6731_s7  ;;  %p6738_p5 = scmp.lt.u32.totalorder %s6731_s7, %s8965_s3 }
  0x42   : > { %p6734_p10 = pnand %p6732_p6, %p6973_p13 }
  0x44   : > { %p6735_p3 = pneg %p6734_p10 }
  0x46   : > { %p6740_p7 = pnand %p6738_p5, %p6735_p3 }
  0x48   : > { %6743 = shalt.err (!%p6740_p7)
}
  0x49   : > { %s6744_s13 = scalar_lea.vmem %s201_s8, 16384  ;;  %p6752_p2 = scmp.lt.s32.totalorder %s201_s8, %s201_s8 }
  0x4a   : > { %p6745_p9 = scmp.ne.s32.totalorder %s201_s8, %s6744_s13  ;;  %p6753_p1 = scmp.lt.s32.totalorder %s6744_s13, %s6744_s13 }
  0x4c   : > { %p6747_p12 = pnand %p6745_p9, %p6973_p13  ;;  %p6754_p4 = por %p6753_p1, %p6752_p2 }
  0x4e   : > { %p6748_p0 = pneg %p6747_p12 }
  0x50   : > { %p6755_p8 = pnand %p6754_p4, %p6748_p0 }
  0x52   : > { %6758 = shalt.err (!%p6755_p8)
}
  0x53   : > { %s6870_s6 = smov 128   ;;  %s6871_s14 = smov 8  }
  0x54   : > { %5798 = dma.hbm_to_vmem [thread:$0]  (!%p6957_p11), %s8965_s3, 16384, %s201_s8, [#allocation9], %s6870_s6, %s6870_s6, %s6871_s14  }
  0x55   : > { %s7040_s28 = sadd.s32 1, %s6863_s21   ;;  %s30_s23 = sadd.s32 1, %s6859_s20 }
  0x56   : > { %s27_s17 = ssub.s32 %s6863_s21, %s7040_s28  ;;  %p37_p8 = scmp.ne.s32.totalorder %s6859_s20, %s6855_s19 }
  0x57   : > { %p28_p4 = scmp.eq.s32.totalorder %s27_s17, 0  ;;  %p38_p13 = scmp.eq.s32.totalorder %s6863_s21, 0 }
  0x58   : > { %p5810_p6 = scmp.lt.s32.totalorder %s6863_s21, 2  ;;  %p8976_p3 = scmp.eq.s32.totalorder %s6927_s22, 1 }
  0x59   : > { %s7050_s27 = scalar_select %p28_p4, %s6859_s20, %s30_s23  }
  0x5a   : > { %p39_p10 = por %p38_p13, %p37_p8  ;;  %p7054_p5 = por %p8976_p3, %p37_p8 }
  0x5b   : > { %s217_s30 = sand.u32 1, %s6859_s20   ;;  %s5514_s7 = sshll.u32 %s6863_s21, 12 }
  0x5c   : > { %s5209_s8 = sshll.u32 %s217_s30, 8  ;;  %s7063_s11 = scalar_lea.hbm %s8962_s0, %s5514_s7 }
  0x5d   : > { %s221_s12 = scalar_lea.vmem [#allocation2], %s5209_s8  ;;  %p7065_p11 = pnand %p5810_p6, %p39_p10 }
  0x5e   : > { %s229_s13 = sshll.u32 %s221_s12, 4  ;;  %s7071_s16 = scalar_lea.sflag [#allocation3], %s217_s30  ;;  %s7069_s13 = int_to_ptr.vmem [resolvable:$true] %s229_s13 }
  0x5f   : > { %s6759_s17 = scalar_lea.hbm %s7063_s11, 4096  ;;  %p6761_p9 = pneg %p7065_p11 }
  0x60   : > { %p6760_p7 = scmp.ne.s32.totalorder %s7063_s11, %s6759_s17  ;;  %s6764_s8 = scalar_lea.hbm %s8962_s0, 8192 }
  0x61   : > { %p6765_p2 = scmp.lt.u32.totalorder %s7063_s11, %s8962_s0  ;;  %p6766_p1 = scmp.lt.u32.totalorder %s6764_s8, %s6759_s17 }
  0x62   : > { %p6762_p12 = pnand %p6761_p9, %p6760_p7  ;;  %p6768_p8 = scmp.lt.u32.totalorder %s6759_s17, %s7063_s11 }
  0x63   : > { %p6767_p4 = por %p6766_p1, %p6765_p2 }
  0x64   : > { %p6763_p0 = pneg %p6762_p12 }
  0x65   : > { %p6769_p13 = por %p6768_p8, %p6767_p4 }
  0x67   : > { %p6770_p6 = pnand %p6769_p13, %p6763_p0 }
  0x69   : > { %6773 = shalt.err (!%p6770_p6)
}
  0x6a   : > { %s6774_s30 = scalar_lea.vmem %s7069_s13, 4096  ;;  %s6872_s12 = smov [#allocation2]  }
  0x6b   : > { %p6775_p10 = scmp.ne.s32.totalorder %s7069_s13, %s6774_s30  ;;  %s6779_s23 = sshll.u32 %s6872_s12, 4  ;;  %s6780_s23 = int_to_ptr.vmem [resolvable:$false] %s6779_s23 }
  0x6c   : > { %s6781_s7 = scalar_lea.vmem %s6780_s23, 8192  ;;  %p6782_p12 = scmp.lt.s32.totalorder %s7069_s13, %s6780_s23 }
  0x6d   : > { %p6777_p3 = pnand %p6775_p10, %p6761_p9  ;;  %p6783_p2 = scmp.lt.s32.totalorder %s6781_s7, %s6774_s30 }
  0x6f   : > { %p6778_p7 = pneg %p6777_p3  ;;  %p6784_p1 = por %p6783_p2, %p6782_p12 }
  0x71   : > { %p6785_p4 = pnand %p6784_p1, %p6778_p7 }
  0x73   : > { %6788 = shalt.err (!%p6785_p4)
}
  0x74   : > { %5802 = dma.hbm_to_vmem [thread:$0]  (!%p7065_p11), %s7063_s11, 4096, %s7069_s13, %s7071_s16, %s6870_s6, %s6870_s6, %s6871_s14  }
  0x75   : > { %p8979_p9 = scmp.ne.s32.totalorder %s8973_s26, 0 }
  0x76   : > { %s7105_s17 = sand.u32 (!%p8979_p9), 1, %s6855_s19   ;;  %p8980_p0 = scmp.ne.s32.totalorder (!%p8979_p9), %s8971_s24, 0 }
  0x77   : > { %241 = sbr.rel (%p8979_p9) target bundleno = 1175 (0x497), region = 40  ;;  %s5214_s8 = sshll.u32 (!%p8979_p9), %s7105_s17, 8 }
  0x78   : > { %s244_s9 = scalar_lea.sflag (!%p8979_p9), [#allocation3], %s7105_s17  ;;  %s7109_s10 = scalar_lea.vmem (!%p8979_p9), [#allocation2], %s5214_s8 }
  0x7e   : > { %6834 = dma.done.wait (%p8980_p0), %s244_s9, 4096  }
  0x7f   : > { %6836 = vsyncadd (%p8980_p0), %s244_s9, 4294963200  ;;  %p8981_p11 = scmp.eq.s32.totalorder %s6927_s22, 0 }
  0x81   : > { %6838 = dma.done.wait (%p8981_p11), [#allocation6], 16512   ;;  %p8982_p8 = pmov %p8981_p11 }
  0x83   : > { %6840 = vsyncadd (%p8982_p8), [#allocation6], 4294950784  ;;  %p8983_p13 = pmov %p8982_p8 }
  0x84   : > { %p8984_p6 = pmov %p8982_p8 }
  0x85   : > { %6842 = dma.done.wait (%p8983_p13), [#allocation9], 16384  }
  0x86   : > { %6844 = vsyncadd (%p8984_p6), [#allocation9], 4294950912  ;;  %v320_v0 = vld [vmem:[#allocation5] sm:$0xff]  ;;  %v321_v63 = vld [vmem:[#allocation5 + $0x8] sm:$0xff]  ;;  %s5218_s6 = sshll.u32 %s7105_s17, 9  ;;  %s5516_s11 = sshll.u32 %s6927_s22, 13 }
  0x87   : > { %v324_v1 = vld [vmem:[#allocation5 + $0x20] sm:$0xff]  ;;  %s8783_s14 = scalar_lea.vmem [#allocation10], %s5218_s6  ;;  %s8912_s30 = scalar_lea.hbm %s8967_s5, %s5516_s11 }
  0x88   : > { %v328_v2 = vld [vmem:[#allocation5 + $0x40] sm:$0xff]  ;;  %v5252_v3 = vcombine.high %v320_v0, %v324_v1  ;;  %v5251_v4 = vcombine.low %v320_v0, %v324_v1  ;;  %v325_v0 = vld [vmem:[#allocation5 + $0x28] sm:$0xff]  ;;  %s5101_s13 = sshll.u32 %s8783_s14, 4  ;;  %s5087_s22 = scalar_lea.sflag [#allocation4], %s7105_s17  ;;  %s8914_s13 = int_to_ptr.vmem [resolvable:$true] %s5101_s13 }
  0x89   : > { %v332_v5 = vld [vmem:[#allocation5 + $0x60] sm:$0xff]  ;;  %s6789_s12 = scalar_lea.vmem %s8914_s13, 8192  ;;  %s6873_s23 = smov [#allocation10]  }
  0x8a   : > { %v5260_v6 = vcombine.high %v328_v2, %v332_v5  ;;  %v336_v7 = vld [vmem:[#allocation5 + $0x80] sm:$0xff]  ;;  %1290 = vmatprep.subr.bf16.mxu1 %v5252_v3  ;;  %v5259_v9 = vcombine.low %v328_v2, %v332_v5  ;;  %v329_v3 = vld [vmem:[#allocation5 + $0x48] sm:$0xff]  ;;  %p6790_p10 = scmp.ne.s32.totalorder %s8914_s13, %s6789_s12  ;;  %s6793_s7 = sshll.u32 %s6873_s23, 4  ;;  %s6794_s7 = int_to_ptr.vmem [resolvable:$false] %s6793_s7 }
  0x8b   : > { %v340_v8 = vld [vmem:[#allocation5 + $0xa0] sm:$0xff]  ;;  %1291 = vmatpush1.bf16.msra.mxu1 %v5251_v4  ;;  %v333_v4 = vld [vmem:[#allocation5 + $0x68] sm:$0xff]  ;;  %s6795_s8 = scalar_lea.vmem %s6794_s7, 16384  ;;  %p6796_p12 = scmp.lt.s32.totalorder %s8914_s13, %s6794_s7 }
  0x8c   : > { %1292 = vmatprep.subr.bf16.mxu1 %v5260_v6  ;;  %v5268_v10 = vcombine.high %v336_v7, %v340_v8  ;;  %v344_v11 = vld [vmem:[#allocation5 + $0xc0] sm:$0xff]  ;;  %v5267_v13 = vcombine.low %v336_v7, %v340_v8  ;;  %v5254_v6 = vcombine.high %v321_v63, %v325_v0  ;;  %v7131_v7 = vld [vmem:[%s7109_s10 + $0x14] ss:$8 sps:$4 sm:$0xff]   ;;  %v5253_v8 = vcombine.low %v321_v63, %v325_v0  ;;  %v417_v0 = vld [vmem:[#allocation5 + $0x308] sm:$0xff]  ;;  %p6791_p3 = pnand %p6790_p10, %p7054_p5  ;;  %p6797_p2 = scmp.lt.s32.totalorder %s6795_s8, %s6789_s12 }
  0x8d   : > { %v348_v12 = vld [vmem:[#allocation5 + $0xe0] sm:$0xff] }
  0x8e   : > { %v5276_v14 = vcombine.high %v344_v11, %v348_v12  ;;  %v352_v15 = vld [vmem:[#allocation5 + $0x100] sm:$0xff]  ;;  %v5275_v18 = vcombine.low %v344_v11, %v348_v12  ;;  %v5262_v11 = vcombine.high %v329_v3, %v333_v4  ;;  %v7134_v12 = vld [vmem:[#allocation5 + $0x10] sm:$0xff]  ;;  %p6792_p7 = pneg %p6791_p3  ;;  %p6798_p1 = por %p6797_p2, %p6796_p12 }
  0x8f   : > { %1293 = vmatpush1.bf16.msra.mxu1 %v5259_v9  ;;  %v356_v16 = vld [vmem:[#allocation5 + $0x120] sm:$0xff]  ;;  %v337_v9 = vld [vmem:[#allocation5 + $0x88] sm:$0xff] }
  0x90   : > { %1294 = vmatprep.subr.bf16.mxu1 %v5268_v10  ;;  %v7124_v17 = vld [vmem:[%s7109_s10 + $0x4] ss:$8 sps:$4 sm:$0xff]   ;;  %v5284_v19 = vcombine.high %v352_v15, %v356_v16  ;;  %v5283_v22 = vcombine.low %v352_v15, %v356_v16  ;;  %v7128_v5 = vld [vmem:[%s7109_s10] ss:$8 sps:$4 sm:$0xff]   ;;  %p6799_p4 = pnand %p6798_p1, %p6792_p7 }
  0x91   : > { %1322 = vmatprep.mubr.bf16.mxu1 %v7124_v17  ;;  %v360_v20 = vld [vmem:[#allocation5 + $0x140] sm:$0xff]  ;;  %v341_v10 = vld [vmem:[#allocation5 + $0xa8] sm:$0xff] }
  0x92   : > { %v364_v21 = vld [vmem:[#allocation5 + $0x160] sm:$0xff]  ;;  %v345_v15 = vld [vmem:[#allocation5 + $0xc8] sm:$0xff] }
  0x93   : > { %1295 = vmatpush1.bf16.msra.mxu1 %v5267_v13  ;;  %v5292_v23 = vcombine.high %v360_v20, %v364_v21  ;;  %v368_v24 = vld [vmem:[#allocation5 + $0x180] sm:$0xff]  ;;  %v5291_v26 = vcombine.low %v360_v20, %v364_v21  ;;  %v7136_v13 = vld [vmem:[#allocation5 + $0x30] sm:$0xff]  ;;  %v349_v16 = vld [vmem:[#allocation5 + $0xe8] sm:$0xff]  ;;  %v5270_v20 = vcombine.high %v337_v9, %v341_v10 }
  0x94   : > { %1296 = vmatprep.subr.bf16.mxu1 %v5276_v14  ;;  %v372_v25 = vld [vmem:[#allocation5 + $0x1a0] sm:$0xff]  ;;  %v5261_v14 = vcombine.low %v329_v3, %v333_v4  ;;  %v5906_v4 = vld [vmem:[#allocation8] ss:$8 sps:$4 sm:$0xff]  }
  0x95   : > { %v5300_v27 = vcombine.high %v368_v24, %v372_v25  ;;  %v376_v28 = vld [vmem:[#allocation5 + $0x1c0] sm:$0xff]  ;;  %v5299_v30 = vcombine.low %v368_v24, %v372_v25  ;;  %v357_v24 = vld [vmem:[#allocation5 + $0x128] sm:$0xff]  ;;  %v5278_v25 = vcombine.high %v345_v15, %v349_v16 }
  0x96   : > { %v380_v29 = vld [vmem:[#allocation5 + $0x1e0] sm:$0xff] }
  0x97   : > { %1297 = vmatpush1.bf16.msra.mxu1 %v5275_v18  ;;  %v5308_v31 = vcombine.high %v376_v28, %v380_v29  ;;  %v384_v32 = vld [vmem:[#allocation5 + $0x200] sm:$0xff]  ;;  %v5307_v34 = vcombine.low %v376_v28, %v380_v29  ;;  %v5255_v18 = vcombine.low %v7134_v12, %v7136_v13  ;;  %v365_v28 = vld [vmem:[#allocation5 + $0x168] sm:$0xff] }
  0x98   : > { %1298 = vmatprep.subr.bf16.mxu1 %v5284_v19  ;;  %v388_v33 = vld [vmem:[#allocation5 + $0x220] sm:$0xff]  ;;  %v7142_v19 = vld [vmem:[%s7109_s10 + $0x10] ss:$8 sps:$4 sm:$0xff]  }
  0x99   : > { %v5316_v35 = vcombine.high %v384_v32, %v388_v33  ;;  %v392_v36 = vld [vmem:[#allocation5 + $0x240] sm:$0xff]  ;;  %v5315_v38 = vcombine.low %v384_v32, %v388_v33  ;;  %v369_v33 = vld [vmem:[#allocation5 + $0x188] sm:$0xff] }
  0x9a   : > { %v396_v37 = vld [vmem:[#allocation5 + $0x260] sm:$0xff] }
  0x9b   : > { %1299 = vmatpush1.bf16.msra.mxu1 %v5283_v22  ;;  %v5324_v39 = vcombine.high %v392_v36, %v396_v37  ;;  %v400_v40 = vld [vmem:[#allocation5 + $0x280] sm:$0xff]  ;;  %v5323_v42 = vcombine.low %v392_v36, %v396_v37  ;;  %v5269_v22 = vcombine.low %v337_v9, %v341_v10  ;;  %v377_v37 = vld [vmem:[#allocation5 + $0x1c8] sm:$0xff] }
  0x9c   : > { %1300 = vmatprep.subr.bf16.mxu1 %v5292_v23  ;;  %v404_v41 = vld [vmem:[#allocation5 + $0x2a0] sm:$0xff]  ;;  %v353_v23 = vld [vmem:[#allocation5 + $0x108] sm:$0xff] }
  0x9d   : > { %v5332_v43 = vcombine.high %v400_v40, %v404_v41  ;;  %v408_v44 = vld [vmem:[#allocation5 + $0x2c0] sm:$0xff]  ;;  %v5331_v46 = vcombine.low %v400_v40, %v404_v41  ;;  %v5285_v32 = vcombine.low %v353_v23, %v357_v24  ;;  %v7158_v40 = vld [vmem:[%s7109_s10 + $0x30] ss:$8 sps:$4 sm:$0xff]   ;;  %v429_v9 = vld [vmem:[#allocation5 + $0x368] sm:$0xff] }
  0x9e   : > { %v412_v45 = vld [vmem:[#allocation5 + $0x2e0] sm:$0xff] }
  0x9f   : > { %1301 = vmatpush1.bf16.msra.mxu1 %v5291_v26  ;;  %v416_v47 = vld [vmem:[#allocation5 + $0x300] sm:$0xff]  ;;  %v5340_v49 = vcombine.high %v408_v44, %v412_v45  ;;  %v5339_v50 = vcombine.low %v408_v44, %v412_v45  ;;  %v5277_v26 = vcombine.low %v345_v15, %v349_v16  ;;  %v385_v44 = vld [vmem:[#allocation5 + $0x208] sm:$0xff] }
  0xa0   : > { %1302 = vmatprep.subr.bf16.mxu1 %v5300_v27  ;;  %v420_v48 = vld [vmem:[#allocation5 + $0x320] sm:$0xff]  ;;  %v361_v27 = vld [vmem:[#allocation5 + $0x148] sm:$0xff] }
  0xa1   : > { %v424_v51 = vld [vmem:[#allocation5 + $0x340] sm:$0xff]  ;;  %v5348_v53 = vcombine.high %v416_v47, %v420_v48  ;;  %v5347_v54 = vcombine.low %v416_v47, %v420_v48  ;;  %v5293_v36 = vcombine.low %v361_v27, %v365_v28  ;;  %v389_v45 = vld [vmem:[#allocation5 + $0x228] sm:$0xff] }
  0xa2   : > { %v428_v52 = vld [vmem:[#allocation5 + $0x360] sm:$0xff]  ;;  %v5318_v47 = vcombine.high %v385_v44, %v389_v45  ;;  %v393_v48 = vld [vmem:[#allocation5 + $0x248] sm:$0xff] }
  0xa3   : > { %1303 = vmatpush1.bf16.msra.mxu1 %v5299_v30  ;;  %v432_v55 = vld [vmem:[#allocation5 + $0x380] sm:$0xff]  ;;  %v5356_v57 = vcombine.high %v424_v51, %v428_v52  ;;  %v5355_v58 = vcombine.low %v424_v51, %v428_v52  ;;  %v5286_v30 = vcombine.high %v353_v23, %v357_v24  ;;  %v7169_v51 = vld [vmem:[%s7109_s10 + $0x54] ss:$8 sps:$4 sm:$0xff]   ;;  %v5317_v52 = vcombine.low %v385_v44, %v389_v45  ;;  %v433_v16 = vld [vmem:[#allocation5 + $0x388] sm:$0xff] }
  0xa4   : > { %1304 = vmatprep.subr.bf16.mxu1 %v5308_v31  ;;  %v436_v56 = vld [vmem:[#allocation5 + $0x3a0] sm:$0xff]  ;;  %v7153_v31 = vld [vmem:[%s7109_s10 + $0x34] ss:$8 sps:$4 sm:$0xff]  }
  0xa5   : > { %v440_v59 = vld [vmem:[#allocation5 + $0x3c0] sm:$0xff]  ;;  %v5364_v61 = vcombine.high %v432_v55, %v436_v56  ;;  %v5363_v62 = vcombine.low %v432_v55, %v436_v56  ;;  %v405_v55 = vld [vmem:[#allocation5 + $0x2a8] sm:$0xff]  ;;  %v7203_v45 = vld [vmem:[%s7109_s10 + $0x94] ss:$8 sps:$4 sm:$0xff]  }
  0xa6   : > { %v444_v60 = vld [vmem:[#allocation5 + $0x3e0] sm:$0xff] }
  0xa7   : > { %1305 = vmatpush1.bf16.msra.mxu1 %v5307_v34  ;;  %v5372_v1 = vcombine.high %v440_v59, %v444_v60  ;;  %v5371_v2 = vcombine.low %v440_v59, %v444_v60  ;;  %v7145_v21 = vld [vmem:[%s7109_s10 + $0x24] ss:$8 sps:$4 sm:$0xff]   ;;  %v7150_v29 = vld [vmem:[%s7109_s10 + $0x20] ss:$8 sps:$4 sm:$0xff]   ;;  %v7174_v60 = vld [vmem:[%s7109_s10 + $0x50] ss:$8 sps:$4 sm:$0xff]  }
  0xa8   : > { %1306 = vmatprep.subr.bf16.mxu1 %v5316_v35  ;;  %v373_v34 = vld [vmem:[#allocation5 + $0x1a8] sm:$0xff]  ;;  %v5294_v35 = vcombine.high %v361_v27, %v365_v28  ;;  %v5909_v23 = vld [vmem:[#allocation8 + $0x10] ss:$8 sps:$4 sm:$0xff]  }
  0xa9   : > { %v7161_v41 = vld [vmem:[%s7109_s10 + $0x44] ss:$8 sps:$4 sm:$0xff]   ;;  %v7182_v10 = vld [vmem:[%s7109_s10 + $0x60] ss:$8 sps:$4 sm:$0xff]  }
  0xaa   : > { %v413_v59 = vld [vmem:[#allocation5 + $0x2e8] sm:$0xff] }
  0xab   : > { %1307 = vmatpush1.bf16.msra.mxu1 %v5315_v38  ;;  %v381_v38 = vld [vmem:[#allocation5 + $0x1e8] sm:$0xff] }
  0xac   : > { %1308 = vmatprep.subr.bf16.mxu1 %v5324_v39  ;;  %v5302_v39 = vcombine.high %v369_v33, %v373_v34  ;;  %v441_v27 = vld [vmem:[#allocation5 + $0x3c8] sm:$0xff] }
  0xad   : > { %v445_v28 = vld [vmem:[#allocation5 + $0x3e8] sm:$0xff] }
  0xae   : > { %v7200_v44 = vld [vmem:[%s7109_s10 + $0x80] ss:$8 sps:$4 sm:$0xff]  }
  0xaf   : > { %1309 = vmatpush1.bf16.msra.mxu1 %v5323_v42  ;;  %v5301_v42 = vcombine.low %v369_v33, %v373_v34  ;;  %v7193_v33 = vld [vmem:[%s7109_s10 + $0x84] ss:$8 sps:$4 sm:$0xff]  }
  0xb0   : > { %1310 = vmatprep.subr.bf16.mxu1 %v5332_v43  ;;  %v5310_v43 = vcombine.high %v377_v37, %v381_v38 }
  0xb3   : > { %1311 = vmatpush1.bf16.msra.mxu1 %v5331_v46  ;;  %v5309_v46 = vcombine.low %v377_v37, %v381_v38  ;;  %v5915_v37 = vld [vmem:[#allocation8 + $0x30] ss:$8 sps:$4 sm:$0xff]   ;;  %v5373_v38 = vcombine.low %v441_v27, %v445_v28 }
  0xb4   : > { %1312 = vmatprep.subr.bf16.mxu1 %v5340_v49  ;;  %v397_v49 = vld [vmem:[#allocation5 + $0x268] sm:$0xff] }
  0xb5   : > { %v5325_v56 = vcombine.low %v393_v48, %v397_v49 }
  0xb7   : > { %1313 = vmatpush1.bf16.msra.mxu1 %v5339_v50  ;;  %v7166_v50 = vld [vmem:[%s7109_s10 + $0x40] ss:$8 sps:$4 sm:$0xff]  }
  0xb8   : > { %1314 = vmatprep.subr.bf16.mxu1 %v5348_v53  ;;  %v5326_v53 = vcombine.high %v393_v48, %v397_v49  ;;  %v5922_v48 = vld [vmem:[#allocation8 + $0x64] ss:$8 sps:$4 sm:$0xff]   ;;  %v5924_v49 = vld [vmem:[#allocation8 + $0x60] ss:$8 sps:$4 sm:$0xff]  }
  0xbb   : > { %1315 = vmatpush1.bf16.msra.mxu1 %v5347_v54  ;;  %v401_v54 = vld [vmem:[#allocation5 + $0x288] sm:$0xff] }
  0xbc   : > { %1316 = vmatprep.subr.bf16.mxu1 %v5356_v57  ;;  %v5334_v57 = vcombine.high %v401_v54, %v405_v55 }
  0xbf   : > { %1317 = vmatpush1.bf16.msra.mxu1 %v5355_v58  ;;  %v409_v58 = vld [vmem:[#allocation5 + $0x2c8] sm:$0xff] }
  0xc0   : > { %1318 = vmatprep.subr.bf16.mxu1 %v5364_v61  ;;  %v7177_v61 = vld [vmem:[%s7109_s10 + $0x64] ss:$8 sps:$4 sm:$0xff]   ;;  %v5342_v63 = vcombine.high %v409_v58, %v413_v59  ;;  %v5341_v3 = vcombine.low %v409_v58, %v413_v59  ;;  %v7216_v58 = vld [vmem:[%s7109_s10 + $0xa0] ss:$8 sps:$4 sm:$0xff]   ;;  %v7219_v59 = vld [vmem:[%s7109_s10 + $0xb4] ss:$8 sps:$4 sm:$0xff]  }
  0xc3   : > { %1319 = vmatpush1.bf16.msra.mxu1 %v5363_v62  ;;  %v5333_v62 = vcombine.low %v401_v54, %v405_v55  ;;  %v5925_v54 = vld [vmem:[#allocation8 + $0x74] ss:$8 sps:$4 sm:$0xff]   ;;  %v5927_v55 = vld [vmem:[#allocation8 + $0x70] ss:$8 sps:$4 sm:$0xff]  }
  0xc4   : > { %1320 = vmatprep.subr.bf16.mxu1 %v5372_v1  ;;  %v421_v1 = vld [vmem:[#allocation5 + $0x328] sm:$0xff] }
  0xc7   : > { %1321 = vmatpush1.bf16.msra.mxu1 %v5371_v2  ;;  %v5904_v2 = vld [vmem:[#allocation8 + $0x4] ss:$8 sps:$4 sm:$0xff]  }
  0xc8   : > { %1483 = vmatprep.subr.bf16.mxu1 %v5254_v6  ;;  %v5350_v6 = vcombine.high %v417_v0, %v421_v1  ;;  %4250 = vmatprep.subr.bf16.mxu0 %v5904_v2  ;;  %v5936_v2 = vld [vmem:[#allocation8 + $0xa0] ss:$8 sps:$4 sm:$0xff]  }
  0xc9   : > { %4251 = vmatpush1.bf16.msra.mxu0 %v5906_v4  ;;  %v5937_v4 = vld [vmem:[#allocation8 + $0xb4] ss:$8 sps:$4 sm:$0xff]  }
  0xca   : > { %1323 = vmatmul.mubr.bf16.vlgmr.msra.gmra.mrb[0].mxu1 %v7128_v5 }
  0xcb   : > { %1484 = vmatpush1.bf16.msra.mxu1 %v5253_v8  ;;  %1332 = vmatprep.mubr.bf16.mxu1 %v7131_v7  ;;  %v425_v8 = vld [vmem:[#allocation5 + $0x348] sm:$0xff] }
  0xcc   : > { %1485 = vmatprep.subr.bf16.mxu1 %v5262_v11  ;;  %v7185_v11 = vld [vmem:[%s7109_s10 + $0x74] ss:$8 sps:$4 sm:$0xff]   ;;  %v5358_v15 = vcombine.high %v425_v8, %v429_v9  ;;  %v5357_v24 = vcombine.low %v425_v8, %v429_v9  ;;  %v7232_v9 = vld [vmem:[%s7109_s10 + $0xc0] ss:$8 sps:$4 sm:$0xff]  }
  0xcd   : > { %v5940_v8 = vld [vmem:[#allocation8 + $0xc4] ss:$8 sps:$4 sm:$0xff]  }
  0xcf   : > { %1486 = vmatpush1.bf16.msra.mxu1 %v5261_v14  ;;  %v5349_v14 = vcombine.low %v417_v0, %v421_v1  ;;  %v5934_v0 = vld [vmem:[#allocation8 + $0xa4] ss:$8 sps:$4 sm:$0xff]   ;;  %v7224_v1 = vld [vmem:[%s7109_s10 + $0xb0] ss:$8 sps:$4 sm:$0xff]  }
  0xd0   : > { %1487 = vmatprep.subr.bf16.mxu1 %v5270_v20  ;;  %v437_v20 = vld [vmem:[#allocation5 + $0x3a8] sm:$0xff] }
  0xd1   : > { %v5365_v34 = vcombine.low %v433_v16, %v437_v20 }
  0xd2   : > { %1333 = vmatmul.mubr.bf16.gmra.mrb[4].mxu1 %v7142_v19 }
  0xd3   : > { %1342 = vmatprep.mubr.bf16.mxu1 %v7145_v21  ;;  %1488 = vmatpush1.bf16.msra.mxu1 %v5269_v22  ;;  %v5907_v22 = vld [vmem:[#allocation8 + $0x14] ss:$8 sps:$4 sm:$0xff]  }
  0xd4   : > { %1489 = vmatprep.subr.bf16.mxu1 %v5278_v25  ;;  %v5910_v25 = vld [vmem:[#allocation8 + $0x24] ss:$8 sps:$4 sm:$0xff]   ;;  %4252 = vmatprep.subr.bf16.mxu0 %v5907_v22 }
  0xd5   : > { %4253 = vmatpush1.bf16.msra.mxu0 %v5909_v23  ;;  %v5946_v22 = vld [vmem:[#allocation8 + $0xe4] ss:$8 sps:$4 sm:$0xff]   ;;  %v7240_v23 = vld [vmem:[%s7109_s10 + $0xd0] ss:$8 sps:$4 sm:$0xff]  }
  0xd6   : > { %4254 = vmatprep.subr.bf16.mxu0 %v5910_v25  ;;  %v7243_v25 = vld [vmem:[%s7109_s10 + $0xe4] ss:$8 sps:$4 sm:$0xff]  }
  0xd7   : > { %1490 = vmatpush1.bf16.msra.mxu1 %v5277_v26  ;;  %v5366_v26 = vcombine.high %v433_v16, %v437_v20  ;;  %v5943_v16 = vld [vmem:[#allocation8 + $0xd4] ss:$8 sps:$4 sm:$0xff]   ;;  %v5945_v20 = vld [vmem:[#allocation8 + $0xd0] ss:$8 sps:$4 sm:$0xff]  }
  0xd8   : > { %1491 = vmatprep.subr.bf16.mxu1 %v5286_v30  ;;  %v5912_v30 = vld [vmem:[#allocation8 + $0x20] ss:$8 sps:$4 sm:$0xff]  }
  0xd9   : > { %4255 = vmatpush1.bf16.msra.mxu0 %v5912_v30  ;;  %v7251_v30 = vld [vmem:[%s7109_s10 + $0xf4] ss:$8 sps:$4 sm:$0xff]  }
  0xda   : > { %1343 = vmatmul.mubr.bf16.gmra.mrb[8].mxu1 %v7150_v29 }
  0xdb   : > { %1352 = vmatprep.mubr.bf16.mxu1 %v7153_v31  ;;  %1492 = vmatpush1.bf16.msra.mxu1 %v5285_v32  ;;  %v7190_v32 = vld [vmem:[%s7109_s10 + $0x70] ss:$8 sps:$4 sm:$0xff]  }
  0xdc   : > { %1493 = vmatprep.subr.bf16.mxu1 %v5294_v35  ;;  %v5374_v35 = vcombine.high %v441_v27, %v445_v28  ;;  %v5951_v27 = vld [vmem:[#allocation8 + $0xf0] ss:$8 sps:$4 sm:$0xff]  }
  0xdd   : > { %v7248_v28 = vld [vmem:[%s7109_s10 + $0xe0] ss:$8 sps:$4 sm:$0xff]  }
  0xdf   : > { %1494 = vmatpush1.bf16.msra.mxu1 %v5293_v36  ;;  %v5913_v36 = vld [vmem:[#allocation8 + $0x34] ss:$8 sps:$4 sm:$0xff]  }
  0xe0   : > { %1495 = vmatprep.subr.bf16.mxu1 %v5302_v39  ;;  %v5916_v39 = vld [vmem:[#allocation8 + $0x44] ss:$8 sps:$4 sm:$0xff]   ;;  %4256 = vmatprep.subr.bf16.mxu0 %v5913_v36 }
  0xe1   : > { %4257 = vmatpush1.bf16.msra.mxu0 %v5915_v37  ;;  %v334_v36 = vld [vmem:[#allocation5 + $0x70] sm:$0xff] }
  0xe2   : > { %1353 = vmatmul.mubr.bf16.gmra.mrb[12].mxu1 %v7158_v40  ;;  %4258 = vmatprep.subr.bf16.mxu0 %v5916_v39  ;;  %v342_v39 = vld [vmem:[#allocation5 + $0xb0] sm:$0xff] }
  0xe3   : > { %1362 = vmatprep.mubr.bf16.mxu1 %v7161_v41  ;;  %1496 = vmatpush1.bf16.msra.mxu1 %v5301_v42  ;;  %v5256_v42 = vcombine.high %v7134_v12, %v7136_v13  ;;  %v362_v12 = vld [vmem:[#allocation5 + $0x150] sm:$0xff] }
  0xe4   : > { %1497 = vmatprep.subr.bf16.mxu1 %v5310_v43  ;;  %v5918_v43 = vld [vmem:[#allocation8 + $0x40] ss:$8 sps:$4 sm:$0xff]  }
  0xe5   : > { %4259 = vmatpush1.bf16.msra.mxu0 %v5918_v43  ;;  %v366_v13 = vld [vmem:[#allocation5 + $0x170] sm:$0xff] }
  0xe7   : > { %1498 = vmatpush1.bf16.msra.mxu1 %v5309_v46  ;;  %v5919_v46 = vld [vmem:[#allocation8 + $0x54] ss:$8 sps:$4 sm:$0xff]  }
  0xe8   : > { %1499 = vmatprep.subr.bf16.mxu1 %v5318_v47  ;;  %v5921_v47 = vld [vmem:[#allocation8 + $0x50] ss:$8 sps:$4 sm:$0xff]   ;;  %4260 = vmatprep.subr.bf16.mxu0 %v5919_v46 }
  0xe9   : > { %4261 = vmatpush1.bf16.msra.mxu0 %v5921_v47  ;;  %v346_v47 = vld [vmem:[#allocation5 + $0xd0] sm:$0xff] }
  0xea   : > { %1363 = vmatmul.mubr.bf16.gmra.mrb[16].mxu1 %v7166_v50  ;;  %4262 = vmatprep.subr.bf16.mxu0 %v5922_v48 }
  0xeb   : > { %1372 = vmatprep.mubr.bf16.mxu1 %v7169_v51  ;;  %1500 = vmatpush1.bf16.msra.mxu1 %v5317_v52  ;;  %v7208_v52 = vld [vmem:[%s7109_s10 + $0x90] ss:$8 sps:$4 sm:$0xff]  }
  0xec   : > { %1501 = vmatprep.subr.bf16.mxu1 %v5326_v53  ;;  %v7211_v53 = vld [vmem:[%s7109_s10 + $0xa4] ss:$8 sps:$4 sm:$0xff]  }
  0xed   : > { %4263 = vmatpush1.bf16.msra.mxu0 %v5924_v49 }
  0xee   : > { %4264 = vmatprep.subr.bf16.mxu0 %v5925_v54  ;;  %v354_v54 = vld [vmem:[#allocation5 + $0x110] sm:$0xff] }
  0xef   : > { %1502 = vmatpush1.bf16.msra.mxu1 %v5325_v56  ;;  %v5928_v56 = vld [vmem:[#allocation8 + $0x84] ss:$8 sps:$4 sm:$0xff]  }
  0xf0   : > { %1503 = vmatprep.subr.bf16.mxu1 %v5334_v57  ;;  %v5930_v57 = vld [vmem:[#allocation8 + $0x80] ss:$8 sps:$4 sm:$0xff]  }
  0xf1   : > { %4265 = vmatpush1.bf16.msra.mxu0 %v5927_v55  ;;  %v358_v55 = vld [vmem:[#allocation5 + $0x130] sm:$0xff] }
  0xf2   : > { %1373 = vmatmul.mubr.bf16.gmra.mrb[20].mxu1 %v7174_v60  ;;  %4266 = vmatprep.subr.bf16.mxu0 %v5928_v56  ;;  %v5296_v56 = vcombine.high %v362_v12, %v366_v13 }
  0xf3   : > { %1382 = vmatprep.mubr.bf16.mxu1 %v7177_v61  ;;  %1504 = vmatpush1.bf16.msra.mxu1 %v5333_v62  ;;  %v5931_v62 = vld [vmem:[#allocation8 + $0x94] ss:$8 sps:$4 sm:$0xff]  }
  0xf4   : > { %1505 = vmatprep.subr.bf16.mxu1 %v5342_v63  ;;  %v5933_v63 = vld [vmem:[#allocation8 + $0x90] ss:$8 sps:$4 sm:$0xff]  }
  0xf5   : > { %4267 = vmatpush1.bf16.msra.mxu0 %v5930_v57  ;;  %v370_v57 = vld [vmem:[#allocation5 + $0x190] sm:$0xff] }
  0xf6   : > { %4268 = vmatprep.subr.bf16.mxu0 %v5931_v62  ;;  %v374_v62 = vld [vmem:[#allocation5 + $0x1b0] sm:$0xff] }
  0xf7   : > { %1506 = vmatpush1.bf16.msra.mxu1 %v5341_v3  ;;  %v7227_v3 = vld [vmem:[%s7109_s10 + $0xc4] ss:$8 sps:$4 sm:$0xff]  }
  0xf8   : > { %1507 = vmatprep.subr.bf16.mxu1 %v5350_v6  ;;  %v5939_v6 = vld [vmem:[#allocation8 + $0xb0] ss:$8 sps:$4 sm:$0xff]  }
  0xf9   : > { %4269 = vmatpush1.bf16.msra.mxu0 %v5933_v63  ;;  %v7269_v63 = vld [vmem:[#allocation5 + $0x18] sm:$0xff] }
  0xfa   : > { %1383 = vmatmul.mubr.bf16.gmra.mrb[24].mxu1 %v7182_v10  ;;  %4270 = vmatprep.subr.bf16.mxu0 %v5934_v0  ;;  %v5304_v0 = vcombine.high %v370_v57, %v374_v62 }
  0xfb   : > { %1392 = vmatprep.mubr.bf16.mxu1 %v7185_v11  ;;  %1508 = vmatpush1.bf16.msra.mxu1 %v5349_v14  ;;  %v5942_v14 = vld [vmem:[#allocation8 + $0xc0] ss:$8 sps:$4 sm:$0xff]  }
  0xfc   : > { %1509 = vmatprep.subr.bf16.mxu1 %v5358_v15  ;;  %v7235_v15 = vld [vmem:[%s7109_s10 + $0xd4] ss:$8 sps:$4 sm:$0xff]  }
  0xfd   : > { %4271 = vmatpush1.bf16.msra.mxu0 %v5936_v2 }
  0xfe   : > { %4272 = vmatprep.subr.bf16.mxu0 %v5937_v4  ;;  %v378_v4 = vld [vmem:[#allocation5 + $0x1d0] sm:$0xff] }
  0xff   : > { %1510 = vmatpush1.bf16.msra.mxu1 %v5357_v24  ;;  %v5948_v24 = vld [vmem:[#allocation8 + $0xe0] ss:$8 sps:$4 sm:$0xff]  }
 0x100   : > { %1511 = vmatprep.subr.bf16.mxu1 %v5366_v26  ;;  %v5949_v26 = vld [vmem:[#allocation8 + $0xf4] ss:$8 sps:$4 sm:$0xff]  }
 0x101   : > { %4273 = vmatpush1.bf16.msra.mxu0 %v5939_v6  ;;  %v382_v6 = vld [vmem:[#allocation5 + $0x1f0] sm:$0xff] }
 0x102   : > { %1393 = vmatmul.mubr.bf16.gmra.mrb[28].mxu1 %v7190_v32  ;;  %4274 = vmatprep.subr.bf16.mxu0 %v5940_v8  ;;  %v5303_v8 = vcombine.low %v370_v57, %v374_v62 }
 0x103   : > { %1402 = vmatprep.mubr.bf16.mxu1 %v7193_v33  ;;  %1512 = vmatpush1.bf16.msra.mxu1 %v5365_v34  ;;  %v7256_v34 = vld [vmem:[%s7109_s10 + $0xf0] ss:$8 sps:$4 sm:$0xff]  }
 0x104   : > { %1513 = vmatprep.subr.bf16.mxu1 %v5374_v35  ;;  %v330_v35 = vld [vmem:[#allocation5 + $0x50] sm:$0xff] }
 0x105   : > { %4275 = vmatpush1.bf16.msra.mxu0 %v5942_v14  ;;  %v5264_v37 = vcombine.high %v330_v35, %v334_v36  ;;  %v5263_v43 = vcombine.low %v330_v35, %v334_v36  ;;  %v5312_v14 = vcombine.high %v378_v4, %v382_v6  ;;  %v402_v35 = vld [vmem:[#allocation5 + $0x290] sm:$0xff] }
 0x106   : > { %4276 = vmatprep.subr.bf16.mxu0 %v5943_v16  ;;  %v390_v16 = vld [vmem:[#allocation5 + $0x230] sm:$0xff] }
 0x107   : > { %1514 = vmatpush1.bf16.msra.mxu1 %v5373_v38  ;;  %v338_v38 = vld [vmem:[#allocation5 + $0x90] sm:$0xff] }
 0x108   : > { %1676 = vmatprep.subr.bf16.mxu1 %v5256_v42  ;;  %v5954_v42 = vld [vmem:[#allocation8 + $0x104] ss:$8 sps:$4 sm:$0xff]   ;;  %v5272_v46 = vcombine.high %v338_v38, %v342_v39  ;;  %v5271_v48 = vcombine.low %v338_v38, %v342_v39 }
 0x109   : > { %4277 = vmatpush1.bf16.msra.mxu0 %v5945_v20  ;;  %v406_v36 = vld [vmem:[#allocation5 + $0x2b0] sm:$0xff] }
 0x10a   : > { %1403 = vmatmul.mubr.bf16.gmra.mrb[32].mxu1 %v7200_v44  ;;  %4278 = vmatprep.subr.bf16.mxu0 %v5946_v22  ;;  %v394_v22 = vld [vmem:[#allocation5 + $0x250] sm:$0xff]  ;;  %v5335_v39 = vcombine.low %v402_v35, %v406_v36 }
 0x10b   : > { %1412 = vmatprep.mubr.bf16.mxu1 %v7203_v45  ;;  %v414_v38 = vld [vmem:[#allocation5 + $0x2f0] sm:$0xff] }
 0x10d   : > { %4279 = vmatpush1.bf16.msra.mxu0 %v5948_v24  ;;  %v398_v24 = vld [vmem:[#allocation5 + $0x270] sm:$0xff] }
 0x10e   : > { %4280 = vmatprep.subr.bf16.mxu0 %v5949_v26 }
 0x111   : > { %4281 = vmatpush1.bf16.msra.mxu0 %v5951_v27  ;;  %v5328_v27 = vcombine.high %v394_v22, %v398_v24 }
 0x112   : > { %1413 = vmatmul.mubr.bf16.gmra.mrb[36].mxu1 %v7208_v52  ;;  %4443 = vmatprep.subr.bf16.mxu0 %v5954_v42 }
 0x113   : > { %1422 = vmatprep.mubr.bf16.mxu1 %v7211_v53 }
 0x11a   : > { %1423 = vmatmul.mubr.bf16.gmra.mrb[40].mxu1 %v7216_v58 }
 0x11b   : > { %1432 = vmatprep.mubr.bf16.mxu1 %v7219_v59 }
 0x122   : > { %1433 = vmatmul.mubr.bf16.gmra.mrb[44].mxu1 %v7224_v1 }
 0x123   : > { %1442 = vmatprep.mubr.bf16.mxu1 %v7227_v3 }
 0x12a   : > { %1443 = vmatmul.mubr.bf16.gmra.mrb[48].mxu1 %v7232_v9 }
 0x12b   : > { %1452 = vmatprep.mubr.bf16.mxu1 %v7235_v15 }
 0x132   : > { %1453 = vmatmul.mubr.bf16.gmra.mrb[52].mxu1 %v7240_v23 }
 0x133   : > { %1462 = vmatprep.mubr.bf16.mxu1 %v7243_v25 }
 0x13a   : > { %1463 = vmatmul.mubr.bf16.gmra.mrb[56].mxu1 %v7248_v28 }
 0x13b   : > { %1472 = vmatprep.mubr.bf16.mxu1 %v7251_v30 }
 0x142   : > { %1473 = vmatmul.mubr.bf16.gmra.mrb[60].mxu1 %v7256_v34 }
 0x143   : > { %1515 = vmatprep.mubr.bf16.mxu1 %v7124_v17  ;;  %v350_v17 = vld [vmem:[#allocation5 + $0xf0] sm:$0xff] }
 0x144   : > { %v5280_v49 = vcombine.high %v346_v47, %v350_v17 }
 0x14a   : > { %1516 = vmatmul.mubr.bf16.vlgmr.msra.gmra.mrb[64].mxu1 %v7128_v5  ;;  %v5279_v5 = vcombine.low %v346_v47, %v350_v17  ;;  %v426_v47 = vld [vmem:[#allocation5 + $0x350] sm:$0xff] }
 0x14b   : > { %1677 = vmatpush1.bf16.msra.mxu1 %v5255_v18  ;;  %1525 = vmatprep.mubr.bf16.mxu1 %v7131_v7  ;;  %v5288_v7 = vcombine.high %v354_v54, %v358_v55  ;;  %v5287_v18 = vcombine.low %v354_v54, %v358_v55  ;;  %v430_v17 = vld [vmem:[#allocation5 + $0x370] sm:$0xff] }
 0x14c   : > { %1678 = vmatprep.subr.bf16.mxu1 %v5264_v37  ;;  %v410_v37 = vld [vmem:[#allocation5 + $0x2d0] sm:$0xff] }
 0x14d   : > { %v5344_v42 = vcombine.high %v410_v37, %v414_v38  ;;  %v434_v54 = vld [vmem:[#allocation5 + $0x390] sm:$0xff] }
 0x14e   : > { %v438_v55 = vld [vmem:[#allocation5 + $0x3b0] sm:$0xff] }
 0x14f   : > { %1679 = vmatpush1.bf16.msra.mxu1 %v5263_v43  ;;  %v418_v43 = vld [vmem:[#allocation5 + $0x310] sm:$0xff] }
 0x150   : > { %1680 = vmatprep.subr.bf16.mxu1 %v5272_v46  ;;  %v422_v46 = vld [vmem:[#allocation5 + $0x330] sm:$0xff] }
 0x152   : > { %1526 = vmatmul.mubr.bf16.gmra.mrb[68].mxu1 %v7142_v19  ;;  %v5295_v19 = vcombine.low %v362_v12, %v366_v13  ;;  %v5367_v12 = vcombine.low %v434_v54, %v438_v55 }
 0x153   : > { %1535 = vmatprep.mubr.bf16.mxu1 %v7145_v21  ;;  %1681 = vmatpush1.bf16.msra.mxu1 %v5271_v48  ;;  %v7271_v21 = vld [vmem:[#allocation5 + $0x38] sm:$0xff]  ;;  %v5351_v48 = vcombine.low %v418_v43, %v422_v46 }
 0x154   : > { %1682 = vmatprep.subr.bf16.mxu1 %v5280_v49  ;;  %v5257_v2 = vcombine.low %v7269_v63, %v7271_v21  ;;  %v5360_v49 = vcombine.high %v426_v47, %v430_v17 }
 0x157   : > { %1683 = vmatpush1.bf16.msra.mxu1 %v5279_v5  ;;  %v442_v5 = vld [vmem:[#allocation5 + $0x3d0] sm:$0xff] }
 0x158   : > { %1684 = vmatprep.subr.bf16.mxu1 %v5288_v7  ;;  %v446_v7 = vld [vmem:[#allocation5 + $0x3f0] sm:$0xff] }
 0x159   : > { %v5376_v13 = vcombine.high %v442_v5, %v446_v7 }
 0x15a   : > { %1536 = vmatmul.mubr.bf16.gmra.mrb[72].mxu1 %v7150_v29  ;;  %v386_v29 = vld [vmem:[#allocation5 + $0x210] sm:$0xff] }
 0x15b   : > { %1545 = vmatprep.mubr.bf16.mxu1 %v7153_v31  ;;  %1685 = vmatpush1.bf16.msra.mxu1 %v5287_v18  ;;  %v5311_v31 = vcombine.low %v378_v4, %v382_v6  ;;  %v5320_v20 = vcombine.high %v386_v29, %v390_v16  ;;  %v5319_v26 = vcombine.low %v386_v29, %v390_v16 }
 0x15c   : > { %1686 = vmatprep.subr.bf16.mxu1 %v5296_v56  ;;  %v5375_v18 = vcombine.low %v442_v5, %v446_v7 }
 0x15f   : > { %1687 = vmatpush1.bf16.msra.mxu1 %v5295_v19 }
 0x160   : > { %1688 = vmatprep.subr.bf16.mxu1 %v5304_v0 }
 0x162   : > { %1546 = vmatmul.mubr.bf16.gmra.mrb[76].mxu1 %v7158_v40  ;;  %v5327_v40 = vcombine.low %v394_v22, %v398_v24 }
 0x163   : > { %1555 = vmatprep.mubr.bf16.mxu1 %v7161_v41  ;;  %1689 = vmatpush1.bf16.msra.mxu1 %v5303_v8  ;;  %v5336_v41 = vcombine.high %v402_v35, %v406_v36 }
 0x164   : > { %1690 = vmatprep.subr.bf16.mxu1 %v5312_v14 }
 0x167   : > { %1691 = vmatpush1.bf16.msra.mxu1 %v5311_v31 }
 0x168   : > { %1692 = vmatprep.subr.bf16.mxu1 %v5320_v20 }
 0x16a   : > { %1556 = vmatmul.mubr.bf16.gmra.mrb[80].mxu1 %v7166_v50  ;;  %v5343_v50 = vcombine.low %v410_v37, %v414_v38 }
 0x16b   : > { %1565 = vmatprep.mubr.bf16.mxu1 %v7169_v51  ;;  %1693 = vmatpush1.bf16.msra.mxu1 %v5319_v26  ;;  %v5352_v51 = vcombine.high %v418_v43, %v422_v46 }
 0x16c   : > { %1694 = vmatprep.subr.bf16.mxu1 %v5328_v27 }
 0x16f   : > { %1695 = vmatpush1.bf16.msra.mxu1 %v5327_v40 }
 0x170   : > { %1696 = vmatprep.subr.bf16.mxu1 %v5336_v41 }
 0x172   : > { %1566 = vmatmul.mubr.bf16.gmra.mrb[84].mxu1 %v7174_v60  ;;  %v5359_v60 = vcombine.low %v426_v47, %v430_v17 }
 0x173   : > { %1575 = vmatprep.mubr.bf16.mxu1 %v7177_v61  ;;  %1697 = vmatpush1.bf16.msra.mxu1 %v5335_v39  ;;  %v5368_v61 = vcombine.high %v434_v54, %v438_v55 }
 0x174   : > { %1698 = vmatprep.subr.bf16.mxu1 %v5344_v42 }
 0x177   : > { %1699 = vmatpush1.bf16.msra.mxu1 %v5343_v50 }
 0x178   : > { %1700 = vmatprep.subr.bf16.mxu1 %v5352_v51 }
 0x17a   : > { %1576 = vmatmul.mubr.bf16.gmra.mrb[88].mxu1 %v7182_v10  ;;  %v5258_v10 = vcombine.high %v7269_v63, %v7271_v21  ;;  %v5970_v21 = vld [vmem:[#allocation8 + $0x160] ss:$8 sps:$4 sm:$0xff]  }
 0x17b   : > { %1585 = vmatprep.mubr.bf16.mxu1 %v7185_v11  ;;  %1701 = vmatpush1.bf16.msra.mxu1 %v5351_v48  ;;  %v450_v11 = vlaneseq }
 0x17c   : > { %1702 = vmatprep.subr.bf16.mxu1 %v5360_v49 }
 0x17d   : > { %v7290_v56 = vshrl.u32 %v450_v11, 7 }
 0x17f   : > { %1703 = vmatpush1.bf16.msra.mxu1 %v5359_v60  ;;  %v456_v57 = vsub.s32 1, %v7290_v56 }
 0x180   : > { %1704 = vmatprep.subr.bf16.mxu1 %v5368_v61 }
 0x182   : > { %1586 = vmatmul.mubr.bf16.gmra.mrb[92].mxu1 %v7190_v32  ;;  %v452_v32 = vsub.s32 0, %v7290_v56 }
 0x183   : > { %1595 = vmatprep.mubr.bf16.mxu1 %v7193_v33  ;;  %1705 = vmatpush1.bf16.msra.mxu1 %v5367_v12  ;;  %v448_v33 = vld [vmem:[#allocation7] sm:$0xff] }
 0x184   : > { %1706 = vmatprep.subr.bf16.mxu1 %v5376_v13  ;;  %v7298_v62 = vrot.slane %v448_v33, %v452_v32 }
 0x187   : > { %1707 = vmatpush1.bf16.msra.mxu1 %v5375_v18 }
 0x188   : > { %1869 = vmatprep.subr.bf16.mxu1 %v5258_v10 }
 0x18a   : > { %1596 = vmatmul.mubr.bf16.gmra.mrb[96].mxu1 %v7200_v44  ;;  %v7302_v44 = vrot.slane %v448_v33, %v456_v57 }
 0x18b   : > { %1605 = vmatprep.mubr.bf16.mxu1 %v7203_v45 }
 0x192   : > { %1606 = vmatmul.mubr.bf16.gmra.mrb[100].mxu1 %v7208_v52 }
 0x193   : > { %1615 = vmatprep.mubr.bf16.mxu1 %v7211_v53 }
 0x19a   : > { %1616 = vmatmul.mubr.bf16.gmra.mrb[104].mxu1 %v7216_v58 }
 0x19b   : > { %1625 = vmatprep.mubr.bf16.mxu1 %v7219_v59 }
 0x19d   : > { %v1324_v45 = vpop.f32.mrb[0].mxu1 }
 0x19e   : > { %v1325_v52 = vadd.f32 %v1324_v45, %v7298_v62  ;;  %v1326_v53 = vpop.f32.mrb[1].mxu1 }
 0x19f   : > { %v1327_v19 = vadd.f32 %v1326_v53, %v7302_v44  ;;  %v1328_v0 = vpop.f32.mrb[2].mxu1 }
 0x1a0   : > { %v2318_v4 = vmul.f32 0.70710677, %v1325_v52  ;;  %v1329_v58 = vadd.f32 %v1328_v0, %v7298_v62  ;;  %v1330_v6 = vpop.f32.mrb[3].mxu1  ;;  %v2062_v42 = vmul.f32 0.5, %v1325_v52 }
 0x1a1   : > { %v2319_v8 = vmul.f32 0.70710677, %v1327_v19  ;;  %v1331_v14 = vadd.f32 %v1330_v6, %v7302_v44  ;;  %v2063_v49 = vmul.f32 0.5, %v1327_v19  ;;  %v5952_v6 = vld [vmem:[#allocation8 + $0x100] ss:$8 sps:$4 sm:$0xff]  }
 0x1a2   : > { %6096 = verf.f32 %v2318_v4  ;;  %v2326_v29 = vmul.f32 0.70710677, %v1329_v58  ;;  %1626 = vmatmul.mubr.bf16.gmra.mrb[108].mxu1 %v7224_v1  ;;  %v2070_v47 = vmul.f32 0.5, %v1329_v58 }
 0x1a3   : > { %6098 = verf.f32 %v2319_v8  ;;  %v2327_v59 = vmul.f32 0.70710677, %v1331_v14  ;;  %1635 = vmatprep.mubr.bf16.mxu1 %v7227_v3  ;;  %v2071_v7 = vmul.f32 0.5, %v1331_v14 }
 0x1a4   : > { %6100 = verf.f32 %v2326_v29 }
 0x1a5   : > { %6102 = verf.f32 %v2327_v59  ;;  %v1334_v16 = vpop.f32.mrb[4].mxu1  ;;  %v5957_v59 = vld [vmem:[#allocation8 + $0x114] ss:$8 sps:$4 sm:$0xff]  }
 0x1a6   : > { %v7312_v31 = vadd.f32 %v1334_v16, %v7298_v62  ;;  %v1336_v20 = vpop.f32.mrb[5].mxu1 }
 0x1a7   : > { %v7315_v22 = vadd.f32 %v1336_v20, %v7302_v44  ;;  %v1338_v24 = vpop.f32.mrb[6].mxu1 }
 0x1a8   : > { %v2334_v26 = vmul.f32 0.70710677, %v7312_v31  ;;  %v1339_v27 = vadd.f32 %v1338_v24, %v7298_v62  ;;  %v1340_v1 = vpop.f32.mrb[7].mxu1  ;;  %v2078_v20 = vmul.f32 0.5, %v7312_v31 }
 0x1a9   : > { %v2335_v35 = vmul.f32 0.70710677, %v7315_v22  ;;  %v1341_v3 = vadd.f32 %v1340_v1, %v7302_v44 }
 0x1aa   : > { %6104 = verf.f32 %v2334_v26  ;;  %v2342_v36 = vmul.f32 0.70710677, %v1339_v27  ;;  %1636 = vmatmul.mubr.bf16.gmra.mrb[112].mxu1 %v7232_v9 }
 0x1ab   : > { %6106 = verf.f32 %v2335_v35  ;;  %v2343_v40 = vmul.f32 0.70710677, %v1341_v3  ;;  %1645 = vmatprep.mubr.bf16.mxu1 %v7235_v15  ;;  %v2079_v35 = vmul.f32 0.5, %v7315_v22 }
 0x1ac   : > { %v6097_v41 = vpop.eup %6096  ;;  %6108 = verf.f32 %v2342_v36  ;;  %v2087_v36 = vmul.f32 0.5, %v1341_v3  ;;  %v5960_v3 = vld [vmem:[#allocation8 + $0x124] ss:$8 sps:$4 sm:$0xff]  }
 0x1ad   : > { %v6099_v37 = vpop.eup %6098  ;;  %6110 = verf.f32 %v2343_v40  ;;  %v1344_v38 = vpop.f32.mrb[8].mxu1  ;;  %v2830_v43 = vadd.f32 1.0, %v6097_v41 }
 0x1ae   : > { %v6101_v39 = vpop.eup %6100  ;;  %v7324_v46 = vadd.f32 %v1344_v38, %v7298_v62  ;;  %v1346_v50 = vpop.f32.mrb[9].mxu1  ;;  %v2831_v15 = vadd.f32 1.0, %v6099_v37 }
 0x1af   : > { %v6103_v51 = vpop.eup %6102  ;;  %v2838_v17 = vadd.f32 1.0, %v6101_v39  ;;  %v7327_v9 = vadd.f32 %v1346_v50, %v7302_v44  ;;  %v1348_v48 = vpop.f32.mrb[10].mxu1  ;;  %v3086_v18 = vmul.f32 %v2830_v43, %v2062_v42 }
 0x1b0   : > { %v2350_v54 = vmul.f32 0.70710677, %v7324_v46  ;;  %v7331_v55 = vadd.f32 %v1348_v48, %v7298_v62  ;;  %v1350_v60 = vpop.f32.mrb[11].mxu1  ;;  %v2839_v61 = vadd.f32 1.0, %v6103_v51  ;;  %v3087_v33 = vmul.f32 %v2831_v15, %v2063_v49 }
 0x1b1   : > { %v3094_v5 = vmul.f32 %v2838_v17, %v2070_v47  ;;  %v2351_v12 = vmul.f32 0.70710677, %v7327_v9  ;;  %v7335_v13 = vadd.f32 %v1350_v60, %v7302_v44 }
 0x1b2   : > { %6112 = verf.f32 %v2350_v54  ;;  %v2358_v10 = vmul.f32 0.70710677, %v7331_v55  ;;  %1646 = vmatmul.mubr.bf16.gmra.mrb[116].mxu1 %v7240_v23  ;;  %v3095_v45 = vmul.f32 %v2839_v61, %v2071_v7  ;;  %v5958_v61 = vld [vmem:[#allocation8 + $0x120] ss:$8 sps:$4 sm:$0xff]  }
 0x1b3   : > { %6114 = verf.f32 %v2351_v12  ;;  %v2359_v11 = vmul.f32 0.70710677, %v7335_v13  ;;  %1655 = vmatprep.mubr.bf16.mxu1 %v7243_v25  ;;  %v3342_v53 = vpack.c.bf16 %v3094_v5, %v3086_v18  ;;  %v2086_v25 = vmul.f32 0.5, %v1339_v27  ;;  %v5955_v27 = vld [vmem:[#allocation8 + $0x110] ss:$8 sps:$4 sm:$0xff]  }
 0x1b4   : > { %v6105_v52 = vpop.eup %6104  ;;  %6116 = verf.f32 %v2358_v10  ;;  %v3343_v58 = vpack.c.bf16 %v3095_v45, %v3087_v33  ;;  %v2094_v10 = vmul.f32 0.5, %v7324_v46 }
 0x1b5   : > { %v6107_v19 = vpop.eup %6106  ;;  %v2846_v0 = vadd.f32 1.0, %v6105_v52  ;;  %6118 = verf.f32 %v2359_v11  ;;  %v1354_v4 = vpop.f32.mrb[12].mxu1  ;;  %v2102_v11 = vmul.f32 0.5, %v7331_v55 }
 0x1b6   : > { %v6109_v8 = vpop.eup %6108  ;;  %v2847_v14 = vadd.f32 1.0, %v6107_v19  ;;  %v7342_v23 = vadd.f32 %v1354_v4, %v7298_v62  ;;  %v1356_v29 = vpop.f32.mrb[13].mxu1  ;;  %4282 = vmatprep.mubr.bf16.mxu0 %v3343_v58  ;;  %v2103_v19 = vmul.f32 0.5, %v7335_v13  ;;  %v5966_v13 = vld [vmem:[#allocation8 + $0x144] ss:$8 sps:$4 sm:$0xff]  }
 0x1b7   : > { %v6111_v16 = vpop.eup %6110  ;;  %v2854_v24 = vadd.f32 1.0, %v6109_v8  ;;  %v7346_v26 = vadd.f32 %v1356_v29, %v7302_v44  ;;  %v1358_v1 = vpop.f32.mrb[14].mxu1  ;;  %4283 = vmatmul.mubr.bf16.vlgmr.msra.gmra.mrb[0].mxu0 %v3342_v53  ;;  %v3102_v38 = vmul.f32 %v2846_v0, %v2078_v20  ;;  %v2095_v53 = vmul.f32 0.5, %v7327_v9 }
 0x1b8   : > { %v2855_v40 = vadd.f32 1.0, %v6111_v16  ;;  %v2366_v41 = vmul.f32 0.70710677, %v7342_v23  ;;  %v1360_v37 = vpop.f32.mrb[15].mxu1  ;;  %v7352_v31 = vadd.f32 %v1358_v1, %v7298_v62  ;;  %4444 = vmatpush1.bf16.msra.mxu0 %v5952_v6  ;;  %v3103_v43 = vmul.f32 %v2847_v14, %v2079_v35  ;;  %v5961_v14 = vld [vmem:[#allocation8 + $0x130] ss:$8 sps:$4 sm:$0xff]  }
 0x1b9   : > { %v3110_v39 = vmul.f32 %v2854_v24, %v2086_v25  ;;  %v2367_v42 = vmul.f32 0.70710677, %v7346_v26  ;;  %v7355_v22 = vadd.f32 %v1360_v37, %v7302_v44  ;;  %4445 = vmatprep.subr.bf16.mxu0 %v5957_v59  ;;  %v6608_v25 = vld [vmem:[%s7109_s10 + $0x4] ss:$8 sps:$4 sm:$0xff]   ;;  %v7382_v24 = vld [vmem:[#allocation5 + $0x58] sm:$0xff] }
 0x1ba   : > { %v3111_v50 = vmul.f32 %v2855_v40, %v2087_v36  ;;  %6120 = verf.f32 %v2366_v41  ;;  %1656 = vmatmul.mubr.bf16.gmra.mrb[120].mxu1 %v7248_v28  ;;  %v2374_v51 = vmul.f32 0.70710677, %v7352_v31  ;;  %v7384_v1 = vld [vmem:[#allocation5 + $0x78] sm:$0xff] }
 0x1bb   : > { %6122 = verf.f32 %v2367_v42  ;;  %v3350_v47 = vpack.c.bf16 %v3110_v39, %v3102_v38  ;;  %1665 = vmatprep.mubr.bf16.mxu1 %v7251_v30  ;;  %v2375_v48 = vmul.f32 0.70710677, %v7355_v22  ;;  %v5963_v30 = vld [vmem:[#allocation8 + $0x134] ss:$8 sps:$4 sm:$0xff]  }
 0x1bc   : > { %v6113_v17 = vpop.eup %6112  ;;  %v3351_v15 = vpack.c.bf16 %v3111_v50, %v3103_v43  ;;  %6124 = verf.f32 %v2374_v51  ;;  %4446 = vmatpush1.bf16.msra.mxu0 %v5955_v27  ;;  %v5265_v27 = vcombine.low %v7382_v24, %v7384_v1  ;;  %v5969_v43 = vld [vmem:[#allocation8 + $0x154] ss:$8 sps:$4 sm:$0xff]  }
 0x1bd   : > { %v6115_v49 = vpop.eup %6114  ;;  %v2862_v54 = vadd.f32 1.0, %v6113_v17  ;;  %v1364_v60 = vpop.f32.mrb[16].mxu1  ;;  %6126 = verf.f32 %v2375_v48  ;;  %4447 = vmatprep.subr.bf16.mxu0 %v5960_v3  ;;  %v2110_v3 = vmul.f32 0.5, %v7342_v23  ;;  %v5266_v48 = vcombine.high %v7382_v24, %v7384_v1 }
 0x1be   : > { %v6117_v5 = vpop.eup %6116  ;;  %v2863_v28 = vadd.f32 1.0, %v6115_v49  ;;  %v7362_v7 = vadd.f32 %v1364_v60, %v7298_v62  ;;  %v1366_v12 = vpop.f32.mrb[17].mxu1  ;;  %4292 = vmatprep.mubr.bf16.mxu0 %v3351_v15  ;;  %v7398_v15 = vld [vmem:[#allocation5 + $0x98] sm:$0xff]  ;;  %v2111_v60 = vmul.f32 0.5, %v7346_v26 }
 0x1bf   : > { %v6119_v18 = vpop.eup %6118  ;;  %v2870_v33 = vadd.f32 1.0, %v6117_v5  ;;  %v7367_v45 = vadd.f32 %v1366_v12, %v7302_v44  ;;  %v1368_v52 = vpop.f32.mrb[18].mxu1  ;;  %4293 = vmatmul.mubr.bf16.gmra.mrb[4].mxu0 %v3350_v47  ;;  %v3118_v6 = vmul.f32 %v2862_v54, %v2094_v10  ;;  %v7400_v49 = vld [vmem:[#allocation5 + $0xb8] sm:$0xff]  ;;  %v2119_v12 = vmul.f32 0.5, %v7355_v22 }
 0x1c0   : > { %v2871_v0 = vadd.f32 1.0, %v6119_v18  ;;  %v2382_v4 = vmul.f32 0.70710677, %v7362_v7  ;;  %v1370_v58 = vpop.f32.mrb[19].mxu1  ;;  %v7374_v55 = vadd.f32 %v1368_v52, %v7298_v62  ;;  %4448 = vmatpush1.bf16.msra.mxu0 %v5958_v61  ;;  %v3119_v29 = vmul.f32 %v2863_v28, %v2095_v53  ;;  %v6609_v52 = vld [vmem:[%s7109_s10] ss:$8 sps:$4 sm:$0xff]  }
 0x1c1   : > { %v3126_v8 = vmul.f32 %v2870_v33, %v2102_v11  ;;  %v2383_v46 = vmul.f32 0.70710677, %v7367_v45  ;;  %v7377_v9 = vadd.f32 %v1370_v58, %v7302_v44  ;;  %4449 = vmatprep.subr.bf16.mxu0 %v5963_v30  ;;  %v2118_v61 = vmul.f32 0.5, %v7352_v31  ;;  %v5967_v11 = vld [vmem:[#allocation8 + $0x150] ss:$8 sps:$4 sm:$0xff]  }
 0x1c2   : > { %v3127_v59 = vmul.f32 %v2871_v0, %v2103_v19  ;;  %6128 = verf.f32 %v2382_v4  ;;  %1666 = vmatmul.mubr.bf16.gmra.mrb[124].mxu1 %v7256_v34  ;;  %v2390_v16 = vmul.f32 0.70710677, %v7374_v55  ;;  %v5964_v34 = vld [vmem:[#allocation8 + $0x140] ss:$8 sps:$4 sm:$0xff]   ;;  %v5972_v53 = vld [vmem:[#allocation8 + $0x164] ss:$8 sps:$4 sm:$0xff]   ;;  %v5273_v63 = vcombine.low %v7398_v15, %v7400_v49 }
 0x1c3   : > { %6130 = verf.f32 %v2383_v46  ;;  %v3358_v20 = vpack.c.bf16 %v3126_v8, %v3118_v6  ;;  %1708 = vmatprep.mubr.bf16.mxu1 %v6608_v25  ;;  %v2391_v36 = vmul.f32 0.70710677, %v7377_v9  ;;  %v6610_v4 = vld [vmem:[%s7109_s10 + $0x14] ss:$8 sps:$4 sm:$0xff]   ;;  %v2135_v24 = vmul.f32 0.5, %v7377_v9 }
 0x1c4   : > { %v6121_v35 = vpop.eup %6120  ;;  %v3359_v40 = vpack.c.bf16 %v3127_v59, %v3119_v29  ;;  %6132 = verf.f32 %v2390_v16  ;;  %4450 = vmatpush1.bf16.msra.mxu0 %v5961_v14  ;;  %v7419_v58 = vld [vmem:[#allocation5 + $0xd8] sm:$0xff]  ;;  %v5274_v29 = vcombine.high %v7398_v15, %v7400_v49 }
 0x1c5   : > { %v6123_v41 = vpop.eup %6122  ;;  %v1374_v37 = vpop.f32.mrb[20].mxu1  ;;  %v2878_v38 = vadd.f32 1.0, %v6121_v35  ;;  %6134 = verf.f32 %v2391_v36  ;;  %4451 = vmatprep.subr.bf16.mxu0 %v5966_v13  ;;  %v7421_v6 = vld [vmem:[#allocation5 + $0xf8] sm:$0xff] }
 0x1c6   : > { %v7388_v39 = vadd.f32 %v1374_v37, %v7298_v62  ;;  %v1376_v42 = vpop.f32.mrb[21].mxu1  ;;  %4302 = vmatprep.mubr.bf16.mxu0 %v3359_v40  ;;  %v6125_v50 = vpop.eup %6124  ;;  %v2879_v51 = vadd.f32 1.0, %v6123_v41  ;;  %v5281_v35 = vcombine.low %v7419_v58, %v7421_v6  ;;  %v5975_v36 = vld [vmem:[#allocation8 + $0x174] ss:$8 sps:$4 sm:$0xff]   ;;  %v2126_v41 = vmul.f32 0.5, %v7362_v7 }
 0x1c7   : > { %v7394_v47 = vadd.f32 %v1376_v42, %v7302_v44  ;;  %v1378_v17 = vpop.f32.mrb[22].mxu1  ;;  %v6127_v54 = vpop.eup %6126  ;;  %v2886_v5 = vadd.f32 1.0, %v6125_v50  ;;  %4303 = vmatmul.mubr.bf16.gmra.mrb[8].mxu0 %v3358_v20  ;;  %v3134_v26 = vmul.f32 %v2878_v38, %v2110_v3  ;;  %v5282_v42 = vcombine.high %v7419_v58, %v7421_v6  ;;  %v7444_v50 = vld [vmem:[#allocation5 + $0x138] sm:$0xff] }
 0x1c8   : > { %v2398_v23 = vmul.f32 0.70710677, %v7388_v39  ;;  %v1380_v28 = vpop.f32.mrb[23].mxu1  ;;  %v2887_v30 = vadd.f32 1.0, %v6127_v54  ;;  %v7408_v10 = vadd.f32 %v1378_v17, %v7298_v62  ;;  %4452 = vmatpush1.bf16.msra.mxu0 %v5964_v34  ;;  %v3135_v22 = vmul.f32 %v2879_v51, %v2111_v60 }
 0x1c9   : > { %v2399_v18 = vmul.f32 0.70710677, %v7394_v47  ;;  %v3142_v33 = vmul.f32 %v2886_v5, %v2118_v61  ;;  %v7411_v31 = vadd.f32 %v1380_v28, %v7302_v44  ;;  %4453 = vmatprep.subr.bf16.mxu0 %v5969_v43  ;;  %v7442_v43 = vld [vmem:[#allocation5 + $0x118] sm:$0xff]  ;;  %v2127_v7 = vmul.f32 0.5, %v7367_v45  ;;  %v5978_v5 = vld [vmem:[#allocation8 + $0x184] ss:$8 sps:$4 sm:$0xff]  }
 0x1ca   : > { %6136 = verf.f32 %v2398_v23  ;;  %1709 = vmatmul.mubr.bf16.vlgmr.msra.gmra.mrb[128].mxu1 %v6609_v52  ;;  %v3143_v19 = vmul.f32 %v2887_v30, %v2119_v12  ;;  %v2406_v0 = vmul.f32 0.70710677, %v7408_v10  ;;  %v2134_v51 = vmul.f32 0.5, %v7374_v55  ;;  %v5973_v45 = vld [vmem:[#allocation8 + $0x170] ss:$8 sps:$4 sm:$0xff]  }
 0x1cb   : > { %6138 = verf.f32 %v2399_v18  ;;  %1870 = vmatpush1.bf16.msra.mxu1 %v5257_v2  ;;  %1718 = vmatprep.mubr.bf16.mxu1 %v6610_v4  ;;  %v2407_v46 = vmul.f32 0.70710677, %v7411_v31  ;;  %v3366_v14 = vpack.c.bf16 %v3142_v33, %v3134_v26  ;;  %v6611_v61 = vld [vmem:[%s7109_s10 + $0x10] ss:$8 sps:$4 sm:$0xff]   ;;  %v6612_v12 = vld [vmem:[%s7109_s10 + $0x24] ss:$8 sps:$4 sm:$0xff]   ;;  %v5290_v52 = vcombine.high %v7442_v43, %v7444_v50 }
 0x1cc   : > { %v6129_v8 = vpop.eup %6128  ;;  %1871 = vmatprep.subr.bf16.mxu1 %v5266_v48  ;;  %6140 = verf.f32 %v2406_v0  ;;  %v3367_v16 = vpack.c.bf16 %v3143_v19, %v3135_v22  ;;  %4454 = vmatpush1.bf16.msra.mxu0 %v5967_v11  ;;  %v7460_v30 = vld [vmem:[#allocation5 + $0x158] sm:$0xff]  ;;  %v5289_v0 = vcombine.low %v7442_v43, %v7444_v50  ;;  %v5976_v4 = vld [vmem:[#allocation8 + $0x180] ss:$8 sps:$4 sm:$0xff]   ;;  %v2151_v58 = vmul.f32 0.5, %v7411_v31 }
 0x1cd   : > { %v6131_v59 = vpop.eup %6130  ;;  %v1384_v13 = vpop.f32.mrb[24].mxu1  ;;  %v2894_v2 = vadd.f32 1.0, %v6129_v8  ;;  %6142 = verf.f32 %v2407_v46  ;;  %4455 = vmatprep.subr.bf16.mxu0 %v5972_v53  ;;  %v7462_v18 = vld [vmem:[#allocation5 + $0x178] sm:$0xff] }
 0x1ce   : > { %v7429_v20 = vadd.f32 %v1384_v13, %v7298_v62  ;;  %v1386_v25 = vpop.f32.mrb[25].mxu1  ;;  %v6133_v40 = vpop.eup %6132  ;;  %v2895_v37 = vadd.f32 1.0, %v6131_v59  ;;  %4312 = vmatprep.mubr.bf16.mxu0 %v3367_v16  ;;  %v5981_v59 = vld [vmem:[#allocation8 + $0x194] ss:$8 sps:$4 sm:$0xff]   ;;  %v2142_v16 = vmul.f32 0.5, %v7388_v39  ;;  %v2143_v39 = vmul.f32 0.5, %v7394_v47 }
 0x1cf   : > { %v7435_v34 = vadd.f32 %v1386_v25, %v7302_v44  ;;  %v1388_v38 = vpop.f32.mrb[26].mxu1  ;;  %1872 = vmatpush1.bf16.msra.mxu1 %v5265_v27  ;;  %v6135_v3 = vpop.eup %6134  ;;  %v2902_v17 = vadd.f32 1.0, %v6133_v40  ;;  %4313 = vmatmul.mubr.bf16.gmra.mrb[12].mxu0 %v3366_v14  ;;  %v3150_v54 = vmul.f32 %v2894_v2, %v2126_v41  ;;  %v5298_v25 = vcombine.high %v7460_v30, %v7462_v18  ;;  %v7485_v40 = vld [vmem:[#allocation5 + $0x1b8] sm:$0xff] }
 0x1d0   : > { %v2414_v48 = vmul.f32 0.70710677, %v7429_v20  ;;  %v1390_v15 = vpop.f32.mrb[27].mxu1  ;;  %1873 = vmatprep.subr.bf16.mxu1 %v5274_v29  ;;  %v2903_v1 = vadd.f32 1.0, %v6135_v3  ;;  %v7452_v49 = vadd.f32 %v1388_v38, %v7298_v62  ;;  %4456 = vmatpush1.bf16.msra.mxu0 %v5970_v21  ;;  %v3151_v9 = vmul.f32 %v2895_v37, %v2127_v7  ;;  %v5979_v47 = vld [vmem:[#allocation8 + $0x190] ss:$8 sps:$4 sm:$0xff]  }
 0x1d1   : > { %v2415_v27 = vmul.f32 0.70710677, %v7435_v34  ;;  %v3158_v55 = vmul.f32 %v2902_v17, %v2134_v51  ;;  %v7455_v60 = vadd.f32 %v1390_v15, %v7302_v44  ;;  %4457 = vmatprep.subr.bf16.mxu0 %v5975_v36  ;;  %v5297_v29 = vcombine.low %v7460_v30, %v7462_v18  ;;  %v7483_v36 = vld [vmem:[#allocation5 + $0x198] sm:$0xff]  ;;  %v6613_v51 = vld [vmem:[%s7109_s10 + $0x20] ss:$8 sps:$4 sm:$0xff]  }
 0x1d2   : > { %6144 = verf.f32 %v2414_v48  ;;  %1719 = vmatmul.mubr.bf16.gmra.mrb[132].mxu1 %v6611_v61  ;;  %v3159_v23 = vmul.f32 %v2903_v1, %v2135_v24  ;;  %v2422_v28 = vmul.f32 0.70710677, %v7452_v49  ;;  %v2150_v37 = vmul.f32 0.5, %v7408_v10  ;;  %v5984_v17 = vld [vmem:[#allocation8 + $0x1a4] ss:$8 sps:$4 sm:$0xff]   ;;  %v7501_v1 = vld [vmem:[#allocation5 + $0x1d8] sm:$0xff] }
 0x1d3   : > { %6146 = verf.f32 %v2415_v27  ;;  %1728 = vmatprep.mubr.bf16.mxu1 %v6612_v12  ;;  %1874 = vmatpush1.bf16.msra.mxu1 %v5273_v63  ;;  %v2423_v26 = vmul.f32 0.70710677, %v7455_v60  ;;  %v3374_v33 = vpack.c.bf16 %v3158_v55, %v3150_v54  ;;  %v6614_v24 = vld [vmem:[%s7109_s10 + $0x34] ss:$8 sps:$4 sm:$0xff]   ;;  %v5306_v61 = vcombine.high %v7483_v36, %v7485_v40  ;;  %v5982_v12 = vld [vmem:[#allocation8 + $0x1a0] ss:$8 sps:$4 sm:$0xff]  }
 0x1d4   : > { %v6137_v11 = vpop.eup %6136  ;;  %1875 = vmatprep.subr.bf16.mxu1 %v5282_v42  ;;  %6148 = verf.f32 %v2422_v28  ;;  %v3375_v19 = vpack.c.bf16 %v3159_v23, %v3151_v9  ;;  %4458 = vmatpush1.bf16.msra.mxu0 %v5973_v45  ;;  %v7503_v27 = vld [vmem:[#allocation5 + $0x1f8] sm:$0xff]  ;;  %v5305_v28 = vcombine.low %v7483_v36, %v7485_v40  ;;  %v2167_v30 = vmul.f32 0.5, %v7455_v60 }
 0x1d5   : > { %v6139_v53 = vpop.eup %6138  ;;  %v1394_v22 = vpop.f32.mrb[28].mxu1  ;;  %v2910_v8 = vadd.f32 1.0, %v6137_v11  ;;  %6150 = verf.f32 %v2423_v26  ;;  %4459 = vmatprep.subr.bf16.mxu0 %v5978_v5 }
 0x1d6   : > { %v7470_v46 = vadd.f32 %v1394_v22, %v7298_v62  ;;  %v1396_v14 = vpop.f32.mrb[29].mxu1  ;;  %v6141_v13 = vpop.eup %6140  ;;  %v2911_v63 = vadd.f32 1.0, %v6139_v53  ;;  %4322 = vmatprep.mubr.bf16.mxu0 %v3375_v19  ;;  %v5987_v53 = vld [vmem:[#allocation8 + $0x1b4] ss:$8 sps:$4 sm:$0xff]   ;;  %v2158_v19 = vmul.f32 0.5, %v7429_v20  ;;  %v2159_v20 = vmul.f32 0.5, %v7435_v34 }
 0x1d7   : > { %v7476_v21 = vadd.f32 %v1396_v14, %v7302_v44  ;;  %v1398_v2 = vpop.f32.mrb[30].mxu1  ;;  %1876 = vmatpush1.bf16.msra.mxu1 %v5281_v35  ;;  %v6143_v41 = vpop.eup %6142  ;;  %v2918_v38 = vadd.f32 1.0, %v6141_v13  ;;  %4323 = vmatmul.mubr.bf16.gmra.mrb[16].mxu0 %v3374_v33  ;;  %v3166_v3 = vmul.f32 %v2910_v8, %v2142_v16  ;;  %v5314_v14 = vcombine.high %v7501_v1, %v7503_v27  ;;  %v7526_v13 = vld [vmem:[#allocation5 + $0x238] sm:$0xff] }
 0x1d8   : > { %v2430_v42 = vmul.f32 0.70710677, %v7470_v46  ;;  %v1400_v43 = vpop.f32.mrb[31].mxu1  ;;  %1877 = vmatprep.subr.bf16.mxu1 %v5290_v52  ;;  %v2919_v6 = vadd.f32 1.0, %v6143_v41  ;;  %v7493_v50 = vadd.f32 %v1398_v2, %v7298_v62  ;;  %4460 = vmatpush1.bf16.msra.mxu0 %v5976_v4  ;;  %v3167_v31 = vmul.f32 %v2911_v63, %v2143_v39  ;;  %v5985_v34 = vld [vmem:[#allocation8 + $0x1b0] ss:$8 sps:$4 sm:$0xff]  }
 0x1d9   : > { %v2431_v35 = vmul.f32 0.70710677, %v7476_v21  ;;  %v3174_v10 = vmul.f32 %v2918_v38, %v2150_v37  ;;  %v7496_v7 = vadd.f32 %v1400_v43, %v7302_v44  ;;  %4461 = vmatprep.subr.bf16.mxu0 %v5981_v59  ;;  %v5313_v52 = vcombine.low %v7501_v1, %v7503_v27  ;;  %v7524_v59 = vld [vmem:[#allocation5 + $0x218] sm:$0xff]  ;;  %v5990_v38 = vld [vmem:[#allocation8 + $0x1c4] ss:$8 sps:$4 sm:$0xff]  }
 0x1da   : > { %6152 = verf.f32 %v2430_v42  ;;  %1729 = vmatmul.mubr.bf16.gmra.mrb[136].mxu1 %v6613_v51  ;;  %v3175_v48 = vmul.f32 %v2919_v6, %v2151_v58  ;;  %v2438_v15 = vmul.f32 0.70710677, %v7493_v50  ;;  %v2166_v63 = vmul.f32 0.5, %v7452_v49  ;;  %v6615_v37 = vld [vmem:[%s7109_s10 + $0x30] ss:$8 sps:$4 sm:$0xff]  }
 0x1db   : > { %6154 = verf.f32 %v2431_v35  ;;  %1738 = vmatprep.mubr.bf16.mxu1 %v6614_v24  ;;  %1878 = vmatpush1.bf16.msra.mxu1 %v5289_v0  ;;  %v2439_v54 = vmul.f32 0.70710677, %v7496_v7  ;;  %v3382_v55 = vpack.c.bf16 %v3174_v10, %v3166_v3  ;;  %v6616_v58 = vld [vmem:[%s7109_s10 + $0x44] ss:$8 sps:$4 sm:$0xff]   ;;  %v7542_v6 = vld [vmem:[#allocation5 + $0x258] sm:$0xff]  ;;  %v5322_v51 = vcombine.high %v7524_v59, %v7526_v13 }
 0x1dc   : > { %v6145_v45 = vpop.eup %6144  ;;  %1879 = vmatprep.subr.bf16.mxu1 %v5298_v25  ;;  %6156 = verf.f32 %v2438_v15  ;;  %v3383_v23 = vpack.c.bf16 %v3175_v48, %v3167_v31  ;;  %4462 = vmatpush1.bf16.msra.mxu0 %v5979_v47  ;;  %v7544_v35 = vld [vmem:[#allocation5 + $0x278] sm:$0xff]  ;;  %v5321_v15 = vcombine.low %v7524_v59, %v7526_v13  ;;  %v5988_v24 = vld [vmem:[#allocation8 + $0x1c0] ss:$8 sps:$4 sm:$0xff]   ;;  %v2183_v1 = vmul.f32 0.5, %v7496_v7 }
 0x1dd   : > { %v6147_v5 = vpop.eup %6146  ;;  %v1404_v9 = vpop.f32.mrb[32].mxu1  ;;  %v2926_v11 = vadd.f32 1.0, %v6145_v45  ;;  %6158 = verf.f32 %v2439_v54  ;;  %4463 = vmatprep.subr.bf16.mxu0 %v5984_v17 }
 0x1de   : > { %v7511_v26 = vadd.f32 %v1404_v9, %v7298_v62  ;;  %v1406_v33 = vpop.f32.mrb[33].mxu1  ;;  %v6149_v22 = vpop.eup %6148  ;;  %v2927_v0 = vadd.f32 1.0, %v6147_v5  ;;  %4332 = vmatprep.mubr.bf16.mxu0 %v3383_v23  ;;  %v5993_v5 = vld [vmem:[#allocation8 + $0x1d4] ss:$8 sps:$4 sm:$0xff]   ;;  %v2174_v23 = vmul.f32 0.5, %v7470_v46  ;;  %v2175_v46 = vmul.f32 0.5, %v7476_v21 }
 0x1df   : > { %v7517_v4 = vadd.f32 %v1406_v33, %v7302_v44  ;;  %v1408_v8 = vpop.f32.mrb[34].mxu1  ;;  %1880 = vmatpush1.bf16.msra.mxu1 %v5297_v29  ;;  %v6151_v16 = vpop.eup %6150  ;;  %v2934_v2 = vadd.f32 1.0, %v6149_v22  ;;  %4333 = vmatmul.mubr.bf16.gmra.mrb[20].mxu0 %v3382_v55  ;;  %v3182_v41 = vmul.f32 %v2926_v11, %v2158_v19  ;;  %v5330_v33 = vcombine.high %v7542_v6, %v7544_v35  ;;  %v7567_v22 = vld [vmem:[#allocation5 + $0x2b8] sm:$0xff] }
 0x1e0   : > { %v2446_v25 = vmul.f32 0.70710677, %v7511_v26  ;;  %v1410_v36 = vpop.f32.mrb[35].mxu1  ;;  %1881 = vmatprep.subr.bf16.mxu1 %v5306_v61  ;;  %v2935_v18 = vadd.f32 1.0, %v6151_v16  ;;  %v7534_v40 = vadd.f32 %v1408_v8, %v7298_v62  ;;  %4464 = vmatpush1.bf16.msra.mxu0 %v5982_v12  ;;  %v3183_v60 = vmul.f32 %v2927_v0, %v2159_v20  ;;  %v5991_v21 = vld [vmem:[#allocation8 + $0x1d0] ss:$8 sps:$4 sm:$0xff]  }
 0x1e1   : > { %v2447_v29 = vmul.f32 0.70710677, %v7517_v4  ;;  %v3190_v49 = vmul.f32 %v2934_v2, %v2166_v63  ;;  %v7537_v39 = vadd.f32 %v1410_v36, %v7302_v44  ;;  %4465 = vmatprep.subr.bf16.mxu0 %v5987_v53  ;;  %v5329_v61 = vcombine.low %v7542_v6, %v7544_v35  ;;  %v7565_v53 = vld [vmem:[#allocation5 + $0x298] sm:$0xff]  ;;  %v6617_v63 = vld [vmem:[%s7109_s10 + $0x40] ss:$8 sps:$4 sm:$0xff]  }
 0x1e2   : > { %6160 = verf.f32 %v2446_v25  ;;  %1739 = vmatmul.mubr.bf16.gmra.mrb[140].mxu1 %v6615_v37  ;;  %v3191_v42 = vmul.f32 %v2935_v18, %v2167_v30  ;;  %v2454_v43 = vmul.f32 0.70710677, %v7534_v40  ;;  %v2182_v0 = vmul.f32 0.5, %v7493_v50  ;;  %v5996_v2 = vld [vmem:[#allocation8 + $0x1e4] ss:$8 sps:$4 sm:$0xff]   ;;  %v7583_v18 = vld [vmem:[#allocation5 + $0x2d8] sm:$0xff] }
 0x1e3   : > { %6162 = verf.f32 %v2447_v29  ;;  %1748 = vmatprep.mubr.bf16.mxu1 %v6616_v58  ;;  %1882 = vmatpush1.bf16.msra.mxu1 %v5305_v28  ;;  %v2455_v3 = vmul.f32 0.70710677, %v7537_v39  ;;  %v3390_v10 = vpack.c.bf16 %v3190_v49, %v3182_v41  ;;  %v6618_v30 = vld [vmem:[%s7109_s10 + $0x54] ss:$8 sps:$4 sm:$0xff]   ;;  %v5338_v37 = vcombine.high %v7565_v53, %v7567_v22  ;;  %v5994_v58 = vld [vmem:[#allocation8 + $0x1e0] ss:$8 sps:$4 sm:$0xff]  }
 0x1e4   : > { %v6153_v47 = vpop.eup %6152  ;;  %1883 = vmatprep.subr.bf16.mxu1 %v5314_v14  ;;  %6164 = verf.f32 %v2454_v43  ;;  %v3391_v48 = vpack.c.bf16 %v3191_v42, %v3183_v60  ;;  %4466 = vmatpush1.bf16.msra.mxu0 %v5985_v34  ;;  %v7585_v29 = vld [vmem:[#allocation5 + $0x2f8] sm:$0xff]  ;;  %v5337_v43 = vcombine.low %v7565_v53, %v7567_v22  ;;  %v2199_v53 = vmul.f32 0.5, %v7537_v39  ;;  %v6002_v39 = vld [vmem:[#allocation8 + $0x204] ss:$8 sps:$4 sm:$0xff]  }
 0x1e5   : > { %v6155_v17 = vpop.eup %6154  ;;  %v1414_v31 = vpop.f32.mrb[36].mxu1  ;;  %v2942_v45 = vadd.f32 1.0, %v6153_v47  ;;  %6166 = verf.f32 %v2455_v3  ;;  %4467 = vmatprep.subr.bf16.mxu0 %v5990_v38 }
 0x1e6   : > { %v7552_v54 = vadd.f32 %v1414_v31, %v7298_v62  ;;  %v1416_v55 = vpop.f32.mrb[37].mxu1  ;;  %v6157_v9 = vpop.eup %6156  ;;  %v2943_v28 = vadd.f32 1.0, %v6155_v17  ;;  %4342 = vmatprep.mubr.bf16.mxu0 %v3391_v48  ;;  %v5999_v17 = vld [vmem:[#allocation8 + $0x1f4] ss:$8 sps:$4 sm:$0xff]   ;;  %v2190_v48 = vmul.f32 0.5, %v7511_v26 }
 0x1e7   : > { %v7558_v12 = vadd.f32 %v1416_v55, %v7302_v44  ;;  %v1418_v11 = vpop.f32.mrb[38].mxu1  ;;  %1884 = vmatpush1.bf16.msra.mxu1 %v5313_v52  ;;  %v6159_v19 = vpop.eup %6158  ;;  %v2950_v8 = vadd.f32 1.0, %v6157_v9  ;;  %4343 = vmatmul.mubr.bf16.gmra.mrb[24].mxu0 %v3390_v10  ;;  %v3198_v16 = vmul.f32 %v2942_v45, %v2174_v23  ;;  %v5346_v55 = vcombine.high %v7583_v18, %v7585_v29 }
 0x1e8   : > { %v2462_v14 = vmul.f32 0.70710677, %v7552_v54  ;;  %v1420_v59 = vpop.f32.mrb[39].mxu1  ;;  %1885 = vmatprep.subr.bf16.mxu1 %v5322_v51  ;;  %v2951_v27 = vadd.f32 1.0, %v6159_v19  ;;  %v7575_v13 = vadd.f32 %v1418_v11, %v7298_v62  ;;  %4468 = vmatpush1.bf16.msra.mxu0 %v5988_v24  ;;  %v3199_v7 = vmul.f32 %v2943_v28, %v2175_v46 }
 0x1e9   : > { %v2463_v52 = vmul.f32 0.70710677, %v7558_v12  ;;  %v3206_v50 = vmul.f32 %v2950_v8, %v2182_v0  ;;  %v7578_v20 = vadd.f32 %v1420_v59, %v7302_v44  ;;  %4469 = vmatprep.subr.bf16.mxu0 %v5993_v5  ;;  %v5345_v51 = vcombine.low %v7583_v18, %v7585_v29  ;;  %v5997_v5 = vld [vmem:[#allocation8 + $0x1f0] ss:$8 sps:$4 sm:$0xff]  }
 0x1ea   : > { %6168 = verf.f32 %v2462_v14  ;;  %1749 = vmatmul.mubr.bf16.gmra.mrb[144].mxu1 %v6617_v63  ;;  %v3207_v25 = vmul.f32 %v2951_v27, %v2183_v1  ;;  %v2470_v36 = vmul.f32 0.70710677, %v7575_v13  ;;  %v2191_v23 = vmul.f32 0.5, %v7517_v4  ;;  %v7614_v4 = vld [vmem:[#allocation5 + $0x318] sm:$0xff]  ;;  %v6620_v1 = vld [vmem:[%s7109_s10 + $0x64] ss:$8 sps:$4 sm:$0xff]  }
 0x1eb   : > { %6170 = verf.f32 %v2463_v52  ;;  %1758 = vmatprep.mubr.bf16.mxu1 %v6618_v30  ;;  %1886 = vmatpush1.bf16.msra.mxu1 %v5321_v15  ;;  %v2471_v41 = vmul.f32 0.70710677, %v7578_v20  ;;  %v3398_v49 = vpack.c.bf16 %v3206_v50, %v3198_v16  ;;  %v2198_v28 = vmul.f32 0.5, %v7534_v40  ;;  %v7616_v40 = vld [vmem:[#allocation5 + $0x338] sm:$0xff] }
 0x1ec   : > { %v6161_v34 = vpop.eup %6160  ;;  %1887 = vmatprep.subr.bf16.mxu1 %v5330_v33  ;;  %6172 = verf.f32 %v2470_v36  ;;  %v3399_v42 = vpack.c.bf16 %v3207_v25, %v3199_v7  ;;  %4470 = vmatpush1.bf16.msra.mxu0 %v5991_v21  ;;  %v6619_v0 = vld [vmem:[%s7109_s10 + $0x50] ss:$8 sps:$4 sm:$0xff]   ;;  %v5354_v63 = vcombine.high %v7614_v4, %v7616_v40  ;;  %v5353_v36 = vcombine.low %v7614_v4, %v7616_v40 }
 0x1ed   : > { %v6163_v38 = vpop.eup %6162  ;;  %v1424_v60 = vpop.f32.mrb[40].mxu1  ;;  %v2958_v47 = vadd.f32 1.0, %v6161_v34  ;;  %6174 = verf.f32 %v2471_v41  ;;  %4471 = vmatprep.subr.bf16.mxu0 %v5996_v2  ;;  %v7624_v27 = vld [vmem:[#allocation5 + $0x358] sm:$0xff] }
 0x1ee   : > { %v7593_v3 = vadd.f32 %v1424_v60, %v7298_v62  ;;  %v1426_v10 = vpop.f32.mrb[41].mxu1  ;;  %v6165_v31 = vpop.eup %6164  ;;  %v2959_v15 = vadd.f32 1.0, %v6163_v38  ;;  %4352 = vmatprep.mubr.bf16.mxu0 %v3399_v42  ;;  %v7626_v52 = vld [vmem:[#allocation5 + $0x378] sm:$0xff]  ;;  %v2206_v38 = vmul.f32 0.5, %v7552_v54 }
 0x1ef   : > { %v7599_v24 = vadd.f32 %v1426_v10, %v7302_v44  ;;  %v1428_v45 = vpop.f32.mrb[42].mxu1  ;;  %1888 = vmatpush1.bf16.msra.mxu1 %v5329_v61  ;;  %v6167_v9 = vpop.eup %6166  ;;  %v2966_v26 = vadd.f32 1.0, %v6165_v31  ;;  %4353 = vmatmul.mubr.bf16.gmra.mrb[28].mxu0 %v3398_v49  ;;  %v3214_v22 = vmul.f32 %v2958_v47, %v2190_v48  ;;  %v5362_v49 = vcombine.high %v7624_v27, %v7626_v52 }
 0x1f0   : > { %v2478_v11 = vmul.f32 0.70710677, %v7593_v3  ;;  %v1430_v33 = vpop.f32.mrb[43].mxu1  ;;  %1889 = vmatprep.subr.bf16.mxu1 %v5338_v37  ;;  %v2967_v6 = vadd.f32 1.0, %v6167_v9  ;;  %v7612_v61 = vadd.f32 %v1428_v45, %v7298_v62  ;;  %4472 = vmatpush1.bf16.msra.mxu0 %v5994_v58  ;;  %v3215_v8 = vmul.f32 %v2959_v15, %v2191_v23  ;;  %v7655_v45 = vld [vmem:[#allocation5 + $0x398] sm:$0xff] }
 0x1f1   : > { %v2479_v35 = vmul.f32 0.70710677, %v7599_v24  ;;  %v3222_v19 = vmul.f32 %v2966_v26, %v2198_v28  ;;  %v7619_v46 = vadd.f32 %v1430_v33, %v7302_v44  ;;  %4473 = vmatprep.subr.bf16.mxu0 %v5999_v17  ;;  %v5361_v58 = vcombine.low %v7624_v27, %v7626_v52  ;;  %v6621_v9 = vld [vmem:[%s7109_s10 + $0x60] ss:$8 sps:$4 sm:$0xff]   ;;  %v6622_v26 = vld [vmem:[%s7109_s10 + $0x74] ss:$8 sps:$4 sm:$0xff]  }
 0x1f2   : > { %6176 = verf.f32 %v2478_v11  ;;  %1759 = vmatmul.mubr.bf16.gmra.mrb[148].mxu1 %v6619_v0  ;;  %v3223_v14 = vmul.f32 %v2967_v6, %v2199_v53  ;;  %v2486_v59 = vmul.f32 0.70710677, %v7612_v61  ;;  %v2207_v10 = vmul.f32 0.5, %v7558_v12  ;;  %v7657_v12 = vld [vmem:[#allocation5 + $0x3b8] sm:$0xff] }
 0x1f3   : > { %6178 = verf.f32 %v2479_v35  ;;  %1768 = vmatprep.mubr.bf16.mxu1 %v6620_v1  ;;  %1890 = vmatpush1.bf16.msra.mxu1 %v5337_v43  ;;  %v2487_v16 = vmul.f32 0.70710677, %v7619_v46  ;;  %v3406_v50 = vpack.c.bf16 %v3222_v19, %v3214_v22  ;;  %v2214_v17 = vmul.f32 0.5, %v7575_v13  ;;  %v7665_v11 = vld [vmem:[#allocation5 + $0x3d8] sm:$0xff] }
 0x1f4   : > { %v6169_v21 = vpop.eup %6168  ;;  %1891 = vmatprep.subr.bf16.mxu1 %v5346_v55  ;;  %6180 = verf.f32 %v2486_v59  ;;  %v3407_v25 = vpack.c.bf16 %v3223_v14, %v3215_v8  ;;  %4474 = vmatpush1.bf16.msra.mxu0 %v5997_v5  ;;  %v2215_v15 = vmul.f32 0.5, %v7578_v20  ;;  %v7667_v33 = vld [vmem:[#allocation5 + $0x3f8] sm:$0xff]  ;;  %v5370_v4 = vcombine.high %v7655_v45, %v7657_v12 }
 0x1f5   : > { %v6171_v2 = vpop.eup %6170  ;;  %v1434_v7 = vpop.f32.mrb[44].mxu1  ;;  %v2974_v30 = vadd.f32 1.0, %v6169_v21  ;;  %6182 = verf.f32 %v2487_v16  ;;  %4636 = vmatprep.subr.bf16.mxu0 %v6002_v39  ;;  %v5369_v0 = vcombine.low %v7655_v45, %v7657_v12  ;;  %v5378_v59 = vcombine.high %v7665_v11, %v7667_v33 }
 0x1f6   : > { %v7634_v34 = vadd.f32 %v1434_v7, %v7298_v62  ;;  %v1436_v41 = vpop.f32.mrb[45].mxu1  ;;  %v6173_v37 = vpop.eup %6172  ;;  %v2975_v60 = vadd.f32 1.0, %v6171_v2  ;;  %4362 = vmatprep.mubr.bf16.mxu0 %v3407_v25  ;;  %v2222_v27 = vmul.f32 0.5, %v7593_v3  ;;  %v2223_v2 = vmul.f32 0.5, %v7599_v24 }
 0x1f7   : > { %v7640_v42 = vadd.f32 %v1436_v41, %v7302_v44  ;;  %v1438_v43 = vpop.f32.mrb[46].mxu1  ;;  %1892 = vmatpush1.bf16.msra.mxu1 %v5345_v51  ;;  %v6175_v47 = vpop.eup %6174  ;;  %v2982_v54 = vadd.f32 1.0, %v6173_v37  ;;  %4363 = vmatmul.mubr.bf16.gmra.mrb[32].mxu0 %v3406_v50  ;;  %v3230_v13 = vmul.f32 %v2974_v30, %v2206_v38  ;;  %v5377_v50 = vcombine.low %v7665_v11, %v7667_v33 }
 0x1f8   : > { %v2494_v31 = vmul.f32 0.70710677, %v7634_v34  ;;  %v1440_v48 = vpop.f32.mrb[47].mxu1  ;;  %1893 = vmatprep.subr.bf16.mxu1 %v5354_v63  ;;  %v2983_v18 = vadd.f32 1.0, %v6175_v47  ;;  %v7653_v51 = vadd.f32 %v1438_v43, %v7298_v62  ;;  %v3231_v20 = vmul.f32 %v2975_v60, %v2207_v10 }
 0x1f9   : > { %v2495_v29 = vmul.f32 0.70710677, %v7640_v42  ;;  %v3238_v55 = vmul.f32 %v2982_v54, %v2214_v17  ;;  %v7660_v5 = vadd.f32 %v1440_v48, %v7302_v44  ;;  %v2230_v7 = vmul.f32 0.5, %v7612_v61  ;;  %v6623_v61 = vld [vmem:[%s7109_s10 + $0x70] ss:$8 sps:$4 sm:$0xff]  }
 0x1fa   : > { %6184 = verf.f32 %v2494_v31  ;;  %1769 = vmatmul.mubr.bf16.gmra.mrb[152].mxu1 %v6621_v9  ;;  %v3239_v23 = vmul.f32 %v2983_v18, %v2215_v15  ;;  %v2502_v28 = vmul.f32 0.70710677, %v7653_v51  ;;  %v2231_v30 = vmul.f32 0.5, %v7619_v46  ;;  %v6624_v46 = vld [vmem:[%s7109_s10 + $0x84] ss:$8 sps:$4 sm:$0xff]  }
 0x1fb   : > { %6186 = verf.f32 %v2495_v29  ;;  %1778 = vmatprep.mubr.bf16.mxu1 %v6622_v26  ;;  %1894 = vmatpush1.bf16.msra.mxu1 %v5353_v36  ;;  %v2503_v6 = vmul.f32 0.70710677, %v7660_v5  ;;  %v3414_v35 = vpack.c.bf16 %v3238_v55, %v3230_v13  ;;  %v2238_v13 = vmul.f32 0.5, %v7634_v34 }
 0x1fc   : > { %v6177_v53 = vpop.eup %6176  ;;  %1895 = vmatprep.subr.bf16.mxu1 %v5362_v49  ;;  %6188 = verf.f32 %v2502_v28  ;;  %v3415_v19 = vpack.c.bf16 %v3239_v23, %v3231_v20  ;;  %v2239_v28 = vmul.f32 0.5, %v7640_v42  ;;  %v2246_v26 = vmul.f32 0.5, %v7653_v51  ;;  %v6625_v51 = vld [vmem:[%s7109_s10 + $0x80] ss:$8 sps:$4 sm:$0xff]  }
 0x1fd   : > { %v6179_v40 = vpop.eup %6178  ;;  %v1444_v22 = vpop.f32.mrb[48].mxu1  ;;  %v2990_v39 = vadd.f32 1.0, %v6177_v53  ;;  %6190 = verf.f32 %v2503_v6  ;;  %v2247_v34 = vmul.f32 0.5, %v7660_v5  ;;  %v6626_v5 = vld [vmem:[%s7109_s10 + $0x94] ss:$8 sps:$4 sm:$0xff]  }
 0x1fe   : > { %v7675_v8 = vadd.f32 %v1444_v22, %v7298_v62  ;;  %v1446_v14 = vpop.f32.mrb[49].mxu1  ;;  %v6181_v1 = vpop.eup %6180  ;;  %v2991_v52 = vadd.f32 1.0, %v6179_v40  ;;  %4372 = vmatprep.mubr.bf16.mxu0 %v3415_v19 }
 0x1ff   : > { %v7681_v21 = vadd.f32 %v1446_v14, %v7302_v44  ;;  %v1448_v16 = vpop.f32.mrb[50].mxu1  ;;  %1896 = vmatpush1.bf16.msra.mxu1 %v5361_v58  ;;  %v6183_v63 = vpop.eup %6182  ;;  %v2998_v25 = vadd.f32 1.0, %v6181_v1  ;;  %4373 = vmatmul.mubr.bf16.gmra.mrb[36].mxu0 %v3414_v35  ;;  %v3246_v38 = vmul.f32 %v2990_v39, %v2222_v27 }
 0x200   : > { %v2510_v36 = vmul.f32 0.70710677, %v7675_v8  ;;  %v1450_v3 = vpop.f32.mrb[51].mxu1  ;;  %1897 = vmatprep.subr.bf16.mxu1 %v5370_v4  ;;  %v2999_v41 = vadd.f32 1.0, %v6183_v63  ;;  %v7691_v37 = vadd.f32 %v1448_v16, %v7298_v62  ;;  %v3247_v43 = vmul.f32 %v2991_v52, %v2223_v2 }
 0x201   : > { %v2511_v49 = vmul.f32 0.70710677, %v7681_v21  ;;  %v3254_v60 = vmul.f32 %v2998_v25, %v2230_v7  ;;  %v7694_v24 = vadd.f32 %v1450_v3, %v7302_v44  ;;  %v460_v7 = vsub.s32 2, %v7290_v56 }
 0x202   : > { %6192 = verf.f32 %v2510_v36  ;;  %1779 = vmatmul.mubr.bf16.gmra.mrb[156].mxu1 %v6623_v61  ;;  %v3255_v58 = vmul.f32 %v2999_v41, %v2231_v30  ;;  %v2518_v47 = vmul.f32 0.70710677, %v7691_v37  ;;  %v2254_v36 = vmul.f32 0.5, %v7675_v8 }
 0x203   : > { %6194 = verf.f32 %v2511_v49  ;;  %1788 = vmatprep.mubr.bf16.mxu1 %v6624_v46  ;;  %1898 = vmatpush1.bf16.msra.mxu1 %v5369_v0  ;;  %v2519_v17 = vmul.f32 0.70710677, %v7694_v24  ;;  %v3422_v54 = vpack.c.bf16 %v3254_v60, %v3246_v38  ;;  %v464_v49 = vsub.s32 3, %v7290_v56 }
 0x204   : > { %v6185_v10 = vpop.eup %6184  ;;  %1899 = vmatprep.subr.bf16.mxu1 %v5378_v59  ;;  %6196 = verf.f32 %v2518_v47  ;;  %v3423_v15 = vpack.c.bf16 %v3255_v58, %v3247_v43  ;;  %v2255_v60 = vmul.f32 0.5, %v7681_v21  ;;  %v2262_v61 = vmul.f32 0.5, %v7691_v37  ;;  %v6627_v37 = vld [vmem:[%s7109_s10 + $0x90] ss:$8 sps:$4 sm:$0xff]  }
 0x205   : > { %v6187_v31 = vpop.eup %6186  ;;  %v1454_v48 = vpop.f32.mrb[52].mxu1  ;;  %v3006_v18 = vadd.f32 1.0, %v6185_v10  ;;  %6198 = verf.f32 %v2519_v17  ;;  %v2263_v47 = vmul.f32 0.5, %v7694_v24  ;;  %v6628_v24 = vld [vmem:[%s7109_s10 + $0xa4] ss:$8 sps:$4 sm:$0xff]  }
 0x206   : > { %v7701_v29 = vadd.f32 %v1454_v48, %v7298_v62  ;;  %v1456_v45 = vpop.f32.mrb[53].mxu1  ;;  %v6189_v12 = vpop.eup %6188  ;;  %v3007_v55 = vadd.f32 1.0, %v6187_v31  ;;  %4382 = vmatprep.mubr.bf16.mxu0 %v3423_v15 }
 0x207   : > { %v7705_v9 = vadd.f32 %v1456_v45, %v7302_v44  ;;  %v1458_v20 = vpop.f32.mrb[54].mxu1  ;;  %1900 = vmatpush1.bf16.msra.mxu1 %v5377_v50  ;;  %v6191_v23 = vpop.eup %6190  ;;  %v3014_v11 = vadd.f32 1.0, %v6189_v12  ;;  %4383 = vmatmul.mubr.bf16.gmra.mrb[40].mxu0 %v3422_v54  ;;  %v3262_v40 = vmul.f32 %v3006_v18, %v2238_v13 }
 0x208   : > { %v2526_v33 = vmul.f32 0.70710677, %v7701_v29  ;;  %v1460_v53 = vpop.f32.mrb[55].mxu1  ;;  %v3015_v6 = vadd.f32 1.0, %v6191_v23  ;;  %v7713_v4 = vadd.f32 %v1458_v20, %v7298_v62  ;;  %v3263_v19 = vmul.f32 %v3007_v55, %v2239_v28 }
 0x209   : > { %v2527_v35 = vmul.f32 0.70710677, %v7705_v9  ;;  %v3270_v22 = vmul.f32 %v3014_v11, %v2246_v26  ;;  %v7716_v42 = vadd.f32 %v1460_v53, %v7302_v44 }
 0x20a   : > { %6200 = verf.f32 %v2526_v33  ;;  %1789 = vmatmul.mubr.bf16.gmra.mrb[160].mxu1 %v6625_v51  ;;  %v3271_v0 = vmul.f32 %v3015_v6, %v2247_v34  ;;  %v2534_v39 = vmul.f32 0.70710677, %v7713_v4  ;;  %v6629_v33 = vld [vmem:[#allocation7] sm:$0xff]  ;;  %v2270_v6 = vmul.f32 0.5, %v7701_v29 }
 0x20b   : > { %6202 = verf.f32 %v2527_v35  ;;  %1798 = vmatprep.mubr.bf16.mxu1 %v6626_v5  ;;  %v2535_v59 = vmul.f32 0.70710677, %v7716_v42  ;;  %v3430_v1 = vpack.c.bf16 %v3270_v22, %v3262_v40  ;;  %v7749_v53 = vrot.slane %v6629_v33, %v460_v7 }
 0x20c   : > { %v6193_v14 = vpop.eup %6192  ;;  %6204 = verf.f32 %v2534_v39  ;;  %v3431_v16 = vpack.c.bf16 %v3271_v0, %v3263_v19  ;;  %v7755_v51 = vrot.slane %v6629_v33, %v464_v49  ;;  %v2271_v0 = vmul.f32 0.5, %v7705_v9 }
 0x20d   : > { %v6195_v27 = vpop.eup %6194  ;;  %v1464_v52 = vpop.f32.mrb[56].mxu1  ;;  %v3022_v50 = vadd.f32 1.0, %v6193_v14  ;;  %6206 = verf.f32 %v2535_v59  ;;  %v2278_v39 = vmul.f32 0.5, %v7713_v4  ;;  %v2279_v59 = vmul.f32 0.5, %v7716_v42  ;;  %v6630_v4 = vld [vmem:[%s7109_s10 + $0xa0] ss:$8 sps:$4 sm:$0xff]  }
 0x20e   : > { %v7723_v63 = vadd.f32 %v1464_v52, %v7298_v62  ;;  %v1466_v2 = vpop.f32.mrb[57].mxu1  ;;  %v6197_v25 = vpop.eup %6196  ;;  %v3023_v3 = vadd.f32 1.0, %v6195_v27  ;;  %4392 = vmatprep.mubr.bf16.mxu0 %v3431_v16  ;;  %v6631_v42 = vld [vmem:[%s7109_s10 + $0xb4] ss:$8 sps:$4 sm:$0xff]  }
 0x20f   : > { %v7728_v30 = vadd.f32 %v1466_v2, %v7302_v44  ;;  %v1468_v41 = vpop.f32.mrb[58].mxu1  ;;  %v6199_v38 = vpop.eup %6198  ;;  %v3030_v43 = vadd.f32 1.0, %v6197_v25  ;;  %4393 = vmatmul.mubr.bf16.gmra.mrb[44].mxu0 %v3430_v1  ;;  %v3278_v54 = vmul.f32 %v3022_v50, %v2254_v36 }
 0x210   : > { %v2542_v58 = vmul.f32 0.70710677, %v7723_v63  ;;  %v1470_v8 = vpop.f32.mrb[59].mxu1  ;;  %v3031_v46 = vadd.f32 1.0, %v6199_v38  ;;  %v7737_v17 = vadd.f32 %v1468_v41, %v7298_v62  ;;  %v3279_v48 = vmul.f32 %v3023_v3, %v2255_v60 }
 0x211   : > { %v2543_v10 = vmul.f32 0.70710677, %v7728_v30  ;;  %v3286_v31 = vmul.f32 %v3030_v43, %v2262_v61  ;;  %v7740_v21 = vadd.f32 %v1470_v8, %v7302_v44 }
 0x212   : > { %6208 = verf.f32 %v2542_v58  ;;  %1799 = vmatmul.mubr.bf16.gmra.mrb[164].mxu1 %v6627_v37  ;;  %v3287_v15 = vmul.f32 %v3031_v46, %v2263_v47  ;;  %v2550_v18 = vmul.f32 0.70710677, %v7737_v17  ;;  %v2286_v58 = vmul.f32 0.5, %v7723_v63 }
 0x213   : > { %6210 = verf.f32 %v2543_v10  ;;  %1808 = vmatprep.mubr.bf16.mxu1 %v6628_v24  ;;  %v2551_v12 = vmul.f32 0.70710677, %v7740_v21  ;;  %v3438_v13 = vpack.c.bf16 %v3286_v31, %v3278_v54  ;;  %v2287_v54 = vmul.f32 0.5, %v7728_v30 }
 0x214   : > { %v6201_v45 = vpop.eup %6200  ;;  %6212 = verf.f32 %v2550_v18  ;;  %v3439_v23 = vpack.c.bf16 %v3287_v15, %v3279_v48  ;;  %v2294_v31 = vmul.f32 0.5, %v7737_v17  ;;  %v2295_v63 = vmul.f32 0.5, %v7740_v21  ;;  %v6632_v17 = vld [vmem:[%s7109_s10 + $0xb0] ss:$8 sps:$4 sm:$0xff]   ;;  %v6633_v21 = vld [vmem:[%s7109_s10 + $0xc4] ss:$8 sps:$4 sm:$0xff]  }
 0x215   : > { %v6203_v55 = vpop.eup %6202  ;;  %v1474_v20 = vpop.f32.mrb[60].mxu1  ;;  %v3038_v28 = vadd.f32 1.0, %v6201_v45  ;;  %6214 = verf.f32 %v2551_v12 }
 0x216   : > { %v7747_v26 = vadd.f32 %v1474_v20, %v7298_v62  ;;  %v1476_v11 = vpop.f32.mrb[61].mxu1  ;;  %v6205_v34 = vpop.eup %6204  ;;  %v3039_v35 = vadd.f32 1.0, %v6203_v55  ;;  %4402 = vmatprep.mubr.bf16.mxu0 %v3439_v23 }
 0x217   : > { %v7753_v40 = vadd.f32 %v1476_v11, %v7302_v44  ;;  %v1478_v22 = vpop.f32.mrb[62].mxu1  ;;  %v6207_v19 = vpop.eup %6206  ;;  %v3046_v5 = vadd.f32 1.0, %v6205_v34  ;;  %4403 = vmatmul.mubr.bf16.gmra.mrb[48].mxu0 %v3438_v13  ;;  %v3294_v16 = vmul.f32 %v3038_v28, %v2270_v6 }
 0x218   : > { %v2558_v14 = vmul.f32 0.70710677, %v7747_v26  ;;  %v1480_v29 = vpop.f32.mrb[63].mxu1  ;;  %v3047_v1 = vadd.f32 1.0, %v6207_v19  ;;  %v7763_v52 = vadd.f32 %v1478_v22, %v7298_v62  ;;  %v3295_v2 = vmul.f32 %v3039_v35, %v2271_v0 }
 0x219   : > { %v2559_v27 = vmul.f32 0.70710677, %v7753_v40  ;;  %v3302_v50 = vmul.f32 %v3046_v5, %v2278_v39  ;;  %v7766_v9 = vadd.f32 %v1480_v29, %v7302_v44  ;;  %v2302_v5 = vmul.f32 0.5, %v7747_v26 }
 0x21a   : > { %6216 = verf.f32 %v2558_v14  ;;  %1809 = vmatmul.mubr.bf16.gmra.mrb[168].mxu1 %v6630_v4  ;;  %v3303_v7 = vmul.f32 %v3047_v1, %v2279_v59  ;;  %v2566_v25 = vmul.f32 0.70710677, %v7763_v52 }
 0x21b   : > { %6218 = verf.f32 %v2559_v27  ;;  %1818 = vmatprep.mubr.bf16.mxu1 %v6631_v42  ;;  %v2567_v3 = vmul.f32 0.70710677, %v7766_v9  ;;  %v3446_v62 = vpack.c.bf16 %v3302_v50, %v3294_v16  ;;  %v2303_v27 = vmul.f32 0.5, %v7753_v40 }
 0x21c   : > { %v6209_v36 = vpop.eup %6208  ;;  %6220 = verf.f32 %v2566_v25  ;;  %v3447_v38 = vpack.c.bf16 %v3303_v7, %v3295_v2  ;;  %v2310_v16 = vmul.f32 0.5, %v7763_v52  ;;  %v2311_v26 = vmul.f32 0.5, %v7766_v9  ;;  %v6634_v52 = vld [vmem:[%s7109_s10 + $0xc0] ss:$8 sps:$4 sm:$0xff]   ;;  %v6635_v9 = vld [vmem:[%s7109_s10 + $0xd4] ss:$8 sps:$4 sm:$0xff]  }
 0x21d   : > { %v6211_v41 = vpop.eup %6210  ;;  %v1517_v49 = vpop.f32.mrb[64].mxu1  ;;  %v3054_v60 = vadd.f32 1.0, %v6209_v36  ;;  %6222 = verf.f32 %v2567_v3 }
 0x21e   : > { %v7773_v44 = vadd.f32 %v1517_v49, %v7749_v53  ;;  %v1519_v61 = vpop.f32.mrb[65].mxu1  ;;  %v6213_v43 = vpop.eup %6212  ;;  %v3055_v8 = vadd.f32 1.0, %v6211_v41  ;;  %4412 = vmatprep.mubr.bf16.mxu0 %v3447_v38 }
 0x21f   : > { %v7777_v47 = vadd.f32 %v1519_v61, %v7755_v51  ;;  %v1521_v46 = vpop.f32.mrb[66].mxu1  ;;  %v6215_v10 = vpop.eup %6214  ;;  %v3062_v37 = vadd.f32 1.0, %v6213_v43  ;;  %4413 = vmatmul.mubr.bf16.gmra.mrb[52].mxu0 %v3446_v62  ;;  %v3310_v12 = vmul.f32 %v3054_v60, %v2286_v58 }
 0x220   : > { %v2320_v48 = vmul.f32 0.70710677, %v7773_v44  ;;  %v1523_v15 = vpop.f32.mrb[67].mxu1  ;;  %v3063_v18 = vadd.f32 1.0, %v6215_v10  ;;  %v7785_v45 = vadd.f32 %v1521_v46, %v7749_v53  ;;  %v3311_v55 = vmul.f32 %v3055_v8, %v2287_v54 }
 0x221   : > { %v2321_v24 = vmul.f32 0.70710677, %v7777_v47  ;;  %v3318_v13 = vmul.f32 %v3062_v37, %v2294_v31  ;;  %v7788_v30 = vadd.f32 %v1523_v15, %v7755_v51  ;;  %v2064_v37 = vmul.f32 0.5, %v7773_v44 }
 0x222   : > { %6224 = verf.f32 %v2320_v48  ;;  %1819 = vmatmul.mubr.bf16.gmra.mrb[172].mxu1 %v6632_v17  ;;  %v3319_v20 = vmul.f32 %v3063_v18, %v2295_v63  ;;  %v2328_v23 = vmul.f32 0.70710677, %v7785_v45 }
 0x223   : > { %6226 = verf.f32 %v2321_v24  ;;  %1828 = vmatprep.mubr.bf16.mxu1 %v6633_v21  ;;  %v2329_v11 = vmul.f32 0.70710677, %v7788_v30  ;;  %v3454_v33 = vpack.c.bf16 %v3318_v13, %v3310_v12  ;;  %v2065_v24 = vmul.f32 0.5, %v7777_v47 }
 0x224   : > { %v6217_v28 = vpop.eup %6216  ;;  %6228 = verf.f32 %v2328_v23  ;;  %v3455_v35 = vpack.c.bf16 %v3319_v20, %v3311_v55  ;;  %v2072_v12 = vmul.f32 0.5, %v7785_v45  ;;  %v2073_v44 = vmul.f32 0.5, %v7788_v30  ;;  %v6636_v45 = vld [vmem:[%s7109_s10 + $0xd0] ss:$8 sps:$4 sm:$0xff]   ;;  %v6637_v30 = vld [vmem:[%s7109_s10 + $0xe4] ss:$8 sps:$4 sm:$0xff]  }
 0x225   : > { %v6219_v34 = vpop.eup %6218  ;;  %v1527_v6 = vpop.f32.mrb[68].mxu1  ;;  %v3070_v22 = vadd.f32 1.0, %v6217_v28  ;;  %6230 = verf.f32 %v2329_v11 }
 0x226   : > { %v7795_v19 = vadd.f32 %v1527_v6, %v7749_v53  ;;  %v1529_v0 = vpop.f32.mrb[69].mxu1  ;;  %v6221_v39 = vpop.eup %6220  ;;  %v3071_v14 = vadd.f32 1.0, %v6219_v34  ;;  %4422 = vmatprep.mubr.bf16.mxu0 %v3455_v35 }
 0x227   : > { %v7799_v29 = vadd.f32 %v1529_v0, %v7755_v51  ;;  %v1531_v59 = vpop.f32.mrb[70].mxu1  ;;  %v6223_v1 = vpop.eup %6222  ;;  %v3078_v50 = vadd.f32 1.0, %v6221_v39  ;;  %4423 = vmatmul.mubr.bf16.gmra.mrb[56].mxu0 %v3454_v33  ;;  %v3326_v36 = vmul.f32 %v3070_v22, %v2302_v5 }
 0x228   : > { %v2336_v4 = vmul.f32 0.70710677, %v7795_v19  ;;  %v1533_v2 = vpop.f32.mrb[71].mxu1  ;;  %v3079_v7 = vadd.f32 1.0, %v6223_v1  ;;  %v7807_v42 = vadd.f32 %v1531_v59, %v7749_v53  ;;  %v3327_v62 = vmul.f32 %v3071_v14, %v2303_v27  ;;  %v6000_v59 = vld [vmem:[#allocation8 + $0x200] ss:$8 sps:$4 sm:$0xff]  }
 0x229   : > { %v2337_v25 = vmul.f32 0.70710677, %v7799_v29  ;;  %v3334_v3 = vmul.f32 %v3078_v50, %v2310_v16  ;;  %v7810_v40 = vadd.f32 %v1533_v2, %v7755_v51  ;;  %v6005_v50 = vld [vmem:[#allocation8 + $0x214] ss:$8 sps:$4 sm:$0xff]   ;;  %v2080_v2 = vmul.f32 0.5, %v7795_v19 }
 0x22a   : > { %6232 = verf.f32 %v2336_v4  ;;  %1829 = vmatmul.mubr.bf16.gmra.mrb[176].mxu1 %v6634_v52  ;;  %v3335_v41 = vmul.f32 %v3079_v7, %v2311_v26  ;;  %v2344_v49 = vmul.f32 0.70710677, %v7807_v42  ;;  %v2088_v52 = vmul.f32 0.5, %v7807_v42 }
 0x22b   : > { %6234 = verf.f32 %v2337_v25  ;;  %1838 = vmatprep.mubr.bf16.mxu1 %v6635_v9  ;;  %v2345_v60 = vmul.f32 0.70710677, %v7810_v40  ;;  %v3462_v61 = vpack.c.bf16 %v3334_v3, %v3326_v36  ;;  %v2081_v3 = vmul.f32 0.5, %v7799_v29 }
 0x22c   : > { %v6225_v38 = vpop.eup %6224  ;;  %6236 = verf.f32 %v2344_v49  ;;  %v3463_v8 = vpack.c.bf16 %v3335_v41, %v3327_v62  ;;  %v2089_v9 = vmul.f32 0.5, %v7810_v40 }
 0x22d   : > { %v6227_v43 = vpop.eup %6226  ;;  %v1537_v58 = vpop.f32.mrb[72].mxu1  ;;  %v2832_v46 = vadd.f32 1.0, %v6225_v38  ;;  %6238 = verf.f32 %v2345_v60 }
 0x22e   : > { %v7817_v10 = vadd.f32 %v1537_v58, %v7749_v53  ;;  %v1539_v54 = vpop.f32.mrb[73].mxu1  ;;  %v6229_v31 = vpop.eup %6228  ;;  %v2833_v48 = vadd.f32 1.0, %v6227_v43  ;;  %4432 = vmatprep.mubr.bf16.mxu0 %v3463_v8  ;;  %v6638_v58 = vld [vmem:[%s7109_s10 + $0xe0] ss:$8 sps:$4 sm:$0xff]   ;;  %v6008_v8 = vld [vmem:[#allocation8 + $0x224] ss:$8 sps:$4 sm:$0xff]  }
 0x22f   : > { %v7821_v15 = vadd.f32 %v1539_v54, %v7755_v51  ;;  %v1541_v63 = vpop.f32.mrb[74].mxu1  ;;  %v6231_v18 = vpop.eup %6230  ;;  %v2840_v13 = vadd.f32 1.0, %v6229_v31  ;;  %4433 = vmatmul.mubr.bf16.gmra.mrb[60].mxu0 %v3462_v61  ;;  %v3088_v28 = vmul.f32 %v2832_v46, %v2064_v37  ;;  %v6003_v61 = vld [vmem:[#allocation8 + $0x210] ss:$8 sps:$4 sm:$0xff]   ;;  %v6639_v31 = vld [vmem:[%s7109_s10 + $0xf4] ss:$8 sps:$4 sm:$0xff]  }
 0x230   : > { %v2352_v17 = vmul.f32 0.70710677, %v7817_v10  ;;  %v1543_v55 = vpop.f32.mrb[75].mxu1  ;;  %v2841_v20 = vadd.f32 1.0, %v6231_v18  ;;  %v7829_v21 = vadd.f32 %v1541_v63, %v7749_v53  ;;  %v3089_v33 = vmul.f32 %v2833_v48, %v2065_v24 }
 0x231   : > { %v2353_v23 = vmul.f32 0.70710677, %v7821_v15  ;;  %v3096_v11 = vmul.f32 %v2840_v13, %v2072_v12  ;;  %v7832_v47 = vadd.f32 %v1543_v55, %v7755_v51  ;;  %v6006_v13 = vld [vmem:[#allocation8 + $0x220] ss:$8 sps:$4 sm:$0xff]  }
 0x232   : > { %6240 = verf.f32 %v2352_v17  ;;  %1839 = vmatmul.mubr.bf16.gmra.mrb[180].mxu1 %v6636_v45  ;;  %v3097_v34 = vmul.f32 %v2841_v20, %v2073_v44  ;;  %v2360_v6 = vmul.f32 0.70710677, %v7829_v21  ;;  %v6011_v20 = vld [vmem:[#allocation8 + $0x234] ss:$8 sps:$4 sm:$0xff]  }
 0x233   : > { %6242 = verf.f32 %v2353_v23  ;;  %1848 = vmatprep.mubr.bf16.mxu1 %v6637_v30  ;;  %v3344_v22 = vpack.c.bf16 %v3096_v11, %v3088_v28  ;;  %v2361_v0 = vmul.f32 0.70710677, %v7832_v47  ;;  %v2096_v28 = vmul.f32 0.5, %v7817_v10 }
 0x234   : > { %v6233_v35 = vpop.eup %6232  ;;  %6244 = verf.f32 %v2360_v6  ;;  %v3345_v14 = vpack.c.bf16 %v3097_v34, %v3089_v33  ;;  %v2097_v6 = vmul.f32 0.5, %v7821_v15  ;;  %v2104_v30 = vmul.f32 0.5, %v7829_v21 }
 0x235   : > { %v6235_v39 = vpop.eup %6234  ;;  %v1547_v5 = vpop.f32.mrb[76].mxu1  ;;  %v2848_v1 = vadd.f32 1.0, %v6233_v35  ;;  %6246 = verf.f32 %v2361_v0 }
 0x236   : > { %v7839_v27 = vadd.f32 %v1547_v5, %v7749_v53  ;;  %v1549_v16 = vpop.f32.mrb[77].mxu1  ;;  %v6237_v4 = vpop.eup %6236  ;;  %v2849_v26 = vadd.f32 1.0, %v6235_v39  ;;  %4475 = vmatprep.mubr.bf16.mxu0 %v3345_v14  ;;  %v2105_v39 = vmul.f32 0.5, %v7832_v47 }
 0x237   : > { %v7843_v7 = vadd.f32 %v1549_v16, %v7755_v51  ;;  %v1551_v25 = vpop.f32.mrb[78].mxu1  ;;  %v6239_v36 = vpop.eup %6238  ;;  %v2856_v62 = vadd.f32 1.0, %v6237_v4  ;;  %4476 = vmatmul.mubr.bf16.vlgmr.msra.gmra.mrb[0].mxu0 %v3344_v22  ;;  %v3104_v29 = vmul.f32 %v2848_v1, %v2080_v2  ;;  %v6640_v16 = vld [vmem:[%s7109_s10 + $0xf0] ss:$8 sps:$4 sm:$0xff]  }
 0x238   : > { %v2368_v41 = vmul.f32 0.70710677, %v7839_v27  ;;  %v1553_v49 = vpop.f32.mrb[79].mxu1  ;;  %v2857_v19 = vadd.f32 1.0, %v6239_v36  ;;  %v7851_v60 = vadd.f32 %v1551_v25, %v7749_v53  ;;  %4637 = vmatpush1.bf16.msra.mxu0 %v6000_v59  ;;  %v3105_v40 = vmul.f32 %v2849_v26, %v2081_v3  ;;  %v6009_v59 = vld [vmem:[#allocation8 + $0x230] ss:$8 sps:$4 sm:$0xff]  }
 0x239   : > { %v2369_v38 = vmul.f32 0.70710677, %v7843_v7  ;;  %v3112_v43 = vmul.f32 %v2856_v62, %v2088_v52  ;;  %v7854_v42 = vadd.f32 %v1553_v49, %v7755_v51  ;;  %4638 = vmatprep.subr.bf16.mxu0 %v6005_v50  ;;  %v6014_v50 = vld [vmem:[#allocation8 + $0x244] ss:$8 sps:$4 sm:$0xff]   ;;  %v6012_v49 = vld [vmem:[#allocation8 + $0x240] ss:$8 sps:$4 sm:$0xff]  }
 0x23a   : > { %6248 = verf.f32 %v2368_v41  ;;  %1849 = vmatmul.mubr.bf16.gmra.mrb[184].mxu1 %v6638_v58  ;;  %v3113_v46 = vmul.f32 %v2857_v19, %v2089_v9  ;;  %v2376_v54 = vmul.f32 0.70710677, %v7851_v60  ;;  %v6641_v26 = vld [vmem:[%s7109_s10 + $0x4] ss:$8 sps:$4 sm:$0xff]  }
 0x23b   : > { %6250 = verf.f32 %v2369_v38  ;;  %1858 = vmatprep.mubr.bf16.mxu1 %v6639_v31  ;;  %v2377_v48 = vmul.f32 0.70710677, %v7854_v42  ;;  %v3352_v63 = vpack.c.bf16 %v3112_v43, %v3104_v29  ;;  %v2112_v43 = vmul.f32 0.5, %v7839_v27 }
 0x23c   : > { %v6241_v37 = vpop.eup %6240  ;;  %6252 = verf.f32 %v2376_v54  ;;  %v3353_v12 = vpack.c.bf16 %v3113_v46, %v3105_v40  ;;  %4639 = vmatpush1.bf16.msra.mxu0 %v6003_v61  ;;  %v6017_v61 = vld [vmem:[#allocation8 + $0x254] ss:$8 sps:$4 sm:$0xff]   ;;  %v2113_v54 = vmul.f32 0.5, %v7843_v7  ;;  %v2120_v31 = vmul.f32 0.5, %v7851_v60 }
 0x23d   : > { %v6243_v18 = vpop.eup %6242  ;;  %v1557_v24 = vpop.f32.mrb[80].mxu1  ;;  %v2864_v17 = vadd.f32 1.0, %v6241_v37  ;;  %6254 = verf.f32 %v2377_v48  ;;  %4640 = vmatprep.subr.bf16.mxu0 %v6008_v8 }
 0x23e   : > { %v7861_v55 = vadd.f32 %v1557_v24, %v7749_v53  ;;  %v1559_v44 = vpop.f32.mrb[81].mxu1  ;;  %v6245_v23 = vpop.eup %6244  ;;  %v2865_v11 = vadd.f32 1.0, %v6243_v18  ;;  %4485 = vmatprep.mubr.bf16.mxu0 %v3353_v12  ;;  %v2121_v18 = vmul.f32 0.5, %v7854_v42 }
 0x23f   : > { %v7865_v45 = vadd.f32 %v1559_v44, %v7755_v51  ;;  %v1561_v33 = vpop.f32.mrb[82].mxu1  ;;  %v6247_v34 = vpop.eup %6246  ;;  %v2872_v35 = vadd.f32 1.0, %v6245_v23  ;;  %4486 = vmatmul.mubr.bf16.gmra.mrb[4].mxu0 %v3352_v63  ;;  %v3120_v15 = vmul.f32 %v2864_v17, %v2096_v28  ;;  %v6642_v44 = vld [vmem:[%s7109_s10] ss:$8 sps:$4 sm:$0xff]  }
 0x240   : > { %v2384_v22 = vmul.f32 0.70710677, %v7861_v55  ;;  %v1563_v0 = vpop.f32.mrb[83].mxu1  ;;  %v2873_v10 = vadd.f32 1.0, %v6247_v34  ;;  %v7873_v14 = vadd.f32 %v1561_v33, %v7749_v53  ;;  %4641 = vmatpush1.bf16.msra.mxu0 %v6006_v13  ;;  %v3121_v47 = vmul.f32 %v2865_v11, %v2097_v6  ;;  %v6015_v13 = vld [vmem:[#allocation8 + $0x250] ss:$8 sps:$4 sm:$0xff]  }
 0x241   : > { %v2385_v5 = vmul.f32 0.70710677, %v7865_v45  ;;  %v3128_v1 = vmul.f32 %v2872_v35, %v2104_v30  ;;  %v7876_v21 = vadd.f32 %v1563_v0, %v7755_v51  ;;  %4642 = vmatprep.subr.bf16.mxu0 %v6011_v20  ;;  %v6020_v20 = vld [vmem:[#allocation8 + $0x264] ss:$8 sps:$4 sm:$0xff]   ;;  %v6018_v0 = vld [vmem:[#allocation8 + $0x260] ss:$8 sps:$4 sm:$0xff]  }
 0x242   : > { %6256 = verf.f32 %v2384_v22  ;;  %1859 = vmatmul.mubr.bf16.gmra.mrb[188].mxu1 %v6640_v16  ;;  %v3129_v4 = vmul.f32 %v2873_v10, %v2105_v39  ;;  %v2392_v2 = vmul.f32 0.70710677, %v7873_v14  ;;  %v6643_v11 = vld [vmem:[%s7109_s10 + $0x14] ss:$8 sps:$4 sm:$0xff]  }
 0x243   : > { %6258 = verf.f32 %v2385_v5  ;;  %1901 = vmatprep.mubr.bf16.mxu1 %v6641_v26  ;;  %v2393_v36 = vmul.f32 0.70710677, %v7876_v21  ;;  %v3360_v3 = vpack.c.bf16 %v3128_v1, %v3120_v15  ;;  %v2128_v1 = vmul.f32 0.5, %v7861_v55 }
 0x244   : > { %v6249_v25 = vpop.eup %6248  ;;  %6260 = verf.f32 %v2392_v2  ;;  %v3361_v41 = vpack.c.bf16 %v3129_v4, %v3121_v47  ;;  %4643 = vmatpush1.bf16.msra.mxu0 %v6009_v59  ;;  %v6023_v59 = vld [vmem:[#allocation8 + $0x274] ss:$8 sps:$4 sm:$0xff]   ;;  %v2129_v2 = vmul.f32 0.5, %v7865_v45  ;;  %v2136_v26 = vmul.f32 0.5, %v7873_v14 }
 0x245   : > { %v6251_v52 = vpop.eup %6250  ;;  %v1567_v62 = vpop.f32.mrb[84].mxu1  ;;  %v2880_v9 = vadd.f32 1.0, %v6249_v25  ;;  %6262 = verf.f32 %v2393_v36  ;;  %4644 = vmatprep.subr.bf16.mxu0 %v6014_v50 }
 0x246   : > { %v7883_v19 = vadd.f32 %v1567_v62, %v7749_v53  ;;  %v1569_v38 = vpop.f32.mrb[85].mxu1  ;;  %v6253_v29 = vpop.eup %6252  ;;  %v2881_v58 = vadd.f32 1.0, %v6251_v52  ;;  %4495 = vmatprep.mubr.bf16.mxu0 %v3361_v41  ;;  %v2137_v52 = vmul.f32 0.5, %v7876_v21 }
 0x247   : > { %v7887_v8 = vadd.f32 %v1569_v38, %v7755_v51  ;;  %v1571_v40 = vpop.f32.mrb[86].mxu1  ;;  %v6255_v46 = vpop.eup %6254  ;;  %v2888_v37 = vadd.f32 1.0, %v6253_v29  ;;  %4496 = vmatmul.mubr.bf16.gmra.mrb[8].mxu0 %v3360_v3  ;;  %v3136_v7 = vmul.f32 %v2880_v9, %v2112_v43  ;;  %v6644_v38 = vld [vmem:[%s7109_s10 + $0x10] ss:$8 sps:$4 sm:$0xff]  }
 0x248   : > { %v2400_v48 = vmul.f32 0.70710677, %v7883_v19  ;;  %v1573_v63 = vpop.f32.mrb[87].mxu1  ;;  %v2889_v27 = vadd.f32 1.0, %v6255_v46  ;;  %v7895_v12 = vadd.f32 %v1571_v40, %v7749_v53  ;;  %4645 = vmatpush1.bf16.msra.mxu0 %v6012_v49  ;;  %v3137_v42 = vmul.f32 %v2881_v58, %v2113_v54  ;;  %v6021_v49 = vld [vmem:[#allocation8 + $0x270] ss:$8 sps:$4 sm:$0xff]  }
 0x249   : > { %v2401_v24 = vmul.f32 0.70710677, %v7887_v8  ;;  %v3144_v17 = vmul.f32 %v2888_v37, %v2120_v31  ;;  %v7898_v60 = vadd.f32 %v1573_v63, %v7755_v51  ;;  %4646 = vmatprep.subr.bf16.mxu0 %v6017_v61  ;;  %v6026_v61 = vld [vmem:[#allocation8 + $0x284] ss:$8 sps:$4 sm:$0xff]   ;;  %v6024_v63 = vld [vmem:[#allocation8 + $0x280] ss:$8 sps:$4 sm:$0xff]  }
 0x24a   : > { %6264 = verf.f32 %v2400_v48  ;;  %1902 = vmatmul.mubr.bf16.vlgmr.msra.gmra.mrb[192].mxu1 %v6642_v44  ;;  %v3145_v23 = vmul.f32 %v2889_v27, %v2121_v18  ;;  %v2408_v28 = vmul.f32 0.70710677, %v7895_v12  ;;  %v6645_v58 = vld [vmem:[%s7109_s10 + $0x24] ss:$8 sps:$4 sm:$0xff]  }
 0x24b   : > { %6266 = verf.f32 %v2401_v24  ;;  %1911 = vmatprep.mubr.bf16.mxu1 %v6643_v11  ;;  %v2409_v34 = vmul.f32 0.70710677, %v7898_v60  ;;  %v3368_v6 = vpack.c.bf16 %v3144_v17, %v3136_v7  ;;  %v2144_v17 = vmul.f32 0.5, %v7883_v19 }
 0x24c   : > { %v6257_v33 = vpop.eup %6256  ;;  %6268 = verf.f32 %v2408_v28  ;;  %v3369_v22 = vpack.c.bf16 %v3145_v23, %v3137_v42  ;;  %4647 = vmatpush1.bf16.msra.mxu0 %v6015_v13  ;;  %v6029_v13 = vld [vmem:[#allocation8 + $0x294] ss:$8 sps:$4 sm:$0xff]   ;;  %v2145_v28 = vmul.f32 0.5, %v7887_v8  ;;  %v2152_v11 = vmul.f32 0.5, %v7895_v12 }
 0x24d   : > { %v6259_v30 = vpop.eup %6258  ;;  %v1577_v35 = vpop.f32.mrb[88].mxu1  ;;  %v2896_v39 = vadd.f32 1.0, %v6257_v33  ;;  %6270 = verf.f32 %v2409_v34  ;;  %4648 = vmatprep.subr.bf16.mxu0 %v6020_v20 }
 0x24e   : > { %v7905_v10 = vadd.f32 %v1577_v35, %v7749_v53  ;;  %v1579_v5 = vpop.f32.mrb[89].mxu1  ;;  %v6261_v15 = vpop.eup %6260  ;;  %v2897_v16 = vadd.f32 1.0, %v6259_v30  ;;  %4505 = vmatprep.mubr.bf16.mxu0 %v3369_v22  ;;  %v2153_v30 = vmul.f32 0.5, %v7898_v60 }
 0x24f   : > { %v7909_v50 = vadd.f32 %v1579_v5, %v7755_v51  ;;  %v1581_v47 = vpop.f32.mrb[90].mxu1  ;;  %v6263_v4 = vpop.eup %6262  ;;  %v2904_v25 = vadd.f32 1.0, %v6261_v15  ;;  %4506 = vmatmul.mubr.bf16.gmra.mrb[12].mxu0 %v3368_v6  ;;  %v3152_v45 = vmul.f32 %v2896_v39, %v2128_v1  ;;  %v6646_v5 = vld [vmem:[%s7109_s10 + $0x20] ss:$8 sps:$4 sm:$0xff]  }
 0x250   : > { %v2416_v36 = vmul.f32 0.70710677, %v7905_v10  ;;  %v1583_v3 = vpop.f32.mrb[91].mxu1  ;;  %v2905_v55 = vadd.f32 1.0, %v6263_v4  ;;  %v7917_v41 = vadd.f32 %v1581_v47, %v7749_v53  ;;  %4649 = vmatpush1.bf16.msra.mxu0 %v6018_v0  ;;  %v3153_v21 = vmul.f32 %v2897_v16, %v2129_v2  ;;  %v6027_v0 = vld [vmem:[#allocation8 + $0x290] ss:$8 sps:$4 sm:$0xff]  }
 0x251   : > { %v2417_v62 = vmul.f32 0.70710677, %v7909_v50  ;;  %v3160_v9 = vmul.f32 %v2904_v25, %v2136_v26  ;;  %v7920_v14 = vadd.f32 %v1583_v3, %v7755_v51  ;;  %4650 = vmatprep.subr.bf16.mxu0 %v6023_v59  ;;  %v6032_v59 = vld [vmem:[#allocation8 + $0x2a4] ss:$8 sps:$4 sm:$0xff]   ;;  %v6030_v3 = vld [vmem:[#allocation8 + $0x2a0] ss:$8 sps:$4 sm:$0xff]  }
 0x252   : > { %6272 = verf.f32 %v2416_v36  ;;  %1912 = vmatmul.mubr.bf16.gmra.mrb[196].mxu1 %v6644_v38  ;;  %v3161_v29 = vmul.f32 %v2905_v55, %v2137_v52  ;;  %v2424_v43 = vmul.f32 0.70710677, %v7917_v41  ;;  %v6647_v16 = vld [vmem:[%s7109_s10 + $0x34] ss:$8 sps:$4 sm:$0xff]  }
 0x253   : > { %6274 = verf.f32 %v2417_v62  ;;  %1921 = vmatprep.mubr.bf16.mxu1 %v6645_v58  ;;  %v2425_v46 = vmul.f32 0.70710677, %v7920_v14  ;;  %v3376_v54 = vpack.c.bf16 %v3160_v9, %v3152_v45  ;;  %v2160_v9 = vmul.f32 0.5, %v7905_v10 }
 0x254   : > { %v6265_v40 = vpop.eup %6264  ;;  %6276 = verf.f32 %v2424_v43  ;;  %v3377_v48 = vpack.c.bf16 %v3161_v29, %v3153_v21  ;;  %4651 = vmatpush1.bf16.msra.mxu0 %v6021_v49  ;;  %v6035_v49 = vld [vmem:[#allocation8 + $0x2b4] ss:$8 sps:$4 sm:$0xff]   ;;  %v2161_v43 = vmul.f32 0.5, %v7909_v50  ;;  %v2168_v58 = vmul.f32 0.5, %v7917_v41 }
 0x255   : > { %v6267_v31 = vpop.eup %6266  ;;  %v1587_v37 = vpop.f32.mrb[92].mxu1  ;;  %v2912_v18 = vadd.f32 1.0, %v6265_v40  ;;  %6278 = verf.f32 %v2425_v46  ;;  %4652 = vmatprep.subr.bf16.mxu0 %v6026_v61 }
 0x256   : > { %v7927_v27 = vadd.f32 %v1587_v37, %v7749_v53  ;;  %v1589_v24 = vpop.f32.mrb[93].mxu1  ;;  %v6269_v7 = vpop.eup %6268  ;;  %v2913_v44 = vadd.f32 1.0, %v6267_v31  ;;  %4515 = vmatprep.mubr.bf16.mxu0 %v3377_v48  ;;  %v2169_v31 = vmul.f32 0.5, %v7920_v14 }
 0x257   : > { %v7931_v20 = vadd.f32 %v1589_v24, %v7755_v51  ;;  %v1591_v42 = vpop.f32.mrb[94].mxu1  ;;  %v6271_v23 = vpop.eup %6270  ;;  %v2920_v33 = vadd.f32 1.0, %v6269_v7  ;;  %4516 = vmatmul.mubr.bf16.gmra.mrb[16].mxu0 %v3376_v54  ;;  %v3168_v8 = vmul.f32 %v2912_v18, %v2144_v17  ;;  %v6648_v24 = vld [vmem:[%s7109_s10 + $0x30] ss:$8 sps:$4 sm:$0xff]  }
 0x258   : > { %v2432_v34 = vmul.f32 0.70710677, %v7927_v27  ;;  %v1593_v6 = vpop.f32.mrb[95].mxu1  ;;  %v2921_v19 = vadd.f32 1.0, %v6271_v23  ;;  %v7939_v22 = vadd.f32 %v1591_v42, %v7749_v53  ;;  %4653 = vmatpush1.bf16.msra.mxu0 %v6024_v63  ;;  %v3169_v60 = vmul.f32 %v2913_v44, %v2145_v28  ;;  %v6033_v63 = vld [vmem:[#allocation8 + $0x2b0] ss:$8 sps:$4 sm:$0xff]  }
 0x259   : > { %v2433_v35 = vmul.f32 0.70710677, %v7931_v20  ;;  %v3176_v39 = vmul.f32 %v2920_v33, %v2152_v11  ;;  %v7942_v12 = vadd.f32 %v1593_v6, %v7755_v51  ;;  %4654 = vmatprep.subr.bf16.mxu0 %v6029_v13  ;;  %v6038_v13 = vld [vmem:[#allocation8 + $0x2c4] ss:$8 sps:$4 sm:$0xff]   ;;  %v6036_v6 = vld [vmem:[#allocation8 + $0x2c0] ss:$8 sps:$4 sm:$0xff]  }
 0x25a   : > { %6280 = verf.f32 %v2432_v34  ;;  %1922 = vmatmul.mubr.bf16.gmra.mrb[200].mxu1 %v6646_v5  ;;  %v3177_v15 = vmul.f32 %v2921_v19, %v2153_v30  ;;  %v2440_v1 = vmul.f32 0.70710677, %v7939_v22  ;;  %v6649_v44 = vld [vmem:[%s7109_s10 + $0x44] ss:$8 sps:$4 sm:$0xff]  }
 0x25b   : > { %6282 = verf.f32 %v2433_v35  ;;  %1931 = vmatprep.mubr.bf16.mxu1 %v6647_v16  ;;  %v2441_v4 = vmul.f32 0.70710677, %v7942_v12  ;;  %v3384_v2 = vpack.c.bf16 %v3176_v39, %v3168_v8  ;;  %v2176_v39 = vmul.f32 0.5, %v7927_v27 }
 0x25c   : > { %v6273_v47 = vpop.eup %6272  ;;  %6284 = verf.f32 %v2440_v1  ;;  %v3385_v36 = vpack.c.bf16 %v3177_v15, %v3169_v60  ;;  %4655 = vmatpush1.bf16.msra.mxu0 %v6027_v0  ;;  %v6041_v0 = vld [vmem:[#allocation8 + $0x2d4] ss:$8 sps:$4 sm:$0xff]   ;;  %v2177_v1 = vmul.f32 0.5, %v7931_v20  ;;  %v2184_v16 = vmul.f32 0.5, %v7939_v22 }
 0x25d   : > { %v6275_v26 = vpop.eup %6274  ;;  %v1597_v25 = vpop.f32.mrb[96].mxu1  ;;  %v2928_v52 = vadd.f32 1.0, %v6273_v47  ;;  %6286 = verf.f32 %v2441_v4  ;;  %4656 = vmatprep.subr.bf16.mxu0 %v6032_v59 }
 0x25e   : > { %v7949_v55 = vadd.f32 %v1597_v25, %v7749_v53  ;;  %v1599_v62 = vpop.f32.mrb[97].mxu1  ;;  %v6277_v45 = vpop.eup %6276  ;;  %v2929_v38 = vadd.f32 1.0, %v6275_v26  ;;  %4525 = vmatprep.mubr.bf16.mxu0 %v3385_v36  ;;  %v2185_v26 = vmul.f32 0.5, %v7942_v12 }
 0x25f   : > { %v7953_v61 = vadd.f32 %v1599_v62, %v7755_v51  ;;  %v1601_v21 = vpop.f32.mrb[98].mxu1  ;;  %v6279_v29 = vpop.eup %6278  ;;  %v2936_v40 = vadd.f32 1.0, %v6277_v45  ;;  %4526 = vmatmul.mubr.bf16.gmra.mrb[20].mxu0 %v3384_v2  ;;  %v3184_v50 = vmul.f32 %v2928_v52, %v2160_v9  ;;  %v6650_v62 = vld [vmem:[%s7109_s10 + $0x40] ss:$8 sps:$4 sm:$0xff]  }
 0x260   : > { %v2448_v46 = vmul.f32 0.70710677, %v7949_v55  ;;  %v1603_v54 = vpop.f32.mrb[99].mxu1  ;;  %v2937_v10 = vadd.f32 1.0, %v6279_v29  ;;  %v7961_v48 = vadd.f32 %v1601_v21, %v7749_v53  ;;  %4657 = vmatpush1.bf16.msra.mxu0 %v6030_v3  ;;  %v3185_v14 = vmul.f32 %v2929_v38, %v2161_v43  ;;  %v6039_v3 = vld [vmem:[#allocation8 + $0x2d0] ss:$8 sps:$4 sm:$0xff]  }
 0x261   : > { %v2449_v37 = vmul.f32 0.70710677, %v7953_v61  ;;  %v3192_v18 = vmul.f32 %v2936_v40, %v2168_v58  ;;  %v7964_v41 = vadd.f32 %v1603_v54, %v7755_v51  ;;  %4658 = vmatprep.subr.bf16.mxu0 %v6035_v49  ;;  %v6044_v49 = vld [vmem:[#allocation8 + $0x2e4] ss:$8 sps:$4 sm:$0xff]   ;;  %v6042_v54 = vld [vmem:[#allocation8 + $0x2e0] ss:$8 sps:$4 sm:$0xff]  }
 0x262   : > { %6288 = verf.f32 %v2448_v46  ;;  %1932 = vmatmul.mubr.bf16.gmra.mrb[204].mxu1 %v6648_v24  ;;  %v3193_v7 = vmul.f32 %v2937_v10, %v2169_v31  ;;  %v2456_v17 = vmul.f32 0.70710677, %v7961_v48  ;;  %v6651_v38 = vld [vmem:[%s7109_s10 + $0x54] ss:$8 sps:$4 sm:$0xff]  }
 0x263   : > { %6290 = verf.f32 %v2449_v37  ;;  %1941 = vmatprep.mubr.bf16.mxu1 %v6649_v44  ;;  %v2457_v23 = vmul.f32 0.70710677, %v7964_v41  ;;  %v3392_v28 = vpack.c.bf16 %v3192_v18, %v3184_v50  ;;  %v2192_v18 = vmul.f32 0.5, %v7949_v55 }
 0x264   : > { %v6281_v42 = vpop.eup %6280  ;;  %6292 = verf.f32 %v2456_v17  ;;  %v3393_v34 = vpack.c.bf16 %v3193_v7, %v3185_v14  ;;  %4659 = vmatpush1.bf16.msra.mxu0 %v6033_v63  ;;  %v6047_v63 = vld [vmem:[#allocation8 + $0x2f4] ss:$8 sps:$4 sm:$0xff]   ;;  %v2193_v17 = vmul.f32 0.5, %v7953_v61  ;;  %v2200_v44 = vmul.f32 0.5, %v7961_v48 }
 0x265   : > { %v6283_v11 = vpop.eup %6282  ;;  %v1607_v33 = vpop.f32.mrb[100].mxu1  ;;  %v2944_v30 = vadd.f32 1.0, %v6281_v42  ;;  %6294 = verf.f32 %v2457_v23  ;;  %4660 = vmatprep.subr.bf16.mxu0 %v6038_v13 }
 0x266   : > { %v7971_v19 = vadd.f32 %v1607_v33, %v7749_v53  ;;  %v1609_v35 = vpop.f32.mrb[101].mxu1  ;;  %v6285_v8 = vpop.eup %6284  ;;  %v2945_v5 = vadd.f32 1.0, %v6283_v11  ;;  %4535 = vmatprep.mubr.bf16.mxu0 %v3393_v34  ;;  %v2201_v11 = vmul.f32 0.5, %v7964_v41 }
 0x267   : > { %v7975_v59 = vadd.f32 %v1609_v35, %v7755_v51  ;;  %v1611_v60 = vpop.f32.mrb[102].mxu1  ;;  %v6287_v15 = vpop.eup %6286  ;;  %v2952_v47 = vadd.f32 1.0, %v6285_v8  ;;  %4536 = vmatmul.mubr.bf16.gmra.mrb[24].mxu0 %v3392_v28  ;;  %v3200_v20 = vmul.f32 %v2944_v30, %v2176_v39  ;;  %v6652_v35 = vld [vmem:[%s7109_s10 + $0x50] ss:$8 sps:$4 sm:$0xff]  }
 0x268   : > { %v2464_v4 = vmul.f32 0.70710677, %v7971_v19  ;;  %v1613_v2 = vpop.f32.mrb[103].mxu1  ;;  %v2953_v27 = vadd.f32 1.0, %v6287_v15  ;;  %v7983_v36 = vadd.f32 %v1611_v60, %v7749_v53  ;;  %4661 = vmatpush1.bf16.msra.mxu0 %v6036_v6  ;;  %v3201_v12 = vmul.f32 %v2945_v5, %v2177_v1  ;;  %v6045_v6 = vld [vmem:[#allocation8 + $0x2f0] ss:$8 sps:$4 sm:$0xff]  }
 0x269   : > { %v2465_v25 = vmul.f32 0.70710677, %v7975_v59  ;;  %v3208_v52 = vmul.f32 %v2952_v47, %v2184_v16  ;;  %v7986_v22 = vadd.f32 %v1613_v2, %v7755_v51  ;;  %4662 = vmatprep.subr.bf16.mxu0 %v6041_v0  ;;  %v6050_v0 = vld [vmem:[#allocation8 + $0x304] ss:$8 sps:$4 sm:$0xff]  }
 0x26a   : > { %6296 = verf.f32 %v2464_v4  ;;  %1942 = vmatmul.mubr.bf16.gmra.mrb[208].mxu1 %v6650_v62  ;;  %v3209_v45 = vmul.f32 %v2953_v27, %v2185_v26  ;;  %v2472_v9 = vmul.f32 0.70710677, %v7983_v36  ;;  %v6653_v5 = vld [vmem:[%s7109_s10 + $0x64] ss:$8 sps:$4 sm:$0xff]  }
 0x26b   : > { %6298 = verf.f32 %v2465_v25  ;;  %1951 = vmatprep.mubr.bf16.mxu1 %v6651_v38  ;;  %v2473_v29 = vmul.f32 0.70710677, %v7986_v22  ;;  %v3400_v43 = vpack.c.bf16 %v3208_v52, %v3200_v20 }
 0x26c   : > { %v6289_v21 = vpop.eup %6288  ;;  %6300 = verf.f32 %v2472_v9  ;;  %v3401_v46 = vpack.c.bf16 %v3209_v45, %v3201_v12  ;;  %4663 = vmatpush1.bf16.msra.mxu0 %v6039_v3  ;;  %v2208_v3 = vmul.f32 0.5, %v7971_v19  ;;  %v2209_v12 = vmul.f32 0.5, %v7975_v59 }
 0x26d   : > { %v6291_v58 = vpop.eup %6290  ;;  %v1617_v40 = vpop.f32.mrb[104].mxu1  ;;  %v2960_v31 = vadd.f32 1.0, %v6289_v21  ;;  %6302 = verf.f32 %v2473_v29  ;;  %4664 = vmatprep.subr.bf16.mxu0 %v6044_v49  ;;  %v2216_v45 = vmul.f32 0.5, %v7983_v36  ;;  %v2217_v19 = vmul.f32 0.5, %v7986_v22  ;;  %v6654_v36 = vld [vmem:[%s7109_s10 + $0x60] ss:$8 sps:$4 sm:$0xff]  }
 0x26e   : > { %v7993_v10 = vadd.f32 %v1617_v40, %v7749_v53  ;;  %v1619_v37 = vpop.f32.mrb[105].mxu1  ;;  %v6293_v50 = vpop.eup %6292  ;;  %v2961_v24 = vadd.f32 1.0, %v6291_v58  ;;  %4545 = vmatprep.mubr.bf16.mxu0 %v3401_v46  ;;  %v6655_v22 = vld [vmem:[%s7109_s10 + $0x74] ss:$8 sps:$4 sm:$0xff]  }
 0x26f   : > { %v7997_v13 = vadd.f32 %v1619_v37, %v7755_v51  ;;  %v1621_v14 = vpop.f32.mrb[106].mxu1  ;;  %v6295_v7 = vpop.eup %6294  ;;  %v2968_v42 = vadd.f32 1.0, %v6293_v50  ;;  %4546 = vmatmul.mubr.bf16.gmra.mrb[28].mxu0 %v3400_v43  ;;  %v3216_v61 = vmul.f32 %v2960_v31, %v2192_v18 }
 0x270   : > { %v2480_v23 = vmul.f32 0.70710677, %v7993_v10  ;;  %v1623_v28 = vpop.f32.mrb[107].mxu1  ;;  %v2969_v55 = vadd.f32 1.0, %v6295_v7  ;;  %v8005_v34 = vadd.f32 %v1621_v14, %v7749_v53  ;;  %4665 = vmatpush1.bf16.msra.mxu0 %v6042_v54  ;;  %v3217_v41 = vmul.f32 %v2961_v24, %v2193_v17 }
 0x271   : > { %v2481_v33 = vmul.f32 0.70710677, %v7997_v13  ;;  %v3224_v30 = vmul.f32 %v2968_v42, %v2200_v44  ;;  %v8008_v48 = vadd.f32 %v1623_v28, %v7755_v51  ;;  %4666 = vmatprep.subr.bf16.mxu0 %v6047_v63  ;;  %v2224_v28 = vmul.f32 0.5, %v7993_v10 }
 0x272   : > { %6304 = verf.f32 %v2480_v23  ;;  %1952 = vmatmul.mubr.bf16.gmra.mrb[212].mxu1 %v6652_v35  ;;  %v3225_v8 = vmul.f32 %v2969_v55, %v2201_v11  ;;  %v2488_v39 = vmul.f32 0.70710677, %v8005_v34 }
 0x273   : > { %6306 = verf.f32 %v2481_v33  ;;  %1961 = vmatprep.mubr.bf16.mxu1 %v6653_v5  ;;  %v2489_v15 = vmul.f32 0.70710677, %v8008_v48  ;;  %v3408_v1 = vpack.c.bf16 %v3224_v30, %v3216_v61  ;;  %v2225_v61 = vmul.f32 0.5, %v7997_v13 }
 0x274   : > { %v6297_v60 = vpop.eup %6296  ;;  %6308 = verf.f32 %v2488_v39  ;;  %v3409_v4 = vpack.c.bf16 %v3225_v8, %v3217_v41  ;;  %4667 = vmatpush1.bf16.msra.mxu0 %v6045_v6  ;;  %v2232_v30 = vmul.f32 0.5, %v8005_v34  ;;  %v2233_v10 = vmul.f32 0.5, %v8008_v48  ;;  %v6656_v34 = vld [vmem:[%s7109_s10 + $0x70] ss:$8 sps:$4 sm:$0xff]   ;;  %v6657_v48 = vld [vmem:[%s7109_s10 + $0x84] ss:$8 sps:$4 sm:$0xff]  }
 0x275   : > { %v6299_v16 = vpop.eup %6298  ;;  %v1627_v47 = vpop.f32.mrb[108].mxu1  ;;  %v2976_v2 = vadd.f32 1.0, %v6297_v60  ;;  %6310 = verf.f32 %v2489_v15  ;;  %4829 = vmatprep.subr.bf16.mxu0 %v6050_v0 }
 0x276   : > { %v8015_v26 = vadd.f32 %v1627_v47, %v7749_v53  ;;  %v1629_v27 = vpop.f32.mrb[109].mxu1  ;;  %v6301_v25 = vpop.eup %6300  ;;  %v2977_v20 = vadd.f32 1.0, %v6299_v16  ;;  %4555 = vmatprep.mubr.bf16.mxu0 %v3409_v4 }
 0x277   : > { %v8019_v52 = vadd.f32 %v1629_v27, %v7755_v51  ;;  %v1631_v62 = vpop.f32.mrb[110].mxu1  ;;  %v6303_v49 = vpop.eup %6302  ;;  %v2984_v9 = vadd.f32 1.0, %v6301_v25  ;;  %4556 = vmatmul.mubr.bf16.gmra.mrb[32].mxu0 %v3408_v1  ;;  %v3232_v40 = vmul.f32 %v2976_v2, %v2208_v3 }
 0x278   : > { %v2496_v38 = vmul.f32 0.70710677, %v8015_v26  ;;  %v1633_v21 = vpop.f32.mrb[111].mxu1  ;;  %v2985_v29 = vadd.f32 1.0, %v6303_v49  ;;  %v8027_v58 = vadd.f32 %v1631_v62, %v7749_v53  ;;  %v3233_v54 = vmul.f32 %v2977_v20, %v2209_v12 }
 0x279   : > { %v2497_v43 = vmul.f32 0.70710677, %v8019_v52  ;;  %v3240_v46 = vmul.f32 %v2984_v9, %v2216_v45  ;;  %v8030_v59 = vadd.f32 %v1633_v21, %v7755_v51  ;;  %v2240_v9 = vmul.f32 0.5, %v8015_v26 }
 0x27a   : > { %6312 = verf.f32 %v2496_v38  ;;  %1962 = vmatmul.mubr.bf16.gmra.mrb[216].mxu1 %v6654_v36  ;;  %v3241_v31 = vmul.f32 %v2985_v29, %v2217_v19  ;;  %v2504_v37 = vmul.f32 0.70710677, %v8027_v58 }
 0x27b   : > { %6314 = verf.f32 %v2497_v43  ;;  %1971 = vmatprep.mubr.bf16.mxu1 %v6655_v22  ;;  %v2505_v50 = vmul.f32 0.70710677, %v8030_v59  ;;  %v3416_v18 = vpack.c.bf16 %v3240_v46, %v3232_v40  ;;  %v2241_v43 = vmul.f32 0.5, %v8019_v52 }
 0x27c   : > { %v6305_v63 = vpop.eup %6304  ;;  %6316 = verf.f32 %v2504_v37  ;;  %v3417_v7 = vpack.c.bf16 %v3241_v31, %v3233_v54  ;;  %v2248_v40 = vmul.f32 0.5, %v8027_v58  ;;  %v2249_v26 = vmul.f32 0.5, %v8030_v59  ;;  %v6658_v58 = vld [vmem:[%s7109_s10 + $0x80] ss:$8 sps:$4 sm:$0xff]   ;;  %v6659_v59 = vld [vmem:[%s7109_s10 + $0x94] ss:$8 sps:$4 sm:$0xff]  }
 0x27d   : > { %v6307_v24 = vpop.eup %6306  ;;  %v1637_v14 = vpop.f32.mrb[112].mxu1  ;;  %v2992_v17 = vadd.f32 1.0, %v6305_v63  ;;  %6318 = verf.f32 %v2505_v50 }
 0x27e   : > { %v8037_v44 = vadd.f32 %v1637_v14, %v7749_v53  ;;  %v1639_v42 = vpop.f32.mrb[113].mxu1  ;;  %v6309_v23 = vpop.eup %6308  ;;  %v2993_v11 = vadd.f32 1.0, %v6307_v24  ;;  %4565 = vmatprep.mubr.bf16.mxu0 %v3417_v7 }
 0x27f   : > { %v8041_v55 = vadd.f32 %v1639_v42, %v7755_v51  ;;  %v1641_v33 = vpop.f32.mrb[114].mxu1  ;;  %v6311_v6 = vpop.eup %6310  ;;  %v3000_v35 = vadd.f32 1.0, %v6309_v23  ;;  %4566 = vmatmul.mubr.bf16.gmra.mrb[36].mxu0 %v3416_v18  ;;  %v3248_v60 = vmul.f32 %v2992_v17, %v2224_v28 }
 0x280   : > { %v2512_v0 = vmul.f32 0.70710677, %v8037_v44  ;;  %v1643_v41 = vpop.f32.mrb[115].mxu1  ;;  %v3001_v8 = vadd.f32 1.0, %v6311_v6  ;;  %v8049_v5 = vadd.f32 %v1641_v33, %v7749_v53  ;;  %v3249_v1 = vmul.f32 %v2993_v11, %v2225_v61 }
 0x281   : > { %v2513_v39 = vmul.f32 0.70710677, %v8041_v55  ;;  %v3256_v15 = vmul.f32 %v3000_v35, %v2232_v30  ;;  %v8052_v13 = vadd.f32 %v1643_v41, %v7755_v51  ;;  %v468_v30 = vsub.s32 4, %v7290_v56 }
 0x282   : > { %6320 = verf.f32 %v2512_v0  ;;  %1972 = vmatmul.mubr.bf16.gmra.mrb[220].mxu1 %v6656_v34  ;;  %v3257_v16 = vmul.f32 %v3001_v8, %v2233_v10  ;;  %v2520_v47 = vmul.f32 0.70710677, %v8049_v5  ;;  %v2256_v0 = vmul.f32 0.5, %v8037_v44 }
 0x283   : > { %6322 = verf.f32 %v2513_v39  ;;  %1981 = vmatprep.mubr.bf16.mxu1 %v6657_v48  ;;  %v2521_v2 = vmul.f32 0.70710677, %v8052_v13  ;;  %v3424_v27 = vpack.c.bf16 %v3256_v15, %v3248_v60  ;;  %v472_v39 = vsub.s32 5, %v7290_v56 }
 0x284   : > { %v6313_v4 = vpop.eup %6312  ;;  %6324 = verf.f32 %v2520_v47  ;;  %v3425_v20 = vpack.c.bf16 %v3257_v16, %v3249_v1  ;;  %v2257_v15 = vmul.f32 0.5, %v8041_v55  ;;  %v2264_v34 = vmul.f32 0.5, %v8049_v5  ;;  %v6660_v5 = vld [vmem:[%s7109_s10 + $0x90] ss:$8 sps:$4 sm:$0xff]  }
 0x285   : > { %v6315_v25 = vpop.eup %6314  ;;  %v1647_v3 = vpop.f32.mrb[116].mxu1  ;;  %v3008_v62 = vadd.f32 1.0, %v6313_v4  ;;  %6326 = verf.f32 %v2521_v2  ;;  %v2265_v47 = vmul.f32 0.5, %v8052_v13  ;;  %v6661_v13 = vld [vmem:[%s7109_s10 + $0xa4] ss:$8 sps:$4 sm:$0xff]  }
 0x286   : > { %v8059_v49 = vadd.f32 %v1647_v3, %v7749_v53  ;;  %v1649_v12 = vpop.f32.mrb[117].mxu1  ;;  %v6317_v45 = vpop.eup %6316  ;;  %v3009_v38 = vadd.f32 1.0, %v6315_v25  ;;  %4575 = vmatprep.mubr.bf16.mxu0 %v3425_v20 }
 0x287   : > { %v8063_v21 = vadd.f32 %v1649_v12, %v7755_v51  ;;  %v1651_v19 = vpop.f32.mrb[118].mxu1  ;;  %v6319_v29 = vpop.eup %6318  ;;  %v3016_v46 = vadd.f32 1.0, %v6317_v45  ;;  %4576 = vmatmul.mubr.bf16.gmra.mrb[40].mxu0 %v3424_v27  ;;  %v3264_v63 = vmul.f32 %v3008_v62, %v2240_v9 }
 0x288   : > { %v2528_v36 = vmul.f32 0.70710677, %v8059_v49  ;;  %v1653_v54 = vpop.f32.mrb[119].mxu1  ;;  %v3017_v31 = vadd.f32 1.0, %v6319_v29  ;;  %v8071_v22 = vadd.f32 %v1651_v19, %v7749_v53  ;;  %v3265_v18 = vmul.f32 %v3009_v38, %v2241_v43 }
 0x289   : > { %v2529_v37 = vmul.f32 0.70710677, %v8063_v21  ;;  %v3272_v50 = vmul.f32 %v3016_v46, %v2248_v40  ;;  %v8074_v52 = vadd.f32 %v1653_v54, %v7755_v51 }
 0x28a   : > { %6328 = verf.f32 %v2528_v36  ;;  %1982 = vmatmul.mubr.bf16.gmra.mrb[224].mxu1 %v6658_v58  ;;  %v3273_v24 = vmul.f32 %v3017_v31, %v2249_v26  ;;  %v2536_v14 = vmul.f32 0.70710677, %v8071_v22  ;;  %v6662_v36 = vld [vmem:[#allocation7] sm:$0xff]  ;;  %v2272_v31 = vmul.f32 0.5, %v8059_v49 }
 0x28b   : > { %6330 = verf.f32 %v2529_v37  ;;  %1991 = vmatprep.mubr.bf16.mxu1 %v6659_v59  ;;  %v2537_v17 = vmul.f32 0.70710677, %v8074_v52  ;;  %v3432_v42 = vpack.c.bf16 %v3272_v50, %v3264_v63  ;;  %v8107_v54 = vrot.slane %v6662_v36, %v468_v30 }
 0x28c   : > { %v6321_v7 = vpop.eup %6320  ;;  %6332 = verf.f32 %v2536_v14  ;;  %v3433_v11 = vpack.c.bf16 %v3273_v24, %v3265_v18  ;;  %v8113_v58 = vrot.slane %v6662_v36, %v472_v39  ;;  %v2273_v24 = vmul.f32 0.5, %v8063_v21 }
 0x28d   : > { %v6323_v23 = vpop.eup %6322  ;;  %v1657_v28 = vpop.f32.mrb[120].mxu1  ;;  %v3024_v33 = vadd.f32 1.0, %v6321_v7  ;;  %6334 = verf.f32 %v2537_v17  ;;  %v2280_v14 = vmul.f32 0.5, %v8071_v22  ;;  %v2281_v17 = vmul.f32 0.5, %v8074_v52  ;;  %v6663_v22 = vld [vmem:[%s7109_s10 + $0xa0] ss:$8 sps:$4 sm:$0xff]  }
 0x28e   : > { %v8081_v6 = vadd.f32 %v1657_v28, %v7749_v53  ;;  %v1659_v61 = vpop.f32.mrb[121].mxu1  ;;  %v6325_v35 = vpop.eup %6324  ;;  %v3025_v41 = vadd.f32 1.0, %v6323_v23  ;;  %4585 = vmatprep.mubr.bf16.mxu0 %v3433_v11  ;;  %v6664_v52 = vld [vmem:[%s7109_s10 + $0xb4] ss:$8 sps:$4 sm:$0xff]  }
 0x28f   : > { %v8086_v10 = vadd.f32 %v1659_v61, %v7755_v51  ;;  %v1661_v8 = vpop.f32.mrb[122].mxu1  ;;  %v6327_v60 = vpop.eup %6326  ;;  %v3032_v1 = vadd.f32 1.0, %v6325_v35  ;;  %4586 = vmatmul.mubr.bf16.gmra.mrb[44].mxu0 %v3432_v42  ;;  %v3280_v27 = vmul.f32 %v3024_v33, %v2256_v0 }
 0x290   : > { %v2544_v16 = vmul.f32 0.70710677, %v8081_v6  ;;  %v1663_v44 = vpop.f32.mrb[123].mxu1  ;;  %v3033_v48 = vadd.f32 1.0, %v6327_v60  ;;  %v8095_v2 = vadd.f32 %v1661_v8, %v7749_v53  ;;  %v3281_v3 = vmul.f32 %v3025_v41, %v2257_v15 }
 0x291   : > { %v2545_v4 = vmul.f32 0.70710677, %v8086_v10  ;;  %v3288_v25 = vmul.f32 %v3032_v1, %v2264_v34  ;;  %v8098_v55 = vadd.f32 %v1663_v44, %v7755_v51 }
 0x292   : > { %6336 = verf.f32 %v2544_v16  ;;  %1992 = vmatmul.mubr.bf16.gmra.mrb[228].mxu1 %v6660_v5  ;;  %v3289_v20 = vmul.f32 %v3033_v48, %v2265_v47  ;;  %v2552_v62 = vmul.f32 0.70710677, %v8095_v2  ;;  %v2288_v16 = vmul.f32 0.5, %v8081_v6 }
 0x293   : > { %6338 = verf.f32 %v2545_v4  ;;  %2001 = vmatprep.mubr.bf16.mxu1 %v6661_v13  ;;  %v2553_v45 = vmul.f32 0.70710677, %v8098_v55  ;;  %v3440_v9 = vpack.c.bf16 %v3288_v25, %v3280_v27  ;;  %v2289_v27 = vmul.f32 0.5, %v8086_v10 }
 0x294   : > { %v6329_v12 = vpop.eup %6328  ;;  %6340 = verf.f32 %v2552_v62  ;;  %v3441_v29 = vpack.c.bf16 %v3289_v20, %v3281_v3  ;;  %v2296_v25 = vmul.f32 0.5, %v8095_v2  ;;  %v2297_v6 = vmul.f32 0.5, %v8098_v55  ;;  %v6665_v2 = vld [vmem:[%s7109_s10 + $0xb0] ss:$8 sps:$4 sm:$0xff]   ;;  %v6666_v55 = vld [vmem:[%s7109_s10 + $0xc4] ss:$8 sps:$4 sm:$0xff]  }
 0x295   : > { %v6331_v38 = vpop.eup %6330  ;;  %v1667_v19 = vpop.f32.mrb[124].mxu1  ;;  %v3040_v43 = vadd.f32 1.0, %v6329_v12  ;;  %6342 = verf.f32 %v2553_v45 }
 0x296   : > { %v8105_v40 = vadd.f32 %v1667_v19, %v7749_v53  ;;  %v1669_v46 = vpop.f32.mrb[125].mxu1  ;;  %v6333_v26 = vpop.eup %6332  ;;  %v3041_v37 = vadd.f32 1.0, %v6331_v38  ;;  %4595 = vmatprep.mubr.bf16.mxu0 %v3441_v29 }
 0x297   : > { %v8111_v63 = vadd.f32 %v1669_v46, %v7755_v51  ;;  %v1671_v50 = vpop.f32.mrb[126].mxu1  ;;  %v6335_v18 = vpop.eup %6334  ;;  %v3048_v59 = vadd.f32 1.0, %v6333_v26  ;;  %4596 = vmatmul.mubr.bf16.gmra.mrb[48].mxu0 %v3440_v9  ;;  %v3296_v11 = vmul.f32 %v3040_v43, %v2272_v31 }
 0x298   : > { %v2560_v7 = vmul.f32 0.70710677, %v8105_v40  ;;  %v1673_v49 = vpop.f32.mrb[127].mxu1  ;;  %v3049_v42 = vadd.f32 1.0, %v6335_v18  ;;  %v8121_v28 = vadd.f32 %v1671_v50, %v7749_v53  ;;  %v3297_v61 = vmul.f32 %v3041_v37, %v2273_v24 }
 0x299   : > { %v2561_v23 = vmul.f32 0.70710677, %v8111_v63  ;;  %v3304_v33 = vmul.f32 %v3048_v59, %v2280_v14  ;;  %v8124_v21 = vadd.f32 %v1673_v49, %v7755_v51  ;;  %v2304_v59 = vmul.f32 0.5, %v8105_v40 }
 0x29a   : > { %6344 = verf.f32 %v2560_v7  ;;  %2002 = vmatmul.mubr.bf16.gmra.mrb[232].mxu1 %v6663_v22  ;;  %v3305_v30 = vmul.f32 %v3049_v42, %v2281_v17  ;;  %v2568_v35 = vmul.f32 0.70710677, %v8121_v28 }
 0x29b   : > { %6346 = verf.f32 %v2561_v23  ;;  %2011 = vmatprep.mubr.bf16.mxu1 %v6664_v52  ;;  %v2569_v41 = vmul.f32 0.70710677, %v8124_v21  ;;  %v3448_v53 = vpack.c.bf16 %v3304_v33, %v3296_v11  ;;  %v2305_v23 = vmul.f32 0.5, %v8111_v63 }
 0x29c   : > { %v6337_v0 = vpop.eup %6336  ;;  %6348 = verf.f32 %v2568_v35  ;;  %v3449_v60 = vpack.c.bf16 %v3305_v30, %v3297_v61  ;;  %v2312_v11 = vmul.f32 0.5, %v8121_v28  ;;  %v2313_v40 = vmul.f32 0.5, %v8124_v21  ;;  %v6667_v28 = vld [vmem:[%s7109_s10 + $0xc0] ss:$8 sps:$4 sm:$0xff]   ;;  %v6668_v21 = vld [vmem:[%s7109_s10 + $0xd4] ss:$8 sps:$4 sm:$0xff]  }
 0x29d   : > { %v6339_v8 = vpop.eup %6338  ;;  %v1710_v39 = vpop.f32.mrb[128].mxu1  ;;  %v3056_v15 = vadd.f32 1.0, %v6337_v0  ;;  %6350 = verf.f32 %v2569_v41 }
 0x29e   : > { %v8131_v51 = vadd.f32 %v1710_v39, %v8107_v54  ;;  %v1712_v34 = vpop.f32.mrb[129].mxu1  ;;  %v6341_v1 = vpop.eup %6340  ;;  %v3057_v44 = vadd.f32 1.0, %v6339_v8  ;;  %4605 = vmatprep.mubr.bf16.mxu0 %v3449_v60 }
 0x29f   : > { %v8135_v47 = vadd.f32 %v1712_v34, %v8113_v58  ;;  %v1714_v48 = vpop.f32.mrb[130].mxu1  ;;  %v6343_v4 = vpop.eup %6342  ;;  %v3064_v5 = vadd.f32 1.0, %v6341_v1  ;;  %4606 = vmatmul.mubr.bf16.gmra.mrb[52].mxu0 %v3448_v53  ;;  %v3312_v45 = vmul.f32 %v3056_v15, %v2288_v16 }
 0x2a0   : > { %v2322_v3 = vmul.f32 0.70710677, %v8131_v51  ;;  %v1716_v20 = vpop.f32.mrb[131].mxu1  ;;  %v3065_v62 = vadd.f32 1.0, %v6343_v4  ;;  %v8143_v12 = vadd.f32 %v1714_v48, %v8107_v54  ;;  %v3313_v38 = vmul.f32 %v3057_v44, %v2289_v27 }
 0x2a1   : > { %v2323_v13 = vmul.f32 0.70710677, %v8135_v47  ;;  %v3320_v9 = vmul.f32 %v3064_v5, %v2296_v25  ;;  %v8146_v10 = vadd.f32 %v1716_v20, %v8113_v58  ;;  %v2066_v5 = vmul.f32 0.5, %v8131_v51 }
 0x2a2   : > { %6352 = verf.f32 %v2322_v3  ;;  %2012 = vmatmul.mubr.bf16.gmra.mrb[236].mxu1 %v6665_v2  ;;  %v3321_v19 = vmul.f32 %v3065_v62, %v2297_v6  ;;  %v2330_v29 = vmul.f32 0.70710677, %v8143_v12 }
 0x2a3   : > { %6354 = verf.f32 %v2323_v13  ;;  %2021 = vmatprep.mubr.bf16.mxu1 %v6666_v55  ;;  %v2331_v46 = vmul.f32 0.70710677, %v8146_v10  ;;  %v3456_v36 = vpack.c.bf16 %v3320_v9, %v3312_v45  ;;  %v2067_v13 = vmul.f32 0.5, %v8135_v47 }
 0x2a4   : > { %v6345_v43 = vpop.eup %6344  ;;  %6356 = verf.f32 %v2330_v29  ;;  %v3457_v37 = vpack.c.bf16 %v3321_v19, %v3313_v38  ;;  %v2074_v45 = vmul.f32 0.5, %v8143_v12  ;;  %v2075_v51 = vmul.f32 0.5, %v8146_v10  ;;  %v6669_v12 = vld [vmem:[%s7109_s10 + $0xd0] ss:$8 sps:$4 sm:$0xff]   ;;  %v6670_v10 = vld [vmem:[%s7109_s10 + $0xe4] ss:$8 sps:$4 sm:$0xff]  }
 0x2a5   : > { %v6347_v26 = vpop.eup %6346  ;;  %v1720_v31 = vpop.f32.mrb[132].mxu1  ;;  %v3072_v50 = vadd.f32 1.0, %v6345_v43  ;;  %6358 = verf.f32 %v2331_v46 }
 0x2a6   : > { %v8153_v18 = vadd.f32 %v1720_v31, %v8107_v54  ;;  %v1722_v24 = vpop.f32.mrb[133].mxu1  ;;  %v6349_v14 = vpop.eup %6348  ;;  %v3073_v7 = vadd.f32 1.0, %v6347_v26  ;;  %4615 = vmatprep.mubr.bf16.mxu0 %v3457_v37 }
 0x2a7   : > { %v8157_v49 = vadd.f32 %v1722_v24, %v8113_v58  ;;  %v1724_v17 = vpop.f32.mrb[134].mxu1  ;;  %v6351_v42 = vpop.eup %6350  ;;  %v3080_v33 = vadd.f32 1.0, %v6349_v14  ;;  %4616 = vmatmul.mubr.bf16.gmra.mrb[56].mxu0 %v3456_v36  ;;  %v3328_v0 = vmul.f32 %v3072_v50, %v2304_v59 }
 0x2a8   : > { %v2338_v22 = vmul.f32 0.70710677, %v8153_v18  ;;  %v1726_v61 = vpop.f32.mrb[135].mxu1  ;;  %v3081_v30 = vadd.f32 1.0, %v6351_v42  ;;  %v8165_v52 = vadd.f32 %v1724_v17, %v8107_v54  ;;  %v3329_v53 = vmul.f32 %v3073_v7, %v2305_v23  ;;  %v6048_v17 = vld [vmem:[#allocation8 + $0x300] ss:$8 sps:$4 sm:$0xff]  }
 0x2a9   : > { %v2339_v35 = vmul.f32 0.70710677, %v8157_v49  ;;  %v3336_v41 = vmul.f32 %v3080_v33, %v2312_v11  ;;  %v8168_v63 = vadd.f32 %v1726_v61, %v8113_v58  ;;  %v6053_v33 = vld [vmem:[#allocation8 + $0x314] ss:$8 sps:$4 sm:$0xff]   ;;  %v2082_v61 = vmul.f32 0.5, %v8153_v18 }
 0x2aa   : > { %6360 = verf.f32 %v2338_v22  ;;  %2022 = vmatmul.mubr.bf16.gmra.mrb[240].mxu1 %v6667_v28  ;;  %v3337_v8 = vmul.f32 %v3081_v30, %v2313_v40  ;;  %v2346_v39 = vmul.f32 0.70710677, %v8165_v52  ;;  %v2090_v28 = vmul.f32 0.5, %v8165_v52 }
 0x2ab   : > { %6362 = verf.f32 %v2339_v35  ;;  %2031 = vmatprep.mubr.bf16.mxu1 %v6668_v21  ;;  %v2347_v15 = vmul.f32 0.70710677, %v8168_v63  ;;  %v3464_v34 = vpack.c.bf16 %v3336_v41, %v3328_v0  ;;  %v2083_v41 = vmul.f32 0.5, %v8157_v49 }
 0x2ac   : > { %v6353_v60 = vpop.eup %6352  ;;  %6364 = verf.f32 %v2346_v39  ;;  %v3465_v44 = vpack.c.bf16 %v3337_v8, %v3329_v53  ;;  %v2091_v21 = vmul.f32 0.5, %v8168_v63 }
 0x2ad   : > { %v6355_v1 = vpop.eup %6354  ;;  %v1730_v16 = vpop.f32.mrb[136].mxu1  ;;  %v2834_v48 = vadd.f32 1.0, %v6353_v60  ;;  %6366 = verf.f32 %v2347_v15 }
 0x2ae   : > { %v8175_v4 = vadd.f32 %v1730_v16, %v8107_v54  ;;  %v1732_v27 = vpop.f32.mrb[137].mxu1  ;;  %v6357_v25 = vpop.eup %6356  ;;  %v2835_v3 = vadd.f32 1.0, %v6355_v1  ;;  %4625 = vmatprep.mubr.bf16.mxu0 %v3465_v44  ;;  %v6671_v16 = vld [vmem:[%s7109_s10 + $0xe0] ss:$8 sps:$4 sm:$0xff]   ;;  %v6056_v44 = vld [vmem:[#allocation8 + $0x324] ss:$8 sps:$4 sm:$0xff]  }
 0x2af   : > { %v8179_v20 = vadd.f32 %v1732_v27, %v8113_v58  ;;  %v1734_v6 = vpop.f32.mrb[138].mxu1  ;;  %v6359_v62 = vpop.eup %6358  ;;  %v2842_v9 = vadd.f32 1.0, %v6357_v25  ;;  %4626 = vmatmul.mubr.bf16.gmra.mrb[60].mxu0 %v3464_v34  ;;  %v3090_v43 = vmul.f32 %v2834_v48, %v2066_v5  ;;  %v6051_v34 = vld [vmem:[#allocation8 + $0x310] ss:$8 sps:$4 sm:$0xff]   ;;  %v6672_v25 = vld [vmem:[%s7109_s10 + $0xf4] ss:$8 sps:$4 sm:$0xff]  }
 0x2b0   : > { %v2354_v2 = vmul.f32 0.70710677, %v8175_v4  ;;  %v1736_v38 = vpop.f32.mrb[139].mxu1  ;;  %v2843_v19 = vadd.f32 1.0, %v6359_v62  ;;  %v8187_v55 = vadd.f32 %v1734_v6, %v8107_v54  ;;  %v3091_v36 = vmul.f32 %v2835_v3, %v2067_v13 }
 0x2b1   : > { %v2355_v29 = vmul.f32 0.70710677, %v8179_v20  ;;  %v3098_v46 = vmul.f32 %v2842_v9, %v2074_v45  ;;  %v8190_v47 = vadd.f32 %v1736_v38, %v8113_v58  ;;  %v6054_v9 = vld [vmem:[#allocation8 + $0x320] ss:$8 sps:$4 sm:$0xff]  }
 0x2b2   : > { %6368 = verf.f32 %v2354_v2  ;;  %2032 = vmatmul.mubr.bf16.gmra.mrb[244].mxu1 %v6669_v12  ;;  %v3099_v26 = vmul.f32 %v2843_v19, %v2075_v51  ;;  %v2362_v31 = vmul.f32 0.70710677, %v8187_v55  ;;  %v6059_v19 = vld [vmem:[#allocation8 + $0x334] ss:$8 sps:$4 sm:$0xff]  }
 0x2b3   : > { %6370 = verf.f32 %v2355_v29  ;;  %2041 = vmatprep.mubr.bf16.mxu1 %v6670_v10  ;;  %v3346_v50 = vpack.c.bf16 %v3098_v46, %v3090_v43  ;;  %v2363_v24 = vmul.f32 0.70710677, %v8190_v47  ;;  %v2098_v43 = vmul.f32 0.5, %v8175_v4 }
 0x2b4   : > { %v6361_v37 = vpop.eup %6360  ;;  %6372 = verf.f32 %v2362_v31  ;;  %v3347_v7 = vpack.c.bf16 %v3099_v26, %v3091_v36  ;;  %v2099_v31 = vmul.f32 0.5, %v8179_v20  ;;  %v2106_v10 = vmul.f32 0.5, %v8187_v55 }
 0x2b5   : > { %v6363_v14 = vpop.eup %6362  ;;  %v1740_v59 = vpop.f32.mrb[140].mxu1  ;;  %v2850_v42 = vadd.f32 1.0, %v6361_v37  ;;  %6374 = verf.f32 %v2363_v24 }
 0x2b6   : > { %v8197_v23 = vadd.f32 %v1740_v59, %v8107_v54  ;;  %v1742_v11 = vpop.f32.mrb[141].mxu1  ;;  %v6365_v22 = vpop.eup %6364  ;;  %v2851_v40 = vadd.f32 1.0, %v6363_v14  ;;  %4668 = vmatprep.mubr.bf16.mxu0 %v3347_v7  ;;  %v2107_v14 = vmul.f32 0.5, %v8190_v47 }
 0x2b7   : > { %v8201_v30 = vadd.f32 %v1742_v11, %v8113_v58  ;;  %v1744_v35 = vpop.f32.mrb[142].mxu1  ;;  %v6367_v0 = vpop.eup %6366  ;;  %v2858_v53 = vadd.f32 1.0, %v6365_v22  ;;  %4669 = vmatmul.mubr.bf16.vlgmr.msra.gmra.mrb[0].mxu0 %v3346_v50  ;;  %v3106_v49 = vmul.f32 %v2850_v42, %v2082_v61  ;;  %v6673_v11 = vld [vmem:[%s7109_s10 + $0xf0] ss:$8 sps:$4 sm:$0xff]  }
 0x2b8   : > { %v2370_v8 = vmul.f32 0.70710677, %v8197_v23  ;;  %v1746_v39 = vpop.f32.mrb[143].mxu1  ;;  %v2859_v18 = vadd.f32 1.0, %v6367_v0  ;;  %v8209_v15 = vadd.f32 %v1744_v35, %v8107_v54  ;;  %4830 = vmatpush1.bf16.msra.mxu0 %v6048_v17  ;;  %v3107_v63 = vmul.f32 %v2851_v40, %v2083_v41  ;;  %v6057_v17 = vld [vmem:[#allocation8 + $0x330] ss:$8 sps:$4 sm:$0xff]  }
 0x2b9   : > { %v2371_v60 = vmul.f32 0.70710677, %v8201_v30  ;;  %v3114_v1 = vmul.f32 %v2858_v53, %v2090_v28  ;;  %v8212_v52 = vadd.f32 %v1746_v39, %v8113_v58  ;;  %4831 = vmatprep.subr.bf16.mxu0 %v6053_v33  ;;  %v6062_v33 = vld [vmem:[#allocation8 + $0x344] ss:$8 sps:$4 sm:$0xff]  }
 0x2ba   : > { %6376 = verf.f32 %v2370_v8  ;;  %2042 = vmatmul.mubr.bf16.gmra.mrb[248].mxu1 %v6671_v16  ;;  %v3115_v48 = vmul.f32 %v2859_v18, %v2091_v21  ;;  %v2378_v27 = vmul.f32 0.70710677, %v8209_v15  ;;  %v6060_v8 = vld [vmem:[#allocation8 + $0x340] ss:$8 sps:$4 sm:$0xff]  }
 0x2bb   : > { %6378 = verf.f32 %v2371_v60  ;;  %2051 = vmatprep.mubr.bf16.mxu1 %v6672_v25  ;;  %v2379_v3 = vmul.f32 0.70710677, %v8212_v52  ;;  %v3354_v6 = vpack.c.bf16 %v3114_v1, %v3106_v49  ;;  %v6065_v60 = vld [vmem:[#allocation8 + $0x354] ss:$8 sps:$4 sm:$0xff]   ;;  %v2114_v49 = vmul.f32 0.5, %v8197_v23 }
 0x2bc   : > { %v6369_v5 = vpop.eup %6368  ;;  %6380 = verf.f32 %v2378_v27  ;;  %v3355_v45 = vpack.c.bf16 %v3115_v48, %v3107_v63  ;;  %4832 = vmatpush1.bf16.msra.mxu0 %v6051_v34  ;;  %v2115_v48 = vmul.f32 0.5, %v8201_v30  ;;  %v2122_v27 = vmul.f32 0.5, %v8209_v15  ;;  %v6068_v15 = vld [vmem:[#allocation8 + $0x364] ss:$8 sps:$4 sm:$0xff]  }
 0x2bd   : > { %v6371_v62 = vpop.eup %6370  ;;  %v1750_v13 = vpop.f32.mrb[144].mxu1  ;;  %v2866_v2 = vadd.f32 1.0, %v6369_v5  ;;  %6382 = verf.f32 %v2379_v3  ;;  %4833 = vmatprep.subr.bf16.mxu0 %v6056_v44 }
 0x2be   : > { %v8219_v38 = vadd.f32 %v1750_v13, %v8107_v54  ;;  %v1752_v51 = vpop.f32.mrb[145].mxu1  ;;  %v6373_v29 = vpop.eup %6372  ;;  %v2867_v46 = vadd.f32 1.0, %v6371_v62  ;;  %4678 = vmatprep.mubr.bf16.mxu0 %v3355_v45  ;;  %v6063_v45 = vld [vmem:[#allocation8 + $0x350] ss:$8 sps:$4 sm:$0xff]  }
 0x2bf   : > { %v8223_v12 = vadd.f32 %v1752_v51, %v8113_v58  ;;  %v1754_v36 = vpop.f32.mrb[146].mxu1  ;;  %v6375_v26 = vpop.eup %6374  ;;  %v2874_v37 = vadd.f32 1.0, %v6373_v29  ;;  %4679 = vmatmul.mubr.bf16.gmra.mrb[4].mxu0 %v3354_v6  ;;  %v3122_v42 = vmul.f32 %v2866_v2, %v2098_v43  ;;  %v2123_v6 = vmul.f32 0.5, %v8212_v52 }
 0x2c0   : > { %v2386_v50 = vmul.f32 0.70710677, %v8219_v38  ;;  %v1756_v24 = vpop.f32.mrb[147].mxu1  ;;  %v2875_v4 = vadd.f32 1.0, %v6375_v26  ;;  %v8231_v7 = vadd.f32 %v1754_v36, %v8107_v54  ;;  %4834 = vmatpush1.bf16.msra.mxu0 %v6054_v9  ;;  %v3123_v22 = vmul.f32 %v2867_v46, %v2099_v31 }
 0x2c1   : > { %v2387_v59 = vmul.f32 0.70710677, %v8223_v12  ;;  %v3130_v20 = vmul.f32 %v2874_v37, %v2106_v10  ;;  %v8234_v55 = vadd.f32 %v1756_v24, %v8113_v58  ;;  %4835 = vmatprep.subr.bf16.mxu0 %v6059_v19  ;;  %v6066_v10 = vld [vmem:[#allocation8 + $0x360] ss:$8 sps:$4 sm:$0xff]  }
 0x2c2   : > { %6384 = verf.f32 %v2386_v50  ;;  %2052 = vmatmul.mubr.bf16.gmra.mrb[252].mxu1 %v6673_v11  ;;  %v3131_v47 = vmul.f32 %v2875_v4, %v2107_v14  ;;  %v2394_v61 = vmul.f32 0.70710677, %v8231_v7  ;;  %v6071_v14 = vld [vmem:[#allocation8 + $0x374] ss:$8 sps:$4 sm:$0xff]  }
 0x2c3   : > { %6386 = verf.f32 %v2387_v59  ;;  %v2395_v35 = vmul.f32 0.70710677, %v8234_v55  ;;  %v3362_v0 = vpack.c.bf16 %v3130_v20, %v3122_v42  ;;  %v2130_v59 = vmul.f32 0.5, %v8219_v38 }
 0x2c4   : > { %v6377_v40 = vpop.eup %6376  ;;  %6388 = verf.f32 %v2394_v61  ;;  %v3363_v53 = vpack.c.bf16 %v3131_v47, %v3123_v22  ;;  %4836 = vmatpush1.bf16.msra.mxu0 %v6057_v17  ;;  %v2138_v22 = vmul.f32 0.5, %v8231_v7  ;;  %v6074_v7 = vld [vmem:[#allocation8 + $0x384] ss:$8 sps:$4 sm:$0xff]  }
 0x2c5   : > { %v6379_v41 = vpop.eup %6378  ;;  %v1760_v28 = vpop.f32.mrb[148].mxu1  ;;  %v2882_v39 = vadd.f32 1.0, %v6377_v40  ;;  %6390 = verf.f32 %v2395_v35  ;;  %4837 = vmatprep.subr.bf16.mxu0 %v6062_v33  ;;  %v2131_v33 = vmul.f32 0.5, %v8223_v12  ;;  %v2139_v35 = vmul.f32 0.5, %v8234_v55 }
 0x2c6   : > { %v8240_v21 = vadd.f32 %v1760_v28, %v8107_v54  ;;  %v1762_v18 = vpop.f32.mrb[149].mxu1  ;;  %v6381_v34 = vpop.eup %6380  ;;  %v2883_v1 = vadd.f32 1.0, %v6379_v41  ;;  %4688 = vmatprep.mubr.bf16.mxu0 %v3363_v53  ;;  %v6069_v28 = vld [vmem:[#allocation8 + $0x370] ss:$8 sps:$4 sm:$0xff]  }
 0x2c7   : > { %v8244_v16 = vadd.f32 %v1762_v18, %v8113_v58  ;;  %v1764_v44 = vpop.f32.mrb[150].mxu1  ;;  %v6383_v63 = vpop.eup %6382  ;;  %v2890_v25 = vadd.f32 1.0, %v6381_v34  ;;  %4689 = vmatmul.mubr.bf16.gmra.mrb[8].mxu0 %v3362_v0  ;;  %v3138_v9 = vmul.f32 %v2882_v39, %v2114_v49 }
 0x2c8   : > { %v2402_v5 = vmul.f32 0.70710677, %v8240_v21  ;;  %v1766_v3 = vpop.f32.mrb[151].mxu1  ;;  %v2891_v62 = vadd.f32 1.0, %v6383_v63  ;;  %v8252_v13 = vadd.f32 %v1764_v44, %v8107_v54  ;;  %4838 = vmatpush1.bf16.msra.mxu0 %v6060_v8  ;;  %v3139_v51 = vmul.f32 %v2883_v1, %v2115_v48  ;;  %v6072_v48 = vld [vmem:[#allocation8 + $0x380] ss:$8 sps:$4 sm:$0xff]  }
 0x2c9   : > { %v2403_v23 = vmul.f32 0.70710677, %v8244_v16  ;;  %v3146_v2 = vmul.f32 %v2890_v25, %v2122_v27  ;;  %v8255_v30 = vadd.f32 %v1766_v3, %v8113_v58  ;;  %4839 = vmatprep.subr.bf16.mxu0 %v6065_v60  ;;  %v6077_v3 = vld [vmem:[#allocation8 + $0x394] ss:$8 sps:$4 sm:$0xff]  }
 0x2ca   : > { %6392 = verf.f32 %v2402_v5  ;;  %v3147_v19 = vmul.f32 %v2891_v62, %v2123_v6  ;;  %v2410_v52 = vmul.f32 0.70710677, %v8252_v13  ;;  %v2146_v62 = vmul.f32 0.5, %v8240_v21 }
 0x2cb   : > { %6394 = verf.f32 %v2403_v23  ;;  %v2411_v43 = vmul.f32 0.70710677, %v8255_v30  ;;  %v3370_v46 = vpack.c.bf16 %v3146_v2, %v3138_v9 }
 0x2cc   : > { %v6385_v29 = vpop.eup %6384  ;;  %6396 = verf.f32 %v2410_v52  ;;  %v3371_v31 = vpack.c.bf16 %v3147_v19, %v3139_v51  ;;  %4840 = vmatpush1.bf16.msra.mxu0 %v6063_v45  ;;  %v2154_v51 = vmul.f32 0.5, %v8252_v13  ;;  %v6080_v13 = vld [vmem:[#allocation8 + $0x3a4] ss:$8 sps:$4 sm:$0xff]  }
 0x2cd   : > { %v6387_v36 = vpop.eup %6386  ;;  %v1770_v26 = vpop.f32.mrb[152].mxu1  ;;  %v2898_v37 = vadd.f32 1.0, %v6385_v29  ;;  %6398 = verf.f32 %v2411_v43  ;;  %4841 = vmatprep.subr.bf16.mxu0 %v6068_v15  ;;  %v2147_v15 = vmul.f32 0.5, %v8244_v16  ;;  %v2155_v43 = vmul.f32 0.5, %v8255_v30 }
 0x2ce   : > { %v8260_v50 = vadd.f32 %v1770_v26, %v8107_v54  ;;  %v1772_v24 = vpop.f32.mrb[153].mxu1  ;;  %v6389_v4 = vpop.eup %6388  ;;  %v2899_v17 = vadd.f32 1.0, %v6387_v36  ;;  %4698 = vmatprep.mubr.bf16.mxu0 %v3371_v31  ;;  %v6075_v26 = vld [vmem:[#allocation8 + $0x390] ss:$8 sps:$4 sm:$0xff]  }
 0x2cf   : > { %v8264_v42 = vadd.f32 %v1772_v24, %v8113_v58  ;;  %v1774_v20 = vpop.f32.mrb[154].mxu1  ;;  %v6391_v11 = vpop.eup %6390  ;;  %v2906_v47 = vadd.f32 1.0, %v6389_v4  ;;  %4699 = vmatmul.mubr.bf16.gmra.mrb[12].mxu0 %v3370_v46  ;;  %v3154_v53 = vmul.f32 %v2898_v37, %v2130_v59 }
 0x2d0   : > { %v2418_v61 = vmul.f32 0.70710677, %v8260_v50  ;;  %v1776_v40 = vpop.f32.mrb[155].mxu1  ;;  %v2907_v0 = vadd.f32 1.0, %v6391_v11  ;;  %v8272_v41 = vadd.f32 %v1774_v20, %v8107_v54  ;;  %4842 = vmatpush1.bf16.msra.mxu0 %v6066_v10  ;;  %v3155_v39 = vmul.f32 %v2899_v17, %v2131_v33  ;;  %v6078_v33 = vld [vmem:[#allocation8 + $0x3a0] ss:$8 sps:$4 sm:$0xff]  }
 0x2d1   : > { %v2419_v38 = vmul.f32 0.70710677, %v8264_v42  ;;  %v3162_v8 = vmul.f32 %v2906_v47, %v2138_v22  ;;  %v8275_v12 = vadd.f32 %v1776_v40, %v8113_v58  ;;  %4843 = vmatprep.subr.bf16.mxu0 %v6071_v14  ;;  %v6083_v40 = vld [vmem:[#allocation8 + $0x3b4] ss:$8 sps:$4 sm:$0xff]  }
 0x2d2   : > { %6400 = verf.f32 %v2418_v61  ;;  %v3163_v18 = vmul.f32 %v2907_v0, %v2139_v35  ;;  %v2426_v55 = vmul.f32 0.70710677, %v8272_v41  ;;  %v2162_v0 = vmul.f32 0.5, %v8260_v50 }
 0x2d3   : > { %6402 = verf.f32 %v2419_v38  ;;  %v2427_v34 = vmul.f32 0.70710677, %v8275_v12  ;;  %v3378_v49 = vpack.c.bf16 %v3162_v8, %v3154_v53 }
 0x2d4   : > { %v6393_v60 = vpop.eup %6392  ;;  %6404 = verf.f32 %v2426_v55  ;;  %v3379_v63 = vpack.c.bf16 %v3163_v18, %v3155_v39  ;;  %4844 = vmatpush1.bf16.msra.mxu0 %v6069_v28  ;;  %v2170_v39 = vmul.f32 0.5, %v8272_v41  ;;  %v6086_v41 = vld [vmem:[#allocation8 + $0x3c4] ss:$8 sps:$4 sm:$0xff]  }
 0x2d5   : > { %v6395_v1 = vpop.eup %6394  ;;  %v1780_v44 = vpop.f32.mrb[156].mxu1  ;;  %v2914_v27 = vadd.f32 1.0, %v6393_v60  ;;  %6406 = verf.f32 %v2427_v34  ;;  %4845 = vmatprep.subr.bf16.mxu0 %v6074_v7  ;;  %v2163_v7 = vmul.f32 0.5, %v8264_v42  ;;  %v2171_v34 = vmul.f32 0.5, %v8275_v12 }
 0x2d6   : > { %v8280_v25 = vadd.f32 %v1780_v44, %v8107_v54  ;;  %v1782_v5 = vpop.f32.mrb[157].mxu1  ;;  %v6397_v6 = vpop.eup %6396  ;;  %v2915_v23 = vadd.f32 1.0, %v6395_v1  ;;  %4708 = vmatprep.mubr.bf16.mxu0 %v3379_v63  ;;  %v6081_v44 = vld [vmem:[#allocation8 + $0x3b0] ss:$8 sps:$4 sm:$0xff]  }
 0x2d7   : > { %v8284_v45 = vadd.f32 %v1782_v5, %v8113_v58  ;;  %v1784_v9 = vpop.f32.mrb[158].mxu1  ;;  %v6399_v2 = vpop.eup %6398  ;;  %v2922_v19 = vadd.f32 1.0, %v6397_v6  ;;  %4709 = vmatmul.mubr.bf16.gmra.mrb[16].mxu0 %v3378_v49  ;;  %v3170_v31 = vmul.f32 %v2914_v27, %v2146_v62 }
 0x2d8   : > { %v2434_v52 = vmul.f32 0.70710677, %v8280_v25  ;;  %v1786_v29 = vpop.f32.mrb[159].mxu1  ;;  %v2923_v46 = vadd.f32 1.0, %v6399_v2  ;;  %v8292_v36 = vadd.f32 %v1784_v9, %v8107_v54  ;;  %4846 = vmatpush1.bf16.msra.mxu0 %v6072_v48  ;;  %v3171_v37 = vmul.f32 %v2915_v23, %v2147_v15  ;;  %v6084_v15 = vld [vmem:[#allocation8 + $0x3c0] ss:$8 sps:$4 sm:$0xff]  }
 0x2d9   : > { %v2435_v21 = vmul.f32 0.70710677, %v8284_v45  ;;  %v3178_v10 = vmul.f32 %v2922_v19, %v2154_v51  ;;  %v8295_v16 = vadd.f32 %v1786_v29, %v8113_v58  ;;  %4847 = vmatprep.subr.bf16.mxu0 %v6077_v3  ;;  %v6089_v29 = vld [vmem:[#allocation8 + $0x3d4] ss:$8 sps:$4 sm:$0xff]  }
 0x2da   : > { %6408 = verf.f32 %v2434_v52  ;;  %v3179_v24 = vmul.f32 %v2923_v46, %v2155_v43  ;;  %v2442_v30 = vmul.f32 0.70710677, %v8292_v36  ;;  %v2178_v46 = vmul.f32 0.5, %v8280_v25 }
 0x2db   : > { %6410 = verf.f32 %v2435_v21  ;;  %v2443_v4 = vmul.f32 0.70710677, %v8295_v16  ;;  %v3386_v59 = vpack.c.bf16 %v3178_v10, %v3170_v31 }
 0x2dc   : > { %v6401_v14 = vpop.eup %6400  ;;  %6412 = verf.f32 %v2442_v30  ;;  %v3387_v11 = vpack.c.bf16 %v3179_v24, %v3171_v37  ;;  %4848 = vmatpush1.bf16.msra.mxu0 %v6075_v26  ;;  %v2186_v37 = vmul.f32 0.5, %v8292_v36  ;;  %v6092_v36 = vld [vmem:[#allocation8 + $0x3e4] ss:$8 sps:$4 sm:$0xff]  }
 0x2dd   : > { %v6403_v17 = vpop.eup %6402  ;;  %v1790_v20 = vpop.f32.mrb[160].mxu1  ;;  %v2930_v22 = vadd.f32 1.0, %v6401_v14  ;;  %6414 = verf.f32 %v2443_v4  ;;  %4849 = vmatprep.subr.bf16.mxu0 %v6080_v13  ;;  %v2179_v13 = vmul.f32 0.5, %v8284_v45  ;;  %v2187_v4 = vmul.f32 0.5, %v8295_v16 }
 0x2de   : > { %v8300_v47 = vadd.f32 %v1790_v20, %v8107_v54  ;;  %v1792_v61 = vpop.f32.mrb[161].mxu1  ;;  %v6405_v35 = vpop.eup %6404  ;;  %v2931_v38 = vadd.f32 1.0, %v6403_v17  ;;  %4718 = vmatprep.mubr.bf16.mxu0 %v3387_v11  ;;  %v6087_v20 = vld [vmem:[#allocation8 + $0x3d0] ss:$8 sps:$4 sm:$0xff]  }
 0x2df   : > { %v8304_v28 = vadd.f32 %v1792_v61, %v8113_v58  ;;  %v1794_v53 = vpop.f32.mrb[162].mxu1  ;;  %v6407_v8 = vpop.eup %6406  ;;  %v2938_v18 = vadd.f32 1.0, %v6405_v35  ;;  %4719 = vmatmul.mubr.bf16.gmra.mrb[20].mxu0 %v3386_v59  ;;  %v3186_v63 = vmul.f32 %v2930_v22, %v2162_v0 }
 0x2e0   : > { %v2450_v55 = vmul.f32 0.70710677, %v8300_v47  ;;  %v1796_v60 = vpop.f32.mrb[163].mxu1  ;;  %v2939_v49 = vadd.f32 1.0, %v6407_v8  ;;  %v8312_v1 = vadd.f32 %v1794_v53, %v8107_v54  ;;  %4850 = vmatpush1.bf16.msra.mxu0 %v6078_v33  ;;  %v3187_v27 = vmul.f32 %v2931_v38, %v2163_v7  ;;  %v6090_v7 = vld [vmem:[#allocation8 + $0x3e0] ss:$8 sps:$4 sm:$0xff]  }
 0x2e1   : > { %v2451_v50 = vmul.f32 0.70710677, %v8304_v28  ;;  %v3194_v48 = vmul.f32 %v2938_v18, %v2170_v39  ;;  %v8315_v42 = vadd.f32 %v1796_v60, %v8113_v58  ;;  %4851 = vmatprep.subr.bf16.mxu0 %v6083_v40  ;;  %v6095_v60 = vld [vmem:[#allocation8 + $0x3f4] ss:$8 sps:$4 sm:$0xff]  }
 0x2e2   : > { %6416 = verf.f32 %v2450_v55  ;;  %v3195_v5 = vmul.f32 %v2939_v49, %v2171_v34  ;;  %v2458_v12 = vmul.f32 0.70710677, %v8312_v1  ;;  %v2194_v49 = vmul.f32 0.5, %v8300_v47 }
 0x2e3   : > { %6418 = verf.f32 %v2451_v50  ;;  %v2459_v6 = vmul.f32 0.70710677, %v8315_v42  ;;  %v3394_v62 = vpack.c.bf16 %v3194_v48, %v3186_v63 }
 0x2e4   : > { %v6409_v3 = vpop.eup %6408  ;;  %6420 = verf.f32 %v2458_v12  ;;  %v3395_v2 = vpack.c.bf16 %v3195_v5, %v3187_v27  ;;  %4852 = vmatpush1.bf16.msra.mxu0 %v6081_v44  ;;  %v2202_v27 = vmul.f32 0.5, %v8312_v1 }
 0x2e5   : > { %v6411_v23 = vpop.eup %6410  ;;  %v1800_v9 = vpop.f32.mrb[164].mxu1  ;;  %v2946_v51 = vadd.f32 1.0, %v6409_v3  ;;  %6422 = verf.f32 %v2459_v6  ;;  %4853 = vmatprep.subr.bf16.mxu0 %v6086_v41  ;;  %v2195_v41 = vmul.f32 0.5, %v8304_v28  ;;  %v2203_v6 = vmul.f32 0.5, %v8315_v42 }
 0x2e6   : > { %v8320_v19 = vadd.f32 %v1800_v9, %v8107_v54  ;;  %v1802_v52 = vpop.f32.mrb[165].mxu1  ;;  %v6413_v43 = vpop.eup %6412  ;;  %v2947_v21 = vadd.f32 1.0, %v6411_v23  ;;  %4728 = vmatprep.mubr.bf16.mxu0 %v3395_v2  ;;  %v6093_v9 = vld [vmem:[#allocation8 + $0x3f0] ss:$8 sps:$4 sm:$0xff]  }
 0x2e7   : > { %v8324_v26 = vadd.f32 %v1802_v52, %v8113_v58  ;;  %v1804_v31 = vpop.f32.mrb[166].mxu1  ;;  %v6415_v10 = vpop.eup %6414  ;;  %v2954_v24 = vadd.f32 1.0, %v6413_v43  ;;  %4729 = vmatmul.mubr.bf16.gmra.mrb[24].mxu0 %v3394_v62  ;;  %v3202_v11 = vmul.f32 %v2946_v51, %v2178_v46 }
 0x2e8   : > { %v2466_v30 = vmul.f32 0.70710677, %v8320_v19  ;;  %v1806_v14 = vpop.f32.mrb[167].mxu1  ;;  %v2955_v59 = vadd.f32 1.0, %v6415_v10  ;;  %v8332_v17 = vadd.f32 %v1804_v31, %v8107_v54  ;;  %4854 = vmatpush1.bf16.msra.mxu0 %v6084_v15  ;;  %v3203_v22 = vmul.f32 %v2947_v21, %v2179_v13 }
 0x2e9   : > { %v2467_v25 = vmul.f32 0.70710677, %v8324_v26  ;;  %v3210_v33 = vmul.f32 %v2954_v24, %v2186_v37  ;;  %v8335_v45 = vadd.f32 %v1806_v14, %v8113_v58  ;;  %4855 = vmatprep.subr.bf16.mxu0 %v6089_v29 }
 0x2ea   : > { %6424 = verf.f32 %v2466_v30  ;;  %v3211_v61 = vmul.f32 %v2955_v59, %v2187_v4  ;;  %v2474_v16 = vmul.f32 0.70710677, %v8332_v17  ;;  %v2210_v30 = vmul.f32 0.5, %v8320_v19 }
 0x2eb   : > { %6426 = verf.f32 %v2467_v25  ;;  %v2475_v35 = vmul.f32 0.70710677, %v8335_v45  ;;  %v3402_v0 = vpack.c.bf16 %v3210_v33, %v3202_v11  ;;  %v2218_v11 = vmul.f32 0.5, %v8332_v17 }
 0x2ec   : > { %v6417_v40 = vpop.eup %6416  ;;  %6428 = verf.f32 %v2474_v16  ;;  %v3403_v8 = vpack.c.bf16 %v3211_v61, %v3203_v22  ;;  %4856 = vmatpush1.bf16.msra.mxu0 %v6087_v20  ;;  %v2211_v20 = vmul.f32 0.5, %v8324_v26  ;;  %v2219_v61 = vmul.f32 0.5, %v8335_v45 }
 0x2ed   : > { %v6419_v38 = vpop.eup %6418  ;;  %v1810_v53 = vpop.f32.mrb[168].mxu1  ;;  %v2962_v39 = vadd.f32 1.0, %v6417_v40  ;;  %6430 = verf.f32 %v2475_v35  ;;  %4857 = vmatprep.subr.bf16.mxu0 %v6092_v36 }
 0x2ee   : > { %v8340_v18 = vadd.f32 %v1810_v53, %v8107_v54  ;;  %v1812_v55 = vpop.f32.mrb[169].mxu1  ;;  %v6421_v34 = vpop.eup %6420  ;;  %v2963_v50 = vadd.f32 1.0, %v6419_v38  ;;  %4738 = vmatprep.mubr.bf16.mxu0 %v3403_v8 }
 0x2ef   : > { %v8344_v44 = vadd.f32 %v1812_v55, %v8113_v58  ;;  %v1814_v63 = vpop.f32.mrb[170].mxu1  ;;  %v6423_v48 = vpop.eup %6422  ;;  %v2970_v5 = vadd.f32 1.0, %v6421_v34  ;;  %4739 = vmatmul.mubr.bf16.gmra.mrb[28].mxu0 %v3402_v0  ;;  %v3218_v2 = vmul.f32 %v2962_v39, %v2194_v49 }
 0x2f0   : > { %v2482_v12 = vmul.f32 0.70710677, %v8340_v18  ;;  %v1816_v3 = vpop.f32.mrb[171].mxu1  ;;  %v2971_v62 = vadd.f32 1.0, %v6423_v48  ;;  %v8352_v23 = vadd.f32 %v1814_v63, %v8107_v54  ;;  %4858 = vmatpush1.bf16.msra.mxu0 %v6090_v7  ;;  %v3219_v1 = vmul.f32 %v2963_v50, %v2195_v41 }
 0x2f1   : > { %v2483_v47 = vmul.f32 0.70710677, %v8344_v44  ;;  %v3226_v15 = vmul.f32 %v2970_v5, %v2202_v27  ;;  %v8355_v28 = vadd.f32 %v1816_v3, %v8113_v58  ;;  %4859 = vmatprep.subr.bf16.mxu0 %v6095_v60  ;;  %v2226_v48 = vmul.f32 0.5, %v8340_v18 }
 0x2f2   : > { %6432 = verf.f32 %v2482_v12  ;;  %v3227_v51 = vmul.f32 %v2971_v62, %v2203_v6  ;;  %v2490_v42 = vmul.f32 0.70710677, %v8352_v23  ;;  %v2227_v3 = vmul.f32 0.5, %v8344_v44 }
 0x2f3   : > { %6434 = verf.f32 %v2483_v47  ;;  %v2491_v29 = vmul.f32 0.70710677, %v8355_v28  ;;  %v3410_v43 = vpack.c.bf16 %v3226_v15, %v3218_v2  ;;  %v2234_v6 = vmul.f32 0.5, %v8352_v23 }
 0x2f4   : > { %v6425_v52 = vpop.eup %6424  ;;  %6436 = verf.f32 %v2490_v42  ;;  %v3411_v31 = vpack.c.bf16 %v3227_v51, %v3219_v1  ;;  %4860 = vmatpush1.bf16.msra.mxu0 %v6093_v9  ;;  %v2235_v2 = vmul.f32 0.5, %v8355_v28 }
 0x2f5   : > { %v6427_v46 = vpop.eup %6426  ;;  %v1820_v21 = vpop.f32.mrb[172].mxu1  ;;  %v2978_v10 = vadd.f32 1.0, %v6425_v52  ;;  %6438 = verf.f32 %v2491_v29 }
 0x2f6   : > { %v8360_v13 = vadd.f32 %v1820_v21, %v8107_v54  ;;  %v1822_v37 = vpop.f32.mrb[173].mxu1  ;;  %v6429_v24 = vpop.eup %6428  ;;  %v2979_v14 = vadd.f32 1.0, %v6427_v46  ;;  %4748 = vmatprep.mubr.bf16.mxu0 %v3411_v31 }
 0x2f7   : > { %v8364_v4 = vadd.f32 %v1822_v37, %v8113_v58  ;;  %v1824_v59 = vpop.f32.mrb[174].mxu1  ;;  %v6431_v25 = vpop.eup %6430  ;;  %v2986_v33 = vadd.f32 1.0, %v6429_v24  ;;  %4749 = vmatmul.mubr.bf16.gmra.mrb[32].mxu0 %v3410_v43  ;;  %v3234_v35 = vmul.f32 %v2978_v10, %v2210_v30 }
 0x2f8   : > { %v2498_v36 = vmul.f32 0.70710677, %v8360_v13  ;;  %v1826_v22 = vpop.f32.mrb[175].mxu1  ;;  %v2987_v16 = vadd.f32 1.0, %v6431_v25  ;;  %v8372_v40 = vadd.f32 %v1824_v59, %v8107_v54  ;;  %v3235_v17 = vmul.f32 %v2979_v14, %v2211_v20 }
 0x2f9   : > { %v2499_v19 = vmul.f32 0.70710677, %v8364_v4  ;;  %v3242_v0 = vmul.f32 %v2986_v33, %v2218_v11  ;;  %v8375_v26 = vadd.f32 %v1826_v22, %v8113_v58  ;;  %v2242_v59 = vmul.f32 0.5, %v8360_v13 }
 0x2fa   : > { %6440 = verf.f32 %v2498_v36  ;;  %v3243_v38 = vmul.f32 %v2987_v16, %v2219_v61  ;;  %v2506_v53 = vmul.f32 0.70710677, %v8372_v40  ;;  %v2243_v36 = vmul.f32 0.5, %v8364_v4 }
 0x2fb   : > { %6442 = verf.f32 %v2499_v19  ;;  %v2507_v45 = vmul.f32 0.70710677, %v8375_v26  ;;  %v3418_v7 = vpack.c.bf16 %v3242_v0, %v3234_v35  ;;  %v2250_v22 = vmul.f32 0.5, %v8372_v40 }
 0x2fc   : > { %v6433_v8 = vpop.eup %6432  ;;  %6444 = verf.f32 %v2506_v53  ;;  %v3419_v60 = vpack.c.bf16 %v3243_v38, %v3235_v17  ;;  %v2251_v35 = vmul.f32 0.5, %v8375_v26 }
 0x2fd   : > { %v6435_v39 = vpop.eup %6434  ;;  %v1830_v55 = vpop.f32.mrb[176].mxu1  ;;  %v2994_v34 = vadd.f32 1.0, %v6433_v8  ;;  %6446 = verf.f32 %v2507_v45 }
 0x2fe   : > { %v8380_v49 = vadd.f32 %v1830_v55, %v8107_v54  ;;  %v1832_v50 = vpop.f32.mrb[177].mxu1  ;;  %v6437_v63 = vpop.eup %6436  ;;  %v2995_v41 = vadd.f32 1.0, %v6435_v39  ;;  %4758 = vmatprep.mubr.bf16.mxu0 %v3419_v60 }
 0x2ff   : > { %v8384_v27 = vadd.f32 %v1832_v50, %v8113_v58  ;;  %v1834_v5 = vpop.f32.mrb[178].mxu1  ;;  %v6439_v12 = vpop.eup %6438  ;;  %v3002_v62 = vadd.f32 1.0, %v6437_v63  ;;  %4759 = vmatmul.mubr.bf16.gmra.mrb[36].mxu0 %v3418_v7  ;;  %v3250_v51 = vmul.f32 %v2994_v34, %v2226_v48 }
 0x300   : > { %v2514_v47 = vmul.f32 0.70710677, %v8380_v49  ;;  %v1836_v9 = vpop.f32.mrb[179].mxu1  ;;  %v3003_v15 = vadd.f32 1.0, %v6439_v12  ;;  %v8392_v1 = vadd.f32 %v1834_v5, %v8107_v54  ;;  %v3251_v23 = vmul.f32 %v2995_v41, %v2227_v3 }
 0x301   : > { %v2515_v18 = vmul.f32 0.70710677, %v8384_v27  ;;  %v3258_v42 = vmul.f32 %v3002_v62, %v2234_v6  ;;  %v8395_v44 = vadd.f32 %v1836_v9, %v8113_v58  ;;  %v476_v41 = vsub.s32 6, %v7290_v56 }
 0x302   : > { %6448 = verf.f32 %v2514_v47  ;;  %v3259_v52 = vmul.f32 %v3003_v15, %v2235_v2  ;;  %v2522_v29 = vmul.f32 0.70710677, %v8392_v1  ;;  %v2258_v12 = vmul.f32 0.5, %v8380_v49 }
 0x303   : > { %6450 = verf.f32 %v2515_v18  ;;  %v2523_v28 = vmul.f32 0.70710677, %v8395_v44  ;;  %v3426_v46 = vpack.c.bf16 %v3258_v42, %v3250_v51  ;;  %v480_v47 = vsub.s32 7, %v7290_v56 }
 0x304   : > { %v6441_v43 = vpop.eup %6440  ;;  %6452 = verf.f32 %v2522_v29  ;;  %v3427_v10 = vpack.c.bf16 %v3259_v52, %v3251_v23  ;;  %v2259_v2 = vmul.f32 0.5, %v8384_v27  ;;  %v2266_v15 = vmul.f32 0.5, %v8392_v1 }
 0x305   : > { %v6443_v21 = vpop.eup %6442  ;;  %v1840_v31 = vpop.f32.mrb[180].mxu1  ;;  %v3010_v37 = vadd.f32 1.0, %v6441_v43  ;;  %6454 = verf.f32 %v2523_v28  ;;  %v2267_v49 = vmul.f32 0.5, %v8395_v44 }
 0x306   : > { %v8400_v24 = vadd.f32 %v1840_v31, %v8107_v54  ;;  %v1842_v30 = vpop.f32.mrb[181].mxu1  ;;  %v6445_v14 = vpop.eup %6444  ;;  %v3011_v25 = vadd.f32 1.0, %v6443_v21  ;;  %4768 = vmatprep.mubr.bf16.mxu0 %v3427_v10 }
 0x307   : > { %v8404_v20 = vadd.f32 %v1842_v30, %v8113_v58  ;;  %v1844_v11 = vpop.f32.mrb[182].mxu1  ;;  %v6447_v33 = vpop.eup %6446  ;;  %v3018_v61 = vadd.f32 1.0, %v6445_v14  ;;  %4769 = vmatmul.mubr.bf16.gmra.mrb[40].mxu0 %v3426_v46  ;;  %v3266_v38 = vmul.f32 %v3010_v37, %v2242_v59 }
 0x308   : > { %v2530_v16 = vmul.f32 0.70710677, %v8400_v24  ;;  %v1846_v19 = vpop.f32.mrb[183].mxu1  ;;  %v3019_v0 = vadd.f32 1.0, %v6447_v33  ;;  %v8412_v17 = vadd.f32 %v1844_v11, %v8107_v54  ;;  %v3267_v40 = vmul.f32 %v3011_v25, %v2243_v36  ;;  %v6674_v33 = vld [vmem:[#allocation7] sm:$0xff] }
 0x309   : > { %v2531_v13 = vmul.f32 0.70710677, %v8404_v20  ;;  %v3274_v53 = vmul.f32 %v3018_v61, %v2250_v22  ;;  %v8415_v4 = vadd.f32 %v1846_v19, %v8113_v58  ;;  %v8444_v36 = vrot.slane %v6674_v33, %v476_v41 }
 0x30a   : > { %6456 = verf.f32 %v2530_v16  ;;  %v3275_v8 = vmul.f32 %v3019_v0, %v2251_v35  ;;  %v2538_v45 = vmul.f32 0.70710677, %v8412_v17  ;;  %v2274_v61 = vmul.f32 0.5, %v8400_v24 }
 0x30b   : > { %6458 = verf.f32 %v2531_v13  ;;  %v2539_v26 = vmul.f32 0.70710677, %v8415_v4  ;;  %v3434_v39 = vpack.c.bf16 %v3274_v53, %v3266_v38  ;;  %v8450_v0 = vrot.slane %v6674_v33, %v480_v47 }
 0x30c   : > { %v6449_v7 = vpop.eup %6448  ;;  %6460 = verf.f32 %v2538_v45  ;;  %v3435_v34 = vpack.c.bf16 %v3275_v8, %v3267_v40  ;;  %v2275_v38 = vmul.f32 0.5, %v8404_v20  ;;  %v2282_v53 = vmul.f32 0.5, %v8412_v17 }
 0x30d   : > { %v6451_v55 = vpop.eup %6450  ;;  %v1850_v60 = vpop.f32.mrb[184].mxu1  ;;  %v3026_v50 = vadd.f32 1.0, %v6449_v7  ;;  %6462 = verf.f32 %v2539_v26  ;;  %v2283_v24 = vmul.f32 0.5, %v8415_v4 }
 0x30e   : > { %v8420_v63 = vadd.f32 %v1850_v60, %v8107_v54  ;;  %v1852_v48 = vpop.f32.mrb[185].mxu1  ;;  %v6453_v5 = vpop.eup %6452  ;;  %v3027_v3 = vadd.f32 1.0, %v6451_v55  ;;  %4778 = vmatprep.mubr.bf16.mxu0 %v3435_v34 }
 0x30f   : > { %v8425_v6 = vadd.f32 %v1852_v48, %v8113_v58  ;;  %v1854_v62 = vpop.f32.mrb[186].mxu1  ;;  %v6455_v9 = vpop.eup %6454  ;;  %v3034_v18 = vadd.f32 1.0, %v6453_v5  ;;  %4779 = vmatmul.mubr.bf16.gmra.mrb[44].mxu0 %v3434_v39  ;;  %v3282_v43 = vmul.f32 %v3026_v50, %v2258_v12 }
 0x310   : > { %v2546_v51 = vmul.f32 0.70710677, %v8420_v63  ;;  %v1856_v42 = vpop.f32.mrb[187].mxu1  ;;  %v3035_v23 = vadd.f32 1.0, %v6455_v9  ;;  %v8434_v29 = vadd.f32 %v1854_v62, %v8107_v54  ;;  %v3283_v1 = vmul.f32 %v3027_v3, %v2259_v2 }
 0x311   : > { %v2547_v52 = vmul.f32 0.70710677, %v8425_v6  ;;  %v3290_v28 = vmul.f32 %v3034_v18, %v2266_v15  ;;  %v8437_v27 = vadd.f32 %v1856_v42, %v8113_v58  ;;  %v2290_v9 = vmul.f32 0.5, %v8420_v63 }
 0x312   : > { %6464 = verf.f32 %v2546_v51  ;;  %v3291_v46 = vmul.f32 %v3035_v23, %v2267_v49  ;;  %v2554_v21 = vmul.f32 0.70710677, %v8434_v29  ;;  %v2291_v42 = vmul.f32 0.5, %v8425_v6 }
 0x313   : > { %6466 = verf.f32 %v2547_v52  ;;  %v2555_v44 = vmul.f32 0.70710677, %v8437_v27  ;;  %v3442_v10 = vpack.c.bf16 %v3290_v28, %v3282_v43  ;;  %v2298_v49 = vmul.f32 0.5, %v8434_v29 }
 0x314   : > { %v6457_v31 = vpop.eup %6456  ;;  %6468 = verf.f32 %v2554_v21  ;;  %v3443_v14 = vpack.c.bf16 %v3291_v46, %v3283_v1  ;;  %v2299_v28 = vmul.f32 0.5, %v8437_v27 }
 0x315   : > { %v6459_v37 = vpop.eup %6458  ;;  %v1860_v30 = vpop.f32.mrb[188].mxu1  ;;  %v3042_v59 = vadd.f32 1.0, %v6457_v31  ;;  %6470 = verf.f32 %v2555_v44 }
 0x316   : > { %v8442_v25 = vadd.f32 %v1860_v30, %v8107_v54  ;;  %v1862_v11 = vpop.f32.mrb[189].mxu1  ;;  %v6461_v22 = vpop.eup %6460  ;;  %v3043_v16 = vadd.f32 1.0, %v6459_v37  ;;  %4788 = vmatprep.mubr.bf16.mxu0 %v3443_v14 }
 0x317   : > { %v8448_v19 = vadd.f32 %v1862_v11, %v8113_v58  ;;  %v1864_v35 = vpop.f32.mrb[190].mxu1  ;;  %v6463_v13 = vpop.eup %6462  ;;  %v3050_v40 = vadd.f32 1.0, %v6461_v22  ;;  %4789 = vmatmul.mubr.bf16.gmra.mrb[48].mxu0 %v3442_v10  ;;  %v3298_v55 = vmul.f32 %v3042_v59, %v2274_v61 }
 0x318   : > { %v2562_v8 = vmul.f32 0.70710677, %v8442_v25  ;;  %v1866_v45 = vpop.f32.mrb[191].mxu1  ;;  %v3051_v7 = vadd.f32 1.0, %v6463_v13  ;;  %v8458_v39 = vadd.f32 %v1864_v35, %v8107_v54  ;;  %v3299_v17 = vmul.f32 %v3043_v16, %v2275_v38 }
 0x319   : > { %v2563_v26 = vmul.f32 0.70710677, %v8448_v19  ;;  %v3306_v60 = vmul.f32 %v3050_v40, %v2282_v53  ;;  %v8461_v20 = vadd.f32 %v1866_v45, %v8113_v58  ;;  %v2306_v35 = vmul.f32 0.5, %v8442_v25 }
 0x31a   : > { %6472 = verf.f32 %v2562_v8  ;;  %v3307_v34 = vmul.f32 %v3051_v7, %v2283_v24  ;;  %v2570_v50 = vmul.f32 0.70710677, %v8458_v39  ;;  %v2307_v8 = vmul.f32 0.5, %v8448_v19 }
 0x31b   : > { %6474 = verf.f32 %v2563_v26  ;;  %v2571_v4 = vmul.f32 0.70710677, %v8461_v20  ;;  %v3450_v41 = vpack.c.bf16 %v3306_v60, %v3298_v55  ;;  %v2314_v45 = vmul.f32 0.5, %v8458_v39 }
 0x31c   : > { %v6465_v48 = vpop.eup %6464  ;;  %6476 = verf.f32 %v2570_v50  ;;  %v3451_v54 = vpack.c.bf16 %v3307_v34, %v3299_v17  ;;  %v2315_v55 = vmul.f32 0.5, %v8461_v20 }
 0x31d   : > { %v6467_v5 = vpop.eup %6466  ;;  %v1903_v12 = vpop.f32.mrb[192].mxu1  ;;  %v3058_v3 = vadd.f32 1.0, %v6465_v48  ;;  %6478 = verf.f32 %v2571_v4 }
 0x31e   : > { %v8466_v62 = vadd.f32 %v1903_v12, %v8444_v36  ;;  %v1905_v58 = vpop.f32.mrb[193].mxu1  ;;  %v6469_v47 = vpop.eup %6468  ;;  %v3059_v2 = vadd.f32 1.0, %v6467_v5  ;;  %4798 = vmatprep.mubr.bf16.mxu0 %v3451_v54 }
 0x31f   : > { %v8470_v15 = vadd.f32 %v1905_v58, %v8450_v0  ;;  %v1907_v18 = vpop.f32.mrb[194].mxu1  ;;  %v6471_v51 = vpop.eup %6470  ;;  %v3066_v23 = vadd.f32 1.0, %v6469_v47  ;;  %4799 = vmatmul.mubr.bf16.gmra.mrb[52].mxu0 %v3450_v41  ;;  %v3314_v21 = vmul.f32 %v3058_v3, %v2290_v9 }
 0x320   : > { %v2324_v52 = vmul.f32 0.70710677, %v8466_v62  ;;  %v1909_v43 = vpop.f32.mrb[195].mxu1  ;;  %v3067_v1 = vadd.f32 1.0, %v6471_v51  ;;  %v8478_v46 = vadd.f32 %v1907_v18, %v8444_v36  ;;  %v3315_v29 = vmul.f32 %v3059_v2, %v2291_v42 }
 0x321   : > { %v2325_v63 = vmul.f32 0.70710677, %v8470_v15  ;;  %v3322_v31 = vmul.f32 %v3066_v23, %v2298_v49  ;;  %v8481_v6 = vadd.f32 %v1909_v43, %v8450_v0  ;;  %v2068_v18 = vmul.f32 0.5, %v8466_v62 }
 0x322   : > { %6480 = verf.f32 %v2324_v52  ;;  %v3323_v44 = vmul.f32 %v3067_v1, %v2299_v28  ;;  %v2332_v10 = vmul.f32 0.70710677, %v8478_v46  ;;  %v2069_v52 = vmul.f32 0.5, %v8470_v15 }
 0x323   : > { %6482 = verf.f32 %v2325_v63  ;;  %v2333_v27 = vmul.f32 0.70710677, %v8481_v6  ;;  %v3458_v30 = vpack.c.bf16 %v3322_v31, %v3314_v21  ;;  %v2076_v43 = vmul.f32 0.5, %v8478_v46 }
 0x324   : > { %v6473_v37 = vpop.eup %6472  ;;  %6484 = verf.f32 %v2332_v10  ;;  %v3459_v11 = vpack.c.bf16 %v3323_v44, %v3315_v29  ;;  %v2077_v21 = vmul.f32 0.5, %v8481_v6 }
 0x325   : > { %v6475_v14 = vpop.eup %6474  ;;  %v1913_v59 = vpop.f32.mrb[196].mxu1  ;;  %v3074_v33 = vadd.f32 1.0, %v6473_v37  ;;  %6486 = verf.f32 %v2333_v27 }
 0x326   : > { %v8486_v22 = vadd.f32 %v1913_v59, %v8444_v36  ;;  %v1915_v61 = vpop.f32.mrb[197].mxu1  ;;  %v6477_v16 = vpop.eup %6476  ;;  %v3075_v13 = vadd.f32 1.0, %v6475_v14  ;;  %4808 = vmatprep.mubr.bf16.mxu0 %v3459_v11 }
 0x327   : > { %v8490_v38 = vadd.f32 %v1915_v61, %v8450_v0  ;;  %v1917_v53 = vpop.f32.mrb[198].mxu1  ;;  %v6479_v40 = vpop.eup %6478  ;;  %v3082_v24 = vadd.f32 1.0, %v6477_v16  ;;  %4809 = vmatmul.mubr.bf16.gmra.mrb[56].mxu0 %v3458_v30  ;;  %v3330_v34 = vmul.f32 %v3074_v33, %v2306_v35 }
 0x328   : > { %v2340_v7 = vmul.f32 0.70710677, %v8486_v22  ;;  %v1919_v26 = vpop.f32.mrb[199].mxu1  ;;  %v3083_v60 = vadd.f32 1.0, %v6479_v40  ;;  %v8498_v17 = vadd.f32 %v1917_v53, %v8444_v36  ;;  %v3331_v39 = vmul.f32 %v3075_v13, %v2307_v8 }
 0x329   : > { %v2341_v25 = vmul.f32 0.70710677, %v8490_v38  ;;  %v3338_v50 = vmul.f32 %v3082_v24, %v2314_v45  ;;  %v8501_v19 = vadd.f32 %v1919_v26, %v8450_v0  ;;  %v2084_v53 = vmul.f32 0.5, %v8486_v22 }
 0x32a   : > { %6488 = verf.f32 %v2340_v7  ;;  %v3339_v48 = vmul.f32 %v3083_v60, %v2315_v55  ;;  %v2348_v4 = vmul.f32 0.70710677, %v8498_v17  ;;  %v2085_v7 = vmul.f32 0.5, %v8490_v38 }
 0x32b   : > { %6490 = verf.f32 %v2341_v25  ;;  %v2349_v20 = vmul.f32 0.70710677, %v8501_v19  ;;  %v3466_v5 = vpack.c.bf16 %v3338_v50, %v3330_v34  ;;  %v2092_v26 = vmul.f32 0.5, %v8498_v17 }
 0x32c   : > { %v6481_v41 = vpop.eup %6480  ;;  %6492 = verf.f32 %v2348_v4  ;;  %v3467_v3 = vpack.c.bf16 %v3339_v48, %v3331_v39  ;;  %v2093_v34 = vmul.f32 0.5, %v8501_v19 }
 0x32d   : > { %v6483_v12 = vpop.eup %6482  ;;  %v1923_v54 = vpop.f32.mrb[200].mxu1  ;;  %v2836_v58 = vadd.f32 1.0, %v6481_v41  ;;  %6494 = verf.f32 %v2349_v20 }
 0x32e   : > { %v8506_v47 = vadd.f32 %v1923_v54, %v8444_v36  ;;  %v1925_v9 = vpop.f32.mrb[201].mxu1  ;;  %v6485_v2 = vpop.eup %6484  ;;  %v2837_v51 = vadd.f32 1.0, %v6483_v12  ;;  %4818 = vmatprep.mubr.bf16.mxu0 %v3467_v3 }
 0x32f   : > { %v8510_v42 = vadd.f32 %v1925_v9, %v8450_v0  ;;  %v1927_v49 = vpop.f32.mrb[202].mxu1  ;;  %v6487_v23 = vpop.eup %6486  ;;  %v2844_v28 = vadd.f32 1.0, %v6485_v2  ;;  %4819 = vmatmul.mubr.bf16.gmra.mrb[60].mxu0 %v3466_v5  ;;  %v3092_v44 = vmul.f32 %v2836_v58, %v2068_v18 }
 0x330   : > { %v2356_v1 = vmul.f32 0.70710677, %v8506_v47  ;;  %v1929_v63 = vpop.f32.mrb[203].mxu1  ;;  %v2845_v31 = vadd.f32 1.0, %v6487_v23  ;;  %v8518_v29 = vadd.f32 %v1927_v49, %v8444_v36  ;;  %v3093_v46 = vmul.f32 %v2837_v51, %v2069_v52 }
 0x331   : > { %v2357_v62 = vmul.f32 0.70710677, %v8510_v42  ;;  %v3100_v10 = vmul.f32 %v2844_v28, %v2076_v43  ;;  %v8521_v15 = vadd.f32 %v1929_v63, %v8450_v0  ;;  %v2100_v49 = vmul.f32 0.5, %v8506_v47 }
 0x332   : > { %6496 = verf.f32 %v2356_v1  ;;  %v3101_v37 = vmul.f32 %v2845_v31, %v2077_v21  ;;  %v2364_v27 = vmul.f32 0.70710677, %v8518_v29  ;;  %v2101_v1 = vmul.f32 0.5, %v8510_v42 }
 0x333   : > { %6498 = verf.f32 %v2357_v62  ;;  %v3348_v14 = vpack.c.bf16 %v3100_v10, %v3092_v44  ;;  %v2365_v6 = vmul.f32 0.70710677, %v8521_v15  ;;  %v2108_v63 = vmul.f32 0.5, %v8518_v29 }
 0x334   : > { %v6489_v30 = vpop.eup %6488  ;;  %6500 = verf.f32 %v2364_v27  ;;  %v3349_v33 = vpack.c.bf16 %v3101_v37, %v3093_v46  ;;  %v2109_v44 = vmul.f32 0.5, %v8521_v15 }
 0x335   : > { %v6491_v59 = vpop.eup %6490  ;;  %v1933_v11 = vpop.f32.mrb[204].mxu1  ;;  %v2852_v61 = vadd.f32 1.0, %v6489_v30  ;;  %6502 = verf.f32 %v2365_v6 }
 0x336   : > { %v8526_v16 = vadd.f32 %v1933_v11, %v8444_v36  ;;  %v1935_v35 = vpop.f32.mrb[205].mxu1  ;;  %v6493_v13 = vpop.eup %6492  ;;  %v2853_v40 = vadd.f32 1.0, %v6491_v59  ;;  %4861 = vmatprep.mubr.bf16.mxu0 %v3349_v33 }
 0x337   : > { %v8530_v8 = vadd.f32 %v1935_v35, %v8450_v0  ;;  %v1937_v45 = vpop.f32.mrb[206].mxu1  ;;  %v6495_v24 = vpop.eup %6494  ;;  %v2860_v55 = vadd.f32 1.0, %v6493_v13  ;;  %4862 = vmatmul.mubr.bf16.vlgmr.msra.gmra.mrb[0].mxu0 %v3348_v14  ;;  %v3108_v48 = vmul.f32 %v2852_v61, %v2084_v53 }
 0x338   : > { %v2372_v60 = vmul.f32 0.70710677, %v8526_v16  ;;  %v1939_v25 = vpop.f32.mrb[207].mxu1  ;;  %v2861_v50 = vadd.f32 1.0, %v6495_v24  ;;  %v8538_v39 = vadd.f32 %v1937_v45, %v8444_v36  ;;  %v3109_v17 = vmul.f32 %v2853_v40, %v2085_v7 }
 0x339   : > { %v2373_v22 = vmul.f32 0.70710677, %v8530_v8  ;;  %v3116_v4 = vmul.f32 %v2860_v55, %v2092_v26  ;;  %v8541_v38 = vadd.f32 %v1939_v25, %v8450_v0  ;;  %v2116_v45 = vmul.f32 0.5, %v8526_v16 }
 0x33a   : > { %6504 = verf.f32 %v2372_v60  ;;  %v3117_v41 = vmul.f32 %v2861_v50, %v2093_v34  ;;  %v2380_v20 = vmul.f32 0.70710677, %v8538_v39  ;;  %v2117_v60 = vmul.f32 0.5, %v8530_v8 }
 0x33b   : > { %6506 = verf.f32 %v2373_v22  ;;  %v2381_v19 = vmul.f32 0.70710677, %v8541_v38  ;;  %v3356_v12 = vpack.c.bf16 %v3116_v4, %v3108_v48  ;;  %v2124_v25 = vmul.f32 0.5, %v8538_v39 }
 0x33c   : > { %v6497_v5 = vpop.eup %6496  ;;  %6508 = verf.f32 %v2380_v20  ;;  %v3357_v58 = vpack.c.bf16 %v3117_v41, %v3109_v17  ;;  %v2125_v48 = vmul.f32 0.5, %v8541_v38 }
 0x33d   : > { %v6499_v54 = vpop.eup %6498  ;;  %v1943_v3 = vpop.f32.mrb[208].mxu1  ;;  %v2868_v9 = vadd.f32 1.0, %v6497_v5  ;;  %6510 = verf.f32 %v2381_v19 }
 0x33e   : > { %v8546_v2 = vadd.f32 %v1943_v3, %v8444_v36  ;;  %v1945_v18 = vpop.f32.mrb[209].mxu1  ;;  %v6501_v51 = vpop.eup %6500  ;;  %v2869_v23 = vadd.f32 1.0, %v6499_v54  ;;  %4871 = vmatprep.mubr.bf16.mxu0 %v3357_v58 }
 0x33f   : > { %v8550_v52 = vadd.f32 %v1945_v18, %v8450_v0  ;;  %v1947_v43 = vpop.f32.mrb[210].mxu1  ;;  %v6503_v28 = vpop.eup %6502  ;;  %v2876_v21 = vadd.f32 1.0, %v6501_v51  ;;  %4872 = vmatmul.mubr.bf16.gmra.mrb[4].mxu0 %v3356_v12  ;;  %v3124_v37 = vmul.f32 %v2868_v9, %v2100_v49 }
 0x340   : > { %v2388_v31 = vmul.f32 0.70710677, %v8546_v2  ;;  %v1949_v62 = vpop.f32.mrb[211].mxu1  ;;  %v2877_v10 = vadd.f32 1.0, %v6503_v28  ;;  %v8558_v46 = vadd.f32 %v1947_v43, %v8444_v36  ;;  %v3125_v29 = vmul.f32 %v2869_v23, %v2101_v1 }
 0x341   : > { %v2389_v47 = vmul.f32 0.70710677, %v8550_v52  ;;  %v3132_v27 = vmul.f32 %v2876_v21, %v2108_v63  ;;  %v8561_v42 = vadd.f32 %v1949_v62, %v8450_v0  ;;  %v2132_v43 = vmul.f32 0.5, %v8546_v2 }
 0x342   : > { %6512 = verf.f32 %v2388_v31  ;;  %v3133_v30 = vmul.f32 %v2877_v10, %v2109_v44  ;;  %v2396_v14 = vmul.f32 0.70710677, %v8558_v46  ;;  %v2133_v31 = vmul.f32 0.5, %v8550_v52 }
 0x343   : > { %6514 = verf.f32 %v2389_v47  ;;  %v2397_v15 = vmul.f32 0.70710677, %v8561_v42  ;;  %v3364_v59 = vpack.c.bf16 %v3132_v27, %v3124_v37  ;;  %v2140_v62 = vmul.f32 0.5, %v8558_v46 }
 0x344   : > { %v6505_v6 = vpop.eup %6504  ;;  %6516 = verf.f32 %v2396_v14  ;;  %v3365_v61 = vpack.c.bf16 %v3133_v30, %v3125_v29  ;;  %v2141_v37 = vmul.f32 0.5, %v8561_v42 }
 0x345   : > { %v6507_v11 = vpop.eup %6506  ;;  %v1953_v33 = vpop.f32.mrb[212].mxu1  ;;  %v2884_v35 = vadd.f32 1.0, %v6505_v6  ;;  %6518 = verf.f32 %v2397_v15 }
 0x346   : > { %v8566_v13 = vadd.f32 %v1953_v33, %v8444_v36  ;;  %v1955_v53 = vpop.f32.mrb[213].mxu1  ;;  %v6509_v40 = vpop.eup %6508  ;;  %v2885_v24 = vadd.f32 1.0, %v6507_v11  ;;  %4881 = vmatprep.mubr.bf16.mxu0 %v3365_v61 }
 0x347   : > { %v8570_v7 = vadd.f32 %v1955_v53, %v8450_v0  ;;  %v1957_v26 = vpop.f32.mrb[214].mxu1  ;;  %v6511_v55 = vpop.eup %6510  ;;  %v2892_v34 = vadd.f32 1.0, %v6509_v40  ;;  %4882 = vmatmul.mubr.bf16.gmra.mrb[8].mxu0 %v3364_v59  ;;  %v3140_v41 = vmul.f32 %v2884_v35, %v2116_v45 }
 0x348   : > { %v2404_v50 = vmul.f32 0.70710677, %v8566_v13  ;;  %v1959_v22 = vpop.f32.mrb[215].mxu1  ;;  %v2893_v4 = vadd.f32 1.0, %v6511_v55  ;;  %v8578_v17 = vadd.f32 %v1957_v26, %v8444_v36  ;;  %v3141_v39 = vmul.f32 %v2885_v24, %v2117_v60 }
 0x349   : > { %v2405_v16 = vmul.f32 0.70710677, %v8570_v7  ;;  %v3148_v20 = vmul.f32 %v2892_v34, %v2124_v25  ;;  %v8581_v8 = vadd.f32 %v1959_v22, %v8450_v0  ;;  %v2148_v26 = vmul.f32 0.5, %v8566_v13 }
 0x34a   : > { %6520 = verf.f32 %v2404_v50  ;;  %v3149_v5 = vmul.f32 %v2893_v4, %v2125_v48  ;;  %v2412_v19 = vmul.f32 0.70710677, %v8578_v17  ;;  %v2149_v50 = vmul.f32 0.5, %v8570_v7 }
 0x34b   : > { %6522 = verf.f32 %v2405_v16  ;;  %v2413_v38 = vmul.f32 0.70710677, %v8581_v8  ;;  %v3372_v54 = vpack.c.bf16 %v3148_v20, %v3140_v41  ;;  %v2156_v22 = vmul.f32 0.5, %v8578_v17 }
 0x34c   : > { %v6513_v12 = vpop.eup %6512  ;;  %6524 = verf.f32 %v2412_v19  ;;  %v3373_v9 = vpack.c.bf16 %v3149_v5, %v3141_v39  ;;  %v2157_v41 = vmul.f32 0.5, %v8581_v8 }
 0x34d   : > { %v6515_v3 = vpop.eup %6514  ;;  %v1963_v58 = vpop.f32.mrb[216].mxu1  ;;  %v2900_v18 = vadd.f32 1.0, %v6513_v12  ;;  %6526 = verf.f32 %v2413_v38 }
 0x34e   : > { %v8586_v51 = vadd.f32 %v1963_v58, %v8444_v36  ;;  %v1965_v49 = vpop.f32.mrb[217].mxu1  ;;  %v6517_v23 = vpop.eup %6516  ;;  %v2901_v28 = vadd.f32 1.0, %v6515_v3  ;;  %4891 = vmatprep.mubr.bf16.mxu0 %v3373_v9 }
 0x34f   : > { %v8590_v1 = vadd.f32 %v1965_v49, %v8450_v0  ;;  %v1967_v63 = vpop.f32.mrb[218].mxu1  ;;  %v6519_v21 = vpop.eup %6518  ;;  %v2908_v44 = vadd.f32 1.0, %v6517_v23  ;;  %4892 = vmatmul.mubr.bf16.gmra.mrb[12].mxu0 %v3372_v54  ;;  %v3156_v30 = vmul.f32 %v2900_v18, %v2132_v43 }
 0x350   : > { %v2420_v10 = vmul.f32 0.70710677, %v8586_v51  ;;  %v1969_v47 = vpop.f32.mrb[219].mxu1  ;;  %v2909_v27 = vadd.f32 1.0, %v6519_v21  ;;  %v8598_v29 = vadd.f32 %v1967_v63, %v8444_v36  ;;  %v3157_v46 = vmul.f32 %v2901_v28, %v2133_v31 }
 0x351   : > { %v2421_v2 = vmul.f32 0.70710677, %v8590_v1  ;;  %v3164_v14 = vmul.f32 %v2908_v44, %v2140_v62  ;;  %v8601_v52 = vadd.f32 %v1969_v47, %v8450_v0  ;;  %v2164_v63 = vmul.f32 0.5, %v8586_v51 }
 0x352   : > { %6528 = verf.f32 %v2420_v10  ;;  %v3165_v6 = vmul.f32 %v2909_v27, %v2141_v37  ;;  %v2428_v15 = vmul.f32 0.70710677, %v8598_v29  ;;  %v2165_v10 = vmul.f32 0.5, %v8590_v1 }
 0x353   : > { %6530 = verf.f32 %v2421_v2  ;;  %v2429_v42 = vmul.f32 0.70710677, %v8601_v52  ;;  %v3380_v11 = vpack.c.bf16 %v3164_v14, %v3156_v30  ;;  %v2172_v47 = vmul.f32 0.5, %v8598_v29 }
 0x354   : > { %v6521_v59 = vpop.eup %6520  ;;  %6532 = verf.f32 %v2428_v15  ;;  %v3381_v35 = vpack.c.bf16 %v3165_v6, %v3157_v46  ;;  %v2173_v30 = vmul.f32 0.5, %v8601_v52 }
 0x355   : > { %v6523_v33 = vpop.eup %6522  ;;  %v1973_v61 = vpop.f32.mrb[220].mxu1  ;;  %v2916_v53 = vadd.f32 1.0, %v6521_v59  ;;  %6534 = verf.f32 %v2429_v42 }
 0x356   : > { %v8606_v40 = vadd.f32 %v1973_v61, %v8444_v36  ;;  %v1975_v45 = vpop.f32.mrb[221].mxu1  ;;  %v6525_v24 = vpop.eup %6524  ;;  %v2917_v55 = vadd.f32 1.0, %v6523_v33  ;;  %4901 = vmatprep.mubr.bf16.mxu0 %v3381_v35 }
 0x357   : > { %v8610_v60 = vadd.f32 %v1975_v45, %v8450_v0  ;;  %v1977_v25 = vpop.f32.mrb[222].mxu1  ;;  %v6527_v34 = vpop.eup %6526  ;;  %v2924_v48 = vadd.f32 1.0, %v6525_v24  ;;  %4902 = vmatmul.mubr.bf16.gmra.mrb[16].mxu0 %v3380_v11  ;;  %v3172_v5 = vmul.f32 %v2916_v53, %v2148_v26 }
 0x358   : > { %v2436_v4 = vmul.f32 0.70710677, %v8606_v40  ;;  %v1979_v16 = vpop.f32.mrb[223].mxu1  ;;  %v2925_v20 = vadd.f32 1.0, %v6527_v34  ;;  %v8618_v39 = vadd.f32 %v1977_v25, %v8444_v36  ;;  %v3173_v17 = vmul.f32 %v2917_v55, %v2149_v50 }
 0x359   : > { %v2437_v13 = vmul.f32 0.70710677, %v8610_v60  ;;  %v3180_v19 = vmul.f32 %v2924_v48, %v2156_v22  ;;  %v8621_v7 = vadd.f32 %v1979_v16, %v8450_v0  ;;  %v2180_v25 = vmul.f32 0.5, %v8606_v40 }
 0x35a   : > { %6536 = verf.f32 %v2436_v4  ;;  %v3181_v12 = vmul.f32 %v2925_v20, %v2157_v41  ;;  %v2444_v38 = vmul.f32 0.70710677, %v8618_v39  ;;  %v2181_v4 = vmul.f32 0.5, %v8610_v60 }
 0x35b   : > { %6538 = verf.f32 %v2437_v13  ;;  %v2445_v8 = vmul.f32 0.70710677, %v8621_v7  ;;  %v3388_v3 = vpack.c.bf16 %v3180_v19, %v3172_v5  ;;  %v2188_v16 = vmul.f32 0.5, %v8618_v39 }
 0x35c   : > { %v6529_v54 = vpop.eup %6528  ;;  %6540 = verf.f32 %v2444_v38  ;;  %v3389_v18 = vpack.c.bf16 %v3181_v12, %v3173_v17  ;;  %v2189_v5 = vmul.f32 0.5, %v8621_v7 }
 0x35d   : > { %v6531_v58 = vpop.eup %6530  ;;  %v1983_v9 = vpop.f32.mrb[224].mxu1  ;;  %v2932_v49 = vadd.f32 1.0, %v6529_v54  ;;  %6542 = verf.f32 %v2445_v8 }
 0x35e   : > { %v8626_v23 = vadd.f32 %v1983_v9, %v8444_v36  ;;  %v1985_v43 = vpop.f32.mrb[225].mxu1  ;;  %v6533_v28 = vpop.eup %6532  ;;  %v2933_v21 = vadd.f32 1.0, %v6531_v58  ;;  %4911 = vmatprep.mubr.bf16.mxu0 %v3389_v18 }
 0x35f   : > { %v8630_v31 = vadd.f32 %v1985_v43, %v8450_v0  ;;  %v1987_v62 = vpop.f32.mrb[226].mxu1  ;;  %v6535_v44 = vpop.eup %6534  ;;  %v2940_v37 = vadd.f32 1.0, %v6533_v28  ;;  %4912 = vmatmul.mubr.bf16.gmra.mrb[20].mxu0 %v3388_v3  ;;  %v3188_v6 = vmul.f32 %v2932_v49, %v2164_v63 }
 0x360   : > { %v2452_v27 = vmul.f32 0.70710677, %v8626_v23  ;;  %v1989_v2 = vpop.f32.mrb[227].mxu1  ;;  %v2941_v14 = vadd.f32 1.0, %v6535_v44  ;;  %v8638_v46 = vadd.f32 %v1987_v62, %v8444_v36  ;;  %v3189_v29 = vmul.f32 %v2933_v21, %v2165_v10 }
 0x361   : > { %v2453_v51 = vmul.f32 0.70710677, %v8630_v31  ;;  %v3196_v15 = vmul.f32 %v2940_v37, %v2172_v47  ;;  %v8641_v1 = vadd.f32 %v1989_v2, %v8450_v0  ;;  %v2196_v62 = vmul.f32 0.5, %v8626_v23 }
 0x362   : > { %6544 = verf.f32 %v2452_v27  ;;  %v3197_v59 = vmul.f32 %v2941_v14, %v2173_v30  ;;  %v2460_v42 = vmul.f32 0.70710677, %v8638_v46  ;;  %v2197_v27 = vmul.f32 0.5, %v8630_v31 }
 0x363   : > { %6546 = verf.f32 %v2453_v51  ;;  %v2461_v52 = vmul.f32 0.70710677, %v8641_v1  ;;  %v3396_v33 = vpack.c.bf16 %v3196_v15, %v3188_v6  ;;  %v2204_v2 = vmul.f32 0.5, %v8638_v46 }
 0x364   : > { %v6537_v11 = vpop.eup %6536  ;;  %6548 = verf.f32 %v2460_v42  ;;  %v3397_v53 = vpack.c.bf16 %v3197_v59, %v3189_v29  ;;  %v2205_v6 = vmul.f32 0.5, %v8641_v1 }
 0x365   : > { %v6539_v61 = vpop.eup %6538  ;;  %v1993_v35 = vpop.f32.mrb[228].mxu1  ;;  %v2948_v45 = vadd.f32 1.0, %v6537_v11  ;;  %6550 = verf.f32 %v2461_v52 }
 0x366   : > { %v8646_v24 = vadd.f32 %v1993_v35, %v8444_v36  ;;  %v1995_v26 = vpop.f32.mrb[229].mxu1  ;;  %v6541_v55 = vpop.eup %6540  ;;  %v2949_v34 = vadd.f32 1.0, %v6539_v61  ;;  %4921 = vmatprep.mubr.bf16.mxu0 %v3397_v53 }
 0x367   : > { %v8650_v50 = vadd.f32 %v1995_v26, %v8450_v0  ;;  %v1997_v22 = vpop.f32.mrb[230].mxu1  ;;  %v6543_v48 = vpop.eup %6542  ;;  %v2956_v41 = vadd.f32 1.0, %v6541_v55  ;;  %4922 = vmatmul.mubr.bf16.gmra.mrb[24].mxu0 %v3396_v33  ;;  %v3204_v12 = vmul.f32 %v2948_v45, %v2180_v25 }
 0x368   : > { %v2468_v20 = vmul.f32 0.70710677, %v8646_v24  ;;  %v1999_v13 = vpop.f32.mrb[231].mxu1  ;;  %v2957_v19 = vadd.f32 1.0, %v6543_v48  ;;  %v8658_v17 = vadd.f32 %v1997_v22, %v8444_v36  ;;  %v3205_v39 = vmul.f32 %v2949_v34, %v2181_v4 }
 0x369   : > { %v2469_v40 = vmul.f32 0.70710677, %v8650_v50  ;;  %v3212_v38 = vmul.f32 %v2956_v41, %v2188_v16  ;;  %v8661_v60 = vadd.f32 %v1999_v13, %v8450_v0  ;;  %v2212_v22 = vmul.f32 0.5, %v8646_v24 }
 0x36a   : > { %6552 = verf.f32 %v2468_v20  ;;  %v3213_v54 = vmul.f32 %v2957_v19, %v2189_v5  ;;  %v2476_v8 = vmul.f32 0.70710677, %v8658_v17  ;;  %v2213_v20 = vmul.f32 0.5, %v8650_v50 }
 0x36b   : > { %6554 = verf.f32 %v2469_v40  ;;  %v2477_v7 = vmul.f32 0.70710677, %v8661_v60  ;;  %v3404_v58 = vpack.c.bf16 %v3212_v38, %v3204_v12  ;;  %v2220_v13 = vmul.f32 0.5, %v8658_v17 }
 0x36c   : > { %v6545_v3 = vpop.eup %6544  ;;  %6556 = verf.f32 %v2476_v8  ;;  %v3405_v49 = vpack.c.bf16 %v3213_v54, %v3205_v39  ;;  %v2221_v12 = vmul.f32 0.5, %v8661_v60 }
 0x36d   : > { %v6547_v9 = vpop.eup %6546  ;;  %v2003_v18 = vpop.f32.mrb[232].mxu1  ;;  %v2964_v43 = vadd.f32 1.0, %v6545_v3  ;;  %6558 = verf.f32 %v2477_v7 }
 0x36e   : > { %v8666_v28 = vadd.f32 %v2003_v18, %v8444_v36  ;;  %v2005_v63 = vpop.f32.mrb[233].mxu1  ;;  %v6549_v21 = vpop.eup %6548  ;;  %v2965_v44 = vadd.f32 1.0, %v6547_v9  ;;  %4931 = vmatprep.mubr.bf16.mxu0 %v3405_v49 }
 0x36f   : > { %v8670_v10 = vadd.f32 %v2005_v63, %v8450_v0  ;;  %v2007_v47 = vpop.f32.mrb[234].mxu1  ;;  %v6551_v37 = vpop.eup %6550  ;;  %v2972_v30 = vadd.f32 1.0, %v6549_v21  ;;  %4932 = vmatmul.mubr.bf16.gmra.mrb[28].mxu0 %v3404_v58  ;;  %v3220_v59 = vmul.f32 %v2964_v43, %v2196_v62 }
 0x370   : > { %v2484_v14 = vmul.f32 0.70710677, %v8666_v28  ;;  %v2009_v51 = vpop.f32.mrb[235].mxu1  ;;  %v2973_v15 = vadd.f32 1.0, %v6551_v37  ;;  %v8678_v29 = vadd.f32 %v2007_v47, %v8444_v36  ;;  %v3221_v46 = vmul.f32 %v2965_v44, %v2197_v27 }
 0x371   : > { %v2485_v23 = vmul.f32 0.70710677, %v8670_v10  ;;  %v3228_v42 = vmul.f32 %v2972_v30, %v2204_v2  ;;  %v8681_v31 = vadd.f32 %v2009_v51, %v8450_v0  ;;  %v2228_v47 = vmul.f32 0.5, %v8666_v28 }
 0x372   : > { %6560 = verf.f32 %v2484_v14  ;;  %v3229_v11 = vmul.f32 %v2973_v15, %v2205_v6  ;;  %v2492_v52 = vmul.f32 0.70710677, %v8678_v29  ;;  %v2229_v14 = vmul.f32 0.5, %v8670_v10 }
 0x373   : > { %6562 = verf.f32 %v2485_v23  ;;  %v2493_v1 = vmul.f32 0.70710677, %v8681_v31  ;;  %v3412_v61 = vpack.c.bf16 %v3228_v42, %v3220_v59  ;;  %v2236_v51 = vmul.f32 0.5, %v8678_v29 }
 0x374   : > { %v6553_v33 = vpop.eup %6552  ;;  %6564 = verf.f32 %v2492_v52  ;;  %v3413_v45 = vpack.c.bf16 %v3229_v11, %v3221_v46  ;;  %v2237_v59 = vmul.f32 0.5, %v8681_v31 }
 0x375   : > { %v6555_v35 = vpop.eup %6554  ;;  %v2013_v53 = vpop.f32.mrb[236].mxu1  ;;  %v2980_v26 = vadd.f32 1.0, %v6553_v33  ;;  %6566 = verf.f32 %v2493_v1 }
 0x376   : > { %v8686_v55 = vadd.f32 %v2013_v53, %v8444_v36  ;;  %v2015_v25 = vpop.f32.mrb[237].mxu1  ;;  %v6557_v34 = vpop.eup %6556  ;;  %v2981_v48 = vadd.f32 1.0, %v6555_v35  ;;  %4941 = vmatprep.mubr.bf16.mxu0 %v3413_v45 }
 0x377   : > { %v8690_v4 = vadd.f32 %v2015_v25, %v8450_v0  ;;  %v2017_v16 = vpop.f32.mrb[238].mxu1  ;;  %v6559_v41 = vpop.eup %6558  ;;  %v2988_v5 = vadd.f32 1.0, %v6557_v34  ;;  %4942 = vmatmul.mubr.bf16.gmra.mrb[32].mxu0 %v3412_v61  ;;  %v3236_v54 = vmul.f32 %v2980_v26, %v2212_v22 }
 0x378   : > { %v2500_v19 = vmul.f32 0.70710677, %v8686_v55  ;;  %v2019_v40 = vpop.f32.mrb[239].mxu1  ;;  %v2989_v38 = vadd.f32 1.0, %v6559_v41  ;;  %v8698_v39 = vadd.f32 %v2017_v16, %v8444_v36  ;;  %v3237_v17 = vmul.f32 %v2981_v48, %v2213_v20 }
 0x379   : > { %v2501_v24 = vmul.f32 0.70710677, %v8690_v4  ;;  %v3244_v8 = vmul.f32 %v2988_v5, %v2220_v13  ;;  %v8701_v50 = vadd.f32 %v2019_v40, %v8450_v0  ;;  %v2244_v16 = vmul.f32 0.5, %v8686_v55 }
 0x37a   : > { %6568 = verf.f32 %v2500_v19  ;;  %v3245_v3 = vmul.f32 %v2989_v38, %v2221_v12  ;;  %v2508_v7 = vmul.f32 0.70710677, %v8698_v39  ;;  %v2245_v19 = vmul.f32 0.5, %v8690_v4 }
 0x37b   : > { %6570 = verf.f32 %v2501_v24  ;;  %v2509_v60 = vmul.f32 0.70710677, %v8701_v50  ;;  %v3420_v9 = vpack.c.bf16 %v3244_v8, %v3236_v54  ;;  %v2252_v40 = vmul.f32 0.5, %v8698_v39 }
 0x37c   : > { %v6561_v58 = vpop.eup %6560  ;;  %6572 = verf.f32 %v2508_v7  ;;  %v3421_v43 = vpack.c.bf16 %v3245_v3, %v3237_v17  ;;  %v2253_v54 = vmul.f32 0.5, %v8701_v50 }
 0x37d   : > { %v6563_v18 = vpop.eup %6562  ;;  %v2023_v49 = vpop.f32.mrb[240].mxu1  ;;  %v2996_v63 = vadd.f32 1.0, %v6561_v58  ;;  %6574 = verf.f32 %v2509_v60 }
 0x37e   : > { %v8706_v21 = vadd.f32 %v2023_v49, %v8444_v36  ;;  %v2025_v62 = vpop.f32.mrb[241].mxu1  ;;  %v6565_v44 = vpop.eup %6564  ;;  %v2997_v37 = vadd.f32 1.0, %v6563_v18  ;;  %4951 = vmatprep.mubr.bf16.mxu0 %v3421_v43 }
 0x37f   : > { %v8710_v27 = vadd.f32 %v2025_v62, %v8450_v0  ;;  %v2027_v2 = vpop.f32.mrb[242].mxu1  ;;  %v6567_v30 = vpop.eup %6566  ;;  %v3004_v6 = vadd.f32 1.0, %v6565_v44  ;;  %4952 = vmatmul.mubr.bf16.gmra.mrb[36].mxu0 %v3420_v9  ;;  %v3252_v11 = vmul.f32 %v2996_v63, %v2228_v47 }
 0x380   : > { %v2516_v15 = vmul.f32 0.70710677, %v8706_v21  ;;  %v2029_v23 = vpop.f32.mrb[243].mxu1  ;;  %v3005_v42 = vadd.f32 1.0, %v6567_v30  ;;  %v8718_v46 = vadd.f32 %v2027_v2, %v8444_v36  ;;  %v3253_v29 = vmul.f32 %v2997_v37, %v2229_v14 }
 0x381   : > { %v2517_v28 = vmul.f32 0.70710677, %v8710_v27  ;;  %v3260_v52 = vmul.f32 %v3004_v6, %v2236_v51  ;;  %v8721_v10 = vadd.f32 %v2029_v23, %v8450_v0  ;;  %v2260_v2 = vmul.f32 0.5, %v8706_v21 }
 0x382   : > { %6576 = verf.f32 %v2516_v15  ;;  %v3261_v33 = vmul.f32 %v3005_v42, %v2237_v59  ;;  %v2524_v1 = vmul.f32 0.70710677, %v8718_v46  ;;  %v2261_v15 = vmul.f32 0.5, %v8710_v27 }
 0x383   : > { %6578 = verf.f32 %v2517_v28  ;;  %v2525_v31 = vmul.f32 0.70710677, %v8721_v10  ;;  %v3428_v35 = vpack.c.bf16 %v3260_v52, %v3252_v11  ;;  %v2268_v23 = vmul.f32 0.5, %v8718_v46 }
 0x384   : > { %v6569_v61 = vpop.eup %6568  ;;  %6580 = verf.f32 %v2524_v1  ;;  %v3429_v26 = vpack.c.bf16 %v3261_v33, %v3253_v29  ;;  %v2269_v11 = vmul.f32 0.5, %v8721_v10 }
 0x385   : > { %v6571_v53 = vpop.eup %6570  ;;  %v2033_v45 = vpop.f32.mrb[244].mxu1  ;;  %v3012_v25 = vadd.f32 1.0, %v6569_v61  ;;  %6582 = verf.f32 %v2525_v31 }
 0x386   : > { %v8726_v34 = vadd.f32 %v2033_v45, %v8444_v36  ;;  %v2035_v22 = vpop.f32.mrb[245].mxu1  ;;  %v6573_v48 = vpop.eup %6572  ;;  %v3013_v41 = vadd.f32 1.0, %v6571_v53  ;;  %4961 = vmatprep.mubr.bf16.mxu0 %v3429_v26 }
 0x387   : > { %v8730_v20 = vadd.f32 %v2035_v22, %v8450_v0  ;;  %v2037_v13 = vpop.f32.mrb[246].mxu1  ;;  %v6575_v5 = vpop.eup %6574  ;;  %v3020_v12 = vadd.f32 1.0, %v6573_v48  ;;  %4962 = vmatmul.mubr.bf16.gmra.mrb[40].mxu0 %v3428_v35  ;;  %v3268_v3 = vmul.f32 %v3012_v25, %v2244_v16 }
 0x388   : > { %v2532_v38 = vmul.f32 0.70710677, %v8726_v34  ;;  %v2039_v24 = vpop.f32.mrb[247].mxu1  ;;  %v3021_v8 = vadd.f32 1.0, %v6575_v5  ;;  %v8738_v17 = vadd.f32 %v2037_v13, %v8444_v36  ;;  %v3269_v39 = vmul.f32 %v3013_v41, %v2245_v19 }
 0x389   : > { %v2533_v55 = vmul.f32 0.70710677, %v8730_v20  ;;  %v3276_v7 = vmul.f32 %v3020_v12, %v2252_v40  ;;  %v8741_v4 = vadd.f32 %v2039_v24, %v8450_v0  ;;  %v2276_v13 = vmul.f32 0.5, %v8726_v34 }
 0x38a   : > { %6584 = verf.f32 %v2532_v38  ;;  %v3277_v58 = vmul.f32 %v3021_v8, %v2253_v54  ;;  %v2540_v60 = vmul.f32 0.70710677, %v8738_v17  ;;  %v2277_v38 = vmul.f32 0.5, %v8730_v20 }
 0x38b   : > { %6586 = verf.f32 %v2533_v55  ;;  %v2541_v50 = vmul.f32 0.70710677, %v8741_v4  ;;  %v3436_v18 = vpack.c.bf16 %v3276_v7, %v3268_v3  ;;  %v2284_v24 = vmul.f32 0.5, %v8738_v17 }
 0x38c   : > { %v6577_v9 = vpop.eup %6576  ;;  %6588 = verf.f32 %v2540_v60  ;;  %v3437_v63 = vpack.c.bf16 %v3277_v58, %v3269_v39  ;;  %v2285_v3 = vmul.f32 0.5, %v8741_v4 }
 0x38d   : > { %v6579_v49 = vpop.eup %6578  ;;  %v2043_v43 = vpop.f32.mrb[248].mxu1  ;;  %v3028_v62 = vadd.f32 1.0, %v6577_v9  ;;  %6590 = verf.f32 %v2541_v50 }
 0x38e   : > { %v8746_v44 = vadd.f32 %v2043_v43, %v8444_v36  ;;  %v2045_v47 = vpop.f32.mrb[249].mxu1  ;;  %v6581_v37 = vpop.eup %6580  ;;  %v3029_v30 = vadd.f32 1.0, %v6579_v49  ;;  %4971 = vmatprep.mubr.bf16.mxu0 %v3437_v63 }
 0x38f   : > { %v8750_v14 = vadd.f32 %v2045_v47, %v8450_v0  ;;  %v2047_v51 = vpop.f32.mrb[250].mxu1  ;;  %v6583_v6 = vpop.eup %6582  ;;  %v3036_v59 = vadd.f32 1.0, %v6581_v37  ;;  %4972 = vmatmul.mubr.bf16.gmra.mrb[44].mxu0 %v3436_v18  ;;  %v3284_v33 = vmul.f32 %v3028_v62, %v2260_v2 }
 0x390   : > { %v2548_v42 = vmul.f32 0.70710677, %v8746_v44  ;;  %v2049_v28 = vpop.f32.mrb[251].mxu1  ;;  %v3037_v52 = vadd.f32 1.0, %v6583_v6  ;;  %v2048_v29 = vadd.f32 %v2047_v51, %v8444_v36  ;;  %v3285_v27 = vmul.f32 %v3029_v30, %v2261_v15 }
 0x391   : > { %v2549_v21 = vmul.f32 0.70710677, %v8750_v14  ;;  %v3292_v1 = vmul.f32 %v3036_v59, %v2268_v23  ;;  %v2050_v61 = vadd.f32 %v2049_v28, %v8450_v0  ;;  %v2292_v2 = vmul.f32 0.5, %v8746_v44 }
 0x392   : > { %6592 = verf.f32 %v2548_v42  ;;  %v3293_v31 = vmul.f32 %v3037_v52, %v2269_v11  ;;  %v2556_v46 = vmul.f32 0.70710677, %v2048_v29  ;;  %v2300_v30 = vmul.f32 0.5, %v2048_v29 }
 0x393   : > { %6594 = verf.f32 %v2549_v21  ;;  %v2557_v53 = vmul.f32 0.70710677, %v2050_v61  ;;  %v3444_v45 = vpack.c.bf16 %v3292_v1, %v3284_v33  ;;  %v2293_v51 = vmul.f32 0.5, %v8750_v14 }
 0x394   : > { %v6585_v35 = vpop.eup %6584  ;;  %6596 = verf.f32 %v2556_v46  ;;  %v3445_v25 = vpack.c.bf16 %v3293_v31, %v3285_v27  ;;  %v2301_v6 = vmul.f32 0.5, %v2050_v61 }
 0x395   : > { %v6587_v26 = vpop.eup %6586  ;;  %v2053_v10 = vpop.f32.mrb[252].mxu1  ;;  %v3044_v22 = vadd.f32 1.0, %v6585_v35  ;;  %6598 = verf.f32 %v2557_v53 }
 0x396   : > { %v2054_v48 = vadd.f32 %v2053_v10, %v8444_v36  ;;  %v2055_v16 = vpop.f32.mrb[253].mxu1  ;;  %v6589_v41 = vpop.eup %6588  ;;  %v3045_v5 = vadd.f32 1.0, %v6587_v26  ;;  %4981 = vmatprep.mubr.bf16.mxu0 %v3445_v25 }
 0x397   : > { %v2056_v19 = vadd.f32 %v2055_v16, %v8450_v0  ;;  %v2057_v40 = vpop.f32.mrb[254].mxu1  ;;  %v6591_v12 = vpop.eup %6590  ;;  %v3052_v54 = vadd.f32 1.0, %v6589_v41  ;;  %4982 = vmatmul.mubr.bf16.gmra.mrb[48].mxu0 %v3444_v45  ;;  %v3300_v58 = vmul.f32 %v3044_v22, %v2276_v13  ;;  %v3598_v41 = vld [vmem:[%s8966_s4] sm:$0x3] }
 0x398   : > { %v2564_v8 = vmul.f32 0.70710677, %v2054_v48  ;;  %v2059_v55 = vpop.f32.mrb[255].mxu1  ;;  %v3053_v7 = vadd.f32 1.0, %v6591_v12  ;;  %v2058_v34 = vadd.f32 %v2057_v40, %v8444_v36  ;;  %v3301_v50 = vmul.f32 %v3045_v5, %v2277_v38 }
 0x399   : > { %v2565_v39 = vmul.f32 0.70710677, %v2056_v19  ;;  %v3308_v60 = vmul.f32 %v3052_v54, %v2284_v24  ;;  %v2060_v9 = vadd.f32 %v2059_v55, %v8450_v0  ;;  %v2308_v29 = vmul.f32 0.5, %v2054_v48 }
 0x39a   : > { %6600 = verf.f32 %v2564_v8  ;;  %v3309_v18 = vmul.f32 %v3053_v7, %v2285_v3  ;;  %v2572_v20 = vmul.f32 0.70710677, %v2058_v34  ;;  %v2316_v46 = vmul.f32 0.5, %v2058_v34 }
 0x39b   : > { %6602 = verf.f32 %v2565_v39  ;;  %v2573_v49 = vmul.f32 0.70710677, %v2060_v9  ;;  %v3452_v43 = vpack.c.bf16 %v3308_v60, %v3300_v58  ;;  %v2309_v14 = vmul.f32 0.5, %v2056_v19 }
 0x39c   : > { %v6593_v17 = vpop.eup %6592  ;;  %6604 = verf.f32 %v2572_v20  ;;  %v3453_v62 = vpack.c.bf16 %v3309_v18, %v3301_v50  ;;  %v2317_v61 = vmul.f32 0.5, %v2060_v9  ;;  %v8775_v48 = vrot.slane %v3598_v41, %v452_v32 }
 0x39d   : > { %v6595_v63 = vpop.eup %6594  ;;  %v3060_v4 = vadd.f32 1.0, %v6593_v17  ;;  %6606 = verf.f32 %v2573_v49  ;;  %v8779_v13 = vrot.slane %v3598_v41, %v456_v57 }
 0x39e   : > { %v6597_v47 = vpop.eup %6596  ;;  %v3061_v37 = vadd.f32 1.0, %v6595_v63  ;;  %4991 = vmatprep.mubr.bf16.mxu0 %v3453_v62 }
 0x39f   : > { %v6599_v36 = vpop.eup %6598  ;;  %v3068_v0 = vadd.f32 1.0, %v6597_v47  ;;  %4992 = vmatmul.mubr.bf16.gmra.mrb[52].mxu0 %v3452_v43  ;;  %v3316_v23 = vmul.f32 %v3060_v4, %v2292_v2 }
 0x3a0   : > { %v3069_v15 = vadd.f32 1.0, %v6599_v36  ;;  %v3317_v42 = vmul.f32 %v3061_v37, %v2293_v51 }
 0x3a1   : > { %v3324_v59 = vmul.f32 %v3068_v0, %v2300_v30 }
 0x3a2   : > { %v3325_v28 = vmul.f32 %v3069_v15, %v2301_v6 }
 0x3a3   : > { %v3460_v52 = vpack.c.bf16 %v3324_v59, %v3316_v23 }
 0x3a4   : > { %v6601_v11 = vpop.eup %6600  ;;  %v3461_v33 = vpack.c.bf16 %v3325_v28, %v3317_v42 }
 0x3a5   : > { %v6603_v21 = vpop.eup %6602  ;;  %v3076_v1 = vadd.f32 1.0, %v6601_v11 }
 0x3a6   : > { %v6605_v27 = vpop.eup %6604  ;;  %v3077_v31 = vadd.f32 1.0, %v6603_v21  ;;  %5001 = vmatprep.mubr.bf16.mxu0 %v3461_v33 }
 0x3a7   : > { %v6607_v44 = vpop.eup %6606  ;;  %v3084_v35 = vadd.f32 1.0, %v6605_v27  ;;  %5002 = vmatmul.mubr.bf16.gmra.mrb[56].mxu0 %v3460_v52  ;;  %v3332_v45 = vmul.f32 %v3076_v1, %v2308_v29 }
 0x3a8   : > { %v3085_v53 = vadd.f32 1.0, %v6607_v44  ;;  %v3333_v10 = vmul.f32 %v3077_v31, %v2309_v14 }
 0x3a9   : > { %v3340_v26 = vmul.f32 %v3084_v35, %v2316_v46 }
 0x3aa   : > { %v3341_v25 = vmul.f32 %v3085_v53, %v2317_v61 }
 0x3ab   : > { %v3468_v22 = vpack.c.bf16 %v3340_v26, %v3332_v45 }
 0x3ac   : > { %v3469_v16 = vpack.c.bf16 %v3341_v25, %v3333_v10 }
 0x3ae   : > { %5011 = vmatprep.mubr.bf16.mxu0 %v3469_v16 }
 0x3af   : > { %5012 = vmatmul.mubr.bf16.gmra.mrb[60].mxu0 %v3468_v22 }
 0x40a   : > { %v4863_v5 = vpop.f32.mrb[0].mxu0 }
 0x40b   : > { %v5517_v19 = vadd.f32 %v4863_v5, %v8775_v48  ;;  %v4865_v40 = vpop.f32.mrb[1].mxu0 }
 0x40c   : > { %v5518_v12 = vadd.f32 %v4865_v40, %v8779_v13  ;;  %v4867_v38 = vpop.f32.mrb[2].mxu0 }
 0x40d   : > { %5022 = vst [vmem:[%s8783_s14] sm:$0xff] %v5517_v19  ;;  %v5519_v56 = vadd.f32 %v4867_v38, %v8775_v48  ;;  %v4869_v32 = vpop.f32.mrb[3].mxu0 }
 0x40e   : > { %5023 = vst [vmem:[%s8783_s14 + $0x8] sm:$0xff] %v5518_v12  ;;  %v5520_v57 = vadd.f32 %v4869_v32, %v8779_v13 }
 0x40f   : > { %5024 = vst [vmem:[%s8783_s14 + $0x10] sm:$0xff] %v5519_v56 }
 0x410   : > { %5025 = vst [vmem:[%s8783_s14 + $0x18] sm:$0xff] %v5520_v57 }
 0x412   : > { %v4873_v24 = vpop.f32.mrb[4].mxu0 }
 0x413   : > { %v5521_v54 = vadd.f32 %v4873_v24, %v8775_v48  ;;  %v4875_v8 = vpop.f32.mrb[5].mxu0 }
 0x414   : > { %v5522_v55 = vadd.f32 %v4875_v8, %v8779_v13  ;;  %v4877_v3 = vpop.f32.mrb[6].mxu0 }
 0x415   : > { %5026 = vst [vmem:[%s8783_s14 + $0x20] sm:$0xff] %v5521_v54  ;;  %v5523_v7 = vadd.f32 %v4877_v3, %v8775_v48  ;;  %v4879_v39 = vpop.f32.mrb[7].mxu0 }
 0x416   : > { %5027 = vst [vmem:[%s8783_s14 + $0x28] sm:$0xff] %v5522_v55  ;;  %v5524_v34 = vadd.f32 %v4879_v39, %v8779_v13 }
 0x417   : > { %5028 = vst [vmem:[%s8783_s14 + $0x30] sm:$0xff] %v5523_v7 }
 0x418   : > { %5029 = vst [vmem:[%s8783_s14 + $0x38] sm:$0xff] %v5524_v34 }
 0x41a   : > { %v4883_v58 = vpop.f32.mrb[8].mxu0 }
 0x41b   : > { %v5525_v60 = vadd.f32 %v4883_v58, %v8775_v48  ;;  %v4885_v9 = vpop.f32.mrb[9].mxu0 }
 0x41c   : > { %v5526_v50 = vadd.f32 %v4885_v9, %v8779_v13  ;;  %v4887_v18 = vpop.f32.mrb[10].mxu0 }
 0x41d   : > { %5030 = vst [vmem:[%s8783_s14 + $0x40] sm:$0xff] %v5525_v60  ;;  %v5527_v20 = vadd.f32 %v4887_v18, %v8775_v48  ;;  %v4889_v17 = vpop.f32.mrb[11].mxu0 }
 0x41e   : > { %5031 = vst [vmem:[%s8783_s14 + $0x48] sm:$0xff] %v5526_v50  ;;  %v5528_v49 = vadd.f32 %v4889_v17, %v8779_v13 }
 0x41f   : > { %5032 = vst [vmem:[%s8783_s14 + $0x50] sm:$0xff] %v5527_v20 }
 0x420   : > { %5033 = vst [vmem:[%s8783_s14 + $0x58] sm:$0xff] %v5528_v49 }
 0x422   : > { %v4893_v43 = vpop.f32.mrb[12].mxu0 }
 0x423   : > { %v5529_v63 = vadd.f32 %v4893_v43, %v8775_v48  ;;  %v4895_v62 = vpop.f32.mrb[13].mxu0 }
 0x424   : > { %v5530_v4 = vadd.f32 %v4895_v62, %v8779_v13  ;;  %v4897_v47 = vpop.f32.mrb[14].mxu0 }
 0x425   : > { %5034 = vst [vmem:[%s8783_s14 + $0x60] sm:$0xff] %v5529_v63  ;;  %v5531_v37 = vadd.f32 %v4897_v47, %v8775_v48  ;;  %v4899_v36 = vpop.f32.mrb[15].mxu0 }
 0x426   : > { %5035 = vst [vmem:[%s8783_s14 + $0x68] sm:$0xff] %v5530_v4  ;;  %v5532_v2 = vadd.f32 %v4899_v36, %v8779_v13 }
 0x427   : > { %5036 = vst [vmem:[%s8783_s14 + $0x70] sm:$0xff] %v5531_v37 }
 0x428   : > { %5037 = vst [vmem:[%s8783_s14 + $0x78] sm:$0xff] %v5532_v2 }
 0x42a   : > { %v4903_v30 = vpop.f32.mrb[16].mxu0 }
 0x42b   : > { %v5533_v0 = vadd.f32 %v4903_v30, %v8775_v48  ;;  %v4905_v51 = vpop.f32.mrb[17].mxu0 }
 0x42c   : > { %v5534_v6 = vadd.f32 %v4905_v51, %v8779_v13  ;;  %v4907_v15 = vpop.f32.mrb[18].mxu0 }
 0x42d   : > { %5038 = vst [vmem:[%s8783_s14 + $0x80] sm:$0xff] %v5533_v0  ;;  %v5535_v23 = vadd.f32 %v4907_v15, %v8775_v48  ;;  %v4909_v59 = vpop.f32.mrb[19].mxu0 }
 0x42e   : > { %5039 = vst [vmem:[%s8783_s14 + $0x88] sm:$0xff] %v5534_v6  ;;  %v5536_v42 = vadd.f32 %v4909_v59, %v8779_v13 }
 0x42f   : > { %5040 = vst [vmem:[%s8783_s14 + $0x90] sm:$0xff] %v5535_v23 }
 0x430   : > { %5041 = vst [vmem:[%s8783_s14 + $0x98] sm:$0xff] %v5536_v42 }
 0x432   : > { %v4913_v28 = vpop.f32.mrb[20].mxu0 }
 0x433   : > { %v5537_v11 = vadd.f32 %v4913_v28, %v8775_v48  ;;  %v4915_v52 = vpop.f32.mrb[21].mxu0 }
 0x434   : > { %v5538_v21 = vadd.f32 %v4915_v52, %v8779_v13  ;;  %v4917_v33 = vpop.f32.mrb[22].mxu0 }
 0x435   : > { %5042 = vst [vmem:[%s8783_s14 + $0xa0] sm:$0xff] %v5537_v11  ;;  %v5539_v1 = vadd.f32 %v4917_v33, %v8775_v48  ;;  %v4919_v27 = vpop.f32.mrb[23].mxu0 }
 0x436   : > { %5043 = vst [vmem:[%s8783_s14 + $0xa8] sm:$0xff] %v5538_v21  ;;  %v5540_v31 = vadd.f32 %v4919_v27, %v8779_v13 }
 0x437   : > { %5044 = vst [vmem:[%s8783_s14 + $0xb0] sm:$0xff] %v5539_v1 }
 0x438   : > { %5045 = vst [vmem:[%s8783_s14 + $0xb8] sm:$0xff] %v5540_v31 }
 0x43a   : > { %v4923_v44 = vpop.f32.mrb[24].mxu0 }
 0x43b   : > { %v5541_v29 = vadd.f32 %v4923_v44, %v8775_v48  ;;  %v4925_v46 = vpop.f32.mrb[25].mxu0 }
 0x43c   : > { %v5542_v35 = vadd.f32 %v4925_v46, %v8779_v13  ;;  %v4927_v14 = vpop.f32.mrb[26].mxu0 }
 0x43d   : > { %5046 = vst [vmem:[%s8783_s14 + $0xc0] sm:$0xff] %v5541_v29  ;;  %v5543_v61 = vadd.f32 %v4927_v14, %v8775_v48  ;;  %v4929_v53 = vpop.f32.mrb[27].mxu0 }
 0x43e   : > { %5047 = vst [vmem:[%s8783_s14 + $0xc8] sm:$0xff] %v5542_v35  ;;  %v5544_v45 = vadd.f32 %v4929_v53, %v8779_v13 }
 0x43f   : > { %5048 = vst [vmem:[%s8783_s14 + $0xd0] sm:$0xff] %v5543_v61 }
 0x440   : > { %5049 = vst [vmem:[%s8783_s14 + $0xd8] sm:$0xff] %v5544_v45 }
 0x442   : > { %v4933_v26 = vpop.f32.mrb[28].mxu0 }
 0x443   : > { %v5545_v10 = vadd.f32 %v4933_v26, %v8775_v48  ;;  %v4935_v25 = vpop.f32.mrb[29].mxu0 }
 0x444   : > { %v5546_v22 = vadd.f32 %v4935_v25, %v8779_v13  ;;  %v4937_v16 = vpop.f32.mrb[30].mxu0 }
 0x445   : > { %5050 = vst [vmem:[%s8783_s14 + $0xe0] sm:$0xff] %v5545_v10  ;;  %v5547_v41 = vadd.f32 %v4937_v16, %v8775_v48  ;;  %v4939_v5 = vpop.f32.mrb[31].mxu0 }
 0x446   : > { %5051 = vst [vmem:[%s8783_s14 + $0xe8] sm:$0xff] %v5546_v22  ;;  %v5548_v19 = vadd.f32 %v4939_v5, %v8779_v13 }
 0x447   : > { %5052 = vst [vmem:[%s8783_s14 + $0xf0] sm:$0xff] %v5547_v41 }
 0x448   : > { %5053 = vst [vmem:[%s8783_s14 + $0xf8] sm:$0xff] %v5548_v19 }
 0x44a   : > { %v4943_v40 = vpop.f32.mrb[32].mxu0 }
 0x44b   : > { %v5549_v12 = vadd.f32 %v4943_v40, %v8775_v48  ;;  %v4945_v38 = vpop.f32.mrb[33].mxu0 }
 0x44c   : > { %v5550_v56 = vadd.f32 %v4945_v38, %v8779_v13  ;;  %v4947_v32 = vpop.f32.mrb[34].mxu0 }
 0x44d   : > { %5054 = vst [vmem:[%s8783_s14 + $0x100] sm:$0xff] %v5549_v12  ;;  %v5551_v57 = vadd.f32 %v4947_v32, %v8775_v48  ;;  %v4949_v24 = vpop.f32.mrb[35].mxu0 }
 0x44e   : > { %5055 = vst [vmem:[%s8783_s14 + $0x108] sm:$0xff] %v5550_v56  ;;  %v5552_v54 = vadd.f32 %v4949_v24, %v8779_v13 }
 0x44f   : > { %5056 = vst [vmem:[%s8783_s14 + $0x110] sm:$0xff] %v5551_v57 }
 0x450   : > { %5057 = vst [vmem:[%s8783_s14 + $0x118] sm:$0xff] %v5552_v54 }
 0x452   : > { %v4953_v8 = vpop.f32.mrb[36].mxu0 }
 0x453   : > { %v5553_v55 = vadd.f32 %v4953_v8, %v8775_v48  ;;  %v4955_v3 = vpop.f32.mrb[37].mxu0 }
 0x454   : > { %v5554_v7 = vadd.f32 %v4955_v3, %v8779_v13  ;;  %v4957_v39 = vpop.f32.mrb[38].mxu0 }
 0x455   : > { %5058 = vst [vmem:[%s8783_s14 + $0x120] sm:$0xff] %v5553_v55  ;;  %v5555_v34 = vadd.f32 %v4957_v39, %v8775_v48  ;;  %v4959_v58 = vpop.f32.mrb[39].mxu0 }
 0x456   : > { %5059 = vst [vmem:[%s8783_s14 + $0x128] sm:$0xff] %v5554_v7  ;;  %v5556_v60 = vadd.f32 %v4959_v58, %v8779_v13 }
 0x457   : > { %5060 = vst [vmem:[%s8783_s14 + $0x130] sm:$0xff] %v5555_v34 }
 0x458   : > { %5061 = vst [vmem:[%s8783_s14 + $0x138] sm:$0xff] %v5556_v60 }
 0x45a   : > { %v4963_v9 = vpop.f32.mrb[40].mxu0 }
 0x45b   : > { %v5557_v50 = vadd.f32 %v4963_v9, %v8775_v48  ;;  %v4965_v18 = vpop.f32.mrb[41].mxu0 }
 0x45c   : > { %v5558_v20 = vadd.f32 %v4965_v18, %v8779_v13  ;;  %v4967_v17 = vpop.f32.mrb[42].mxu0 }
 0x45d   : > { %5062 = vst [vmem:[%s8783_s14 + $0x140] sm:$0xff] %v5557_v50  ;;  %v5559_v49 = vadd.f32 %v4967_v17, %v8775_v48  ;;  %v4969_v43 = vpop.f32.mrb[43].mxu0 }
 0x45e   : > { %5063 = vst [vmem:[%s8783_s14 + $0x148] sm:$0xff] %v5558_v20  ;;  %v5560_v63 = vadd.f32 %v4969_v43, %v8779_v13 }
 0x45f   : > { %5064 = vst [vmem:[%s8783_s14 + $0x150] sm:$0xff] %v5559_v49 }
 0x460   : > { %5065 = vst [vmem:[%s8783_s14 + $0x158] sm:$0xff] %v5560_v63 }
 0x462   : > { %v4973_v62 = vpop.f32.mrb[44].mxu0 }
 0x463   : > { %v5561_v4 = vadd.f32 %v4973_v62, %v8775_v48  ;;  %v4975_v47 = vpop.f32.mrb[45].mxu0 }
 0x464   : > { %v5562_v37 = vadd.f32 %v4975_v47, %v8779_v13  ;;  %v4977_v36 = vpop.f32.mrb[46].mxu0 }
 0x465   : > { %5066 = vst [vmem:[%s8783_s14 + $0x160] sm:$0xff] %v5561_v4  ;;  %v5563_v2 = vadd.f32 %v4977_v36, %v8775_v48  ;;  %v4979_v30 = vpop.f32.mrb[47].mxu0 }
 0x466   : > { %5067 = vst [vmem:[%s8783_s14 + $0x168] sm:$0xff] %v5562_v37  ;;  %v5564_v0 = vadd.f32 %v4979_v30, %v8779_v13 }
 0x467   : > { %5068 = vst [vmem:[%s8783_s14 + $0x170] sm:$0xff] %v5563_v2 }
 0x468   : > { %5069 = vst [vmem:[%s8783_s14 + $0x178] sm:$0xff] %v5564_v0 }
 0x46a   : > { %v4983_v51 = vpop.f32.mrb[48].mxu0 }
 0x46b   : > { %v5565_v6 = vadd.f32 %v4983_v51, %v8775_v48  ;;  %v4985_v15 = vpop.f32.mrb[49].mxu0 }
 0x46c   : > { %v5566_v23 = vadd.f32 %v4985_v15, %v8779_v13  ;;  %v4987_v59 = vpop.f32.mrb[50].mxu0 }
 0x46d   : > { %5070 = vst [vmem:[%s8783_s14 + $0x180] sm:$0xff] %v5565_v6  ;;  %v5567_v42 = vadd.f32 %v4987_v59, %v8775_v48  ;;  %v4989_v28 = vpop.f32.mrb[51].mxu0 }
 0x46e   : > { %5071 = vst [vmem:[%s8783_s14 + $0x188] sm:$0xff] %v5566_v23  ;;  %v5568_v11 = vadd.f32 %v4989_v28, %v8779_v13 }
 0x46f   : > { %5072 = vst [vmem:[%s8783_s14 + $0x190] sm:$0xff] %v5567_v42 }
 0x470   : > { %5073 = vst [vmem:[%s8783_s14 + $0x198] sm:$0xff] %v5568_v11 }
 0x472   : > { %v4993_v52 = vpop.f32.mrb[52].mxu0 }
 0x473   : > { %v5569_v21 = vadd.f32 %v4993_v52, %v8775_v48  ;;  %v4995_v33 = vpop.f32.mrb[53].mxu0 }
 0x474   : > { %v5570_v1 = vadd.f32 %v4995_v33, %v8779_v13  ;;  %v4997_v27 = vpop.f32.mrb[54].mxu0 }
 0x475   : > { %5074 = vst [vmem:[%s8783_s14 + $0x1a0] sm:$0xff] %v5569_v21  ;;  %v5571_v31 = vadd.f32 %v4997_v27, %v8775_v48  ;;  %v4999_v44 = vpop.f32.mrb[55].mxu0 }
 0x476   : > { %5075 = vst [vmem:[%s8783_s14 + $0x1a8] sm:$0xff] %v5570_v1  ;;  %v5572_v29 = vadd.f32 %v4999_v44, %v8779_v13 }
 0x477   : > { %5076 = vst [vmem:[%s8783_s14 + $0x1b0] sm:$0xff] %v5571_v31 }
 0x478   : > { %5077 = vst [vmem:[%s8783_s14 + $0x1b8] sm:$0xff] %v5572_v29 }
 0x47a   : > { %v5003_v46 = vpop.f32.mrb[56].mxu0 }
 0x47b   : > { %v5573_v35 = vadd.f32 %v5003_v46, %v8775_v48  ;;  %v5005_v14 = vpop.f32.mrb[57].mxu0 }
 0x47c   : > { %v5574_v61 = vadd.f32 %v5005_v14, %v8779_v13  ;;  %v5007_v53 = vpop.f32.mrb[58].mxu0 }
 0x47d   : > { %5078 = vst [vmem:[%s8783_s14 + $0x1c0] sm:$0xff] %v5573_v35  ;;  %v5575_v45 = vadd.f32 %v5007_v53, %v8775_v48  ;;  %v5009_v26 = vpop.f32.mrb[59].mxu0 }
 0x47e   : > { %5079 = vst [vmem:[%s8783_s14 + $0x1c8] sm:$0xff] %v5574_v61  ;;  %v5576_v10 = vadd.f32 %v5009_v26, %v8779_v13 }
 0x47f   : > { %5080 = vst [vmem:[%s8783_s14 + $0x1d0] sm:$0xff] %v5575_v45 }
 0x480   : > { %5081 = vst [vmem:[%s8783_s14 + $0x1d8] sm:$0xff] %v5576_v10 }
 0x482   : > { %v5013_v25 = vpop.f32.mrb[60].mxu0 }
 0x483   : > { %v5577_v22 = vadd.f32 %v5013_v25, %v8775_v48  ;;  %v5015_v16 = vpop.f32.mrb[61].mxu0 }
 0x484   : > { %v5578_v41 = vadd.f32 %v5015_v16, %v8779_v13  ;;  %v5017_v5 = vpop.f32.mrb[62].mxu0 }
 0x485   : > { %5082 = vst [vmem:[%s8783_s14 + $0x1e0] sm:$0xff] %v5577_v22  ;;  %v5579_v19 = vadd.f32 %v5017_v5, %v8775_v48  ;;  %v5019_v40 = vpop.f32.mrb[63].mxu0 }
 0x486   : > { %5083 = vst [vmem:[%s8783_s14 + $0x1e8] sm:$0xff] %v5578_v41  ;;  %v5580_v12 = vadd.f32 %v5019_v40, %v8779_v13 }
 0x487   : > { %5084 = vst [vmem:[%s8783_s14 + $0x1f0] sm:$0xff] %v5579_v19 }
 0x488   : > { %5085 = vst [vmem:[%s8783_s14 + $0x1f8] sm:$0xff] %v5580_v12 }
 0x489   : > { %6802 = shalt.err (!%p6799_p4)
}
 0x48a   : > { %s6803_s9 = scalar_lea.hbm %s8912_s30, 8192  ;;  %s6807_s26 = scalar_lea.hbm %s8967_s5, 16384 }
 0x48b   : > { %p6804_p9 = scmp.ne.s32.totalorder %s8912_s30, %s6803_s9  ;;  %p6808_p8 = scmp.lt.u32.totalorder %s8912_s30, %s8967_s5 }
 0x48c   : > { %p6809_p13 = scmp.lt.u32.totalorder %s6807_s26, %s6803_s9  ;;  %p6811_p10 = scmp.lt.u32.totalorder %s6803_s9, %s8912_s30 }
 0x48d   : > { %p6805_p0 = pnand %p6804_p9, %p7054_p5 }
 0x48e   : > { %p6810_p6 = por %p6809_p13, %p6808_p8 }
 0x48f   : > { %p6806_p11 = pneg %p6805_p0 }
 0x490   : > { %p6812_p3 = por %p6811_p10, %p6810_p6 }
 0x492   : > { %p6813_p7 = pnand %p6812_p3, %p6806_p11 }
 0x494   : > { %6816 = shalt.err (!%p6813_p7)
}
 0x495   : > { %s6874_s11 = smov 256   ;;  %s6875_s15 = smov 16  }
 0x496   : > { %5787 = dma.vmem_to_hbm [thread:$0]  (%p7054_p5), %s8914_s13, 8192, %s8912_s30, %s5087_s22, %s6874_s11, %s6874_s11, %s6875_s15  }
 0x497 PF: > { %s5116_s16 = sand.u32 1, %s6851_s18   ;;  %p8985_p12 = scmp.ne.s32.totalorder %s8972_s25, 0 }
 0x498   : > { %p8986_p2 = scmp.ge.s32.totalorder %s6863_s21, 2  ;;  %s5117_s12 = scalar_lea.sflag [#allocation4], %s5116_s16 }
 0x49a   : > { %p5804_p1 = pnand %p8986_p2, %p8985_p12 }
 0x49c   : > { %6846 = dma.done.wait (!%p5804_p1), %s5117_s12, 8192  }
 0x49d   : > { %6848 = vsyncadd (!%p5804_p1), %s5117_s12, 4294959104  ;;  %p20_p4 = scmp.ge.s32.totalorder %s7040_s28, 4   ;;  %s8987_s18 = smov %s6855_s19 }
 0x49e   : > { %s8988_s19 = smov %s6859_s20  ;;  %s8989_s20 = smov %s7050_s27 }
 0x49f   : > { %s8990_s21 = smov %s7040_s28  ;;  %22 = sbr.rel (!%p20_p4) target bundleno = 7 (0x7), region = 97 }
 0x4a6   :  { %5122 = vsyncpa [#allocation3], 1 }
 0x4a7   :  { %5124 = vsyncpa [#allocation3 + $0x1], 1 }
 0x4a8   :  { %5125 = vsyncpa [#allocation6], 1 }
 0x4a9   :  { %5126 = vsyncpa [#allocation9], 1 }
 0x4aa   :  { %5127 = vsyncpa [#allocation4], 1 }
 0x4ab   :  { %5129 = vsyncpa [#allocation4 + $0x1], 1 }

</bundles_post_ra>
